<compile_context>
chip_gen: v7x
topology: tpu7x:2x2x1
jax: 0.10.0
libtpu: 0.0.40
codegen_flags: <defaults>
</compile_context>

<pallas_src>
import functools

import jax
import jax.numpy as jnp
import numpy as np
from jax.experimental import pallas as pl
from jax.experimental.pallas import tpu as pltpu

# small, lane-friendly sizes consistent with the module's forward
VOCAB = 128
EMBED_DIM = 128
HIDDEN_DIM = 128
BATCH = 2
SRC_LEN = 8
TGT_LEN = 6


def _lstm_update(gates, c, H):
    # PyTorch gate order: i, f, g, o
    i_g = jax.nn.sigmoid(gates[:, 0:H])
    f_g = jax.nn.sigmoid(gates[:, H:2 * H])
    g_g = jnp.tanh(gates[:, 2 * H:3 * H])
    o_g = jax.nn.sigmoid(gates[:, 3 * H:4 * H])
    c_new = f_g * c + i_g * g_g
    h_new = o_g * jnp.tanh(c_new)
    return h_new, c_new


# ---------------------------------------------------------------------------
# Fused seq2seq kernel.
# inputs (time-major flat where relevant, all fully resident in VMEM):
#   src_emb  [S*B, E]   (row = s*B + b)
#   dec_emb  [(T-1)*B, E]
#   enc_wih [E,4H], enc_whh [H,4H], enc_b [1,4H]
#   attn_w [2H,H] (rows 0:H multiply hidden, H:2H multiply encoder outs),
#   attn_b [1,H], attn_v [1,H]
#   dec_wih_e [E,4H], dec_w_ch [2H,4H] (= concat(W_ih_ctx, W_hh)), dec_b [1,4H]
#   fc_w [H,V], fc_b [1,V]
# output: logits_flat [(T-1)*B, V]  (row = t*B + b)
# ---------------------------------------------------------------------------
def seq2seq_kernel(src_emb_ref, dec_emb_ref,
                   enc_wih_ref, enc_whh_ref, enc_b_ref,
                   attn_w_ref, attn_b_ref, attn_v_ref,
                   dec_wih_e_ref, dec_w_ch_ref, dec_b_ref,
                   fc_w_ref, fc_b_ref,
                   out_ref,
                   enc_scr,
                   *, B, S, Tm1, H):
    f32 = jnp.float32

    # ---------------- encoder ----------------
    # hoisted input projection for all S steps: one [S*B,E]@[E,4H] matmul (+ bias)
    xp_enc = (jnp.dot(src_emb_ref[...], enc_wih_ref[...],
                      preferred_element_type=f32) + enc_b_ref[...])          # [S*B,4H]
    whh = enc_whh_ref[...]

    h = jnp.zeros((B, H), f32)
    c = jnp.zeros((B, H), f32)
    for s in range(S):                       # static unroll; only h @ W_hh per step
        gates = (xp_enc[s * B:(s + 1) * B, :]
                 + jnp.dot(h, whh, preferred_element_type=f32))
        h, c = _lstm_update(gates, c, H)
        enc_scr[:, s:s + 1, :] = h[:, None, :]       # batch-major [B, S, H]

    enc_bsh = enc_scr[...]                   # [B, S, H]
    enc_2d = enc_bsh.reshape(B * S, H)       # layout-preserving reshape (row = b*S+s)

    # ------- attention precompute (invariant across target steps) -------
    wa_h = attn_w_ref[0:H, :]                # multiplies the (repeated) hidden state
    wa_e = attn_w_ref[H:2 * H, :]            # multiplies the encoder outputs
    part_e = (jnp.dot(enc_2d, wa_e, preferred_element_type=f32)
              .reshape(B, S, H) + attn_b_ref[...])                           # [B,S,H]
    v = attn_v_ref[...]                      # [1, H]

    # decoder input projections for ALL T-1 steps (teacher forcing) in one matmul
    xp_dec = (jnp.dot(dec_emb_ref[...], dec_wih_e_ref[...],
                      preferred_element_type=f32) + dec_b_ref[...])          # [(T-1)*B,4H]
    w_ch = dec_w_ch_ref[...]                 # [2H, 4H]

    # ---------------- decoder ----------------
    h_steps = []
    for t in range(Tm1):                     # static unroll
        # attention: energy = tanh(h@Wa_h + enc@Wa_e + b); scores = energy . v
        part_h = jnp.dot(h, wa_h, preferred_element_type=f32)                # [B,H]
        energy = jnp.tanh(part_h[:, None, :] + part_e)                       # [B,S,H]
        scores = jnp.sum(energy * v, axis=-1)                                # [B,S]
        scores = scores - jnp.max(scores, axis=-1, keepdims=True)
        p = jnp.exp(scores)
        aw = p * pl.reciprocal(jnp.sum(p, axis=-1, keepdims=True), approx=True)
        context = jnp.sum(aw[:, :, None] * enc_bsh, axis=1)                  # [B,H]

        # LSTMCell: single fused [B,2H]@[2H,4H] gate matmul per step
        ch = jnp.concatenate([context, h], axis=1)                           # [B,2H]
        gates = (xp_dec[t * B:(t + 1) * B, :]
                 + jnp.dot(ch, w_ch, preferred_element_type=f32))
        h, c = _lstm_update(gates, c, H)
        h_steps.append(h)

    # ------------- batched fc projection (one matmul, lane-dense store) -------------
    h_all = jnp.concatenate(h_steps, axis=0)                                 # [(T-1)*B,H]
    out_ref[...] = (jnp.dot(h_all, fc_w_ref[...], preferred_element_type=f32)
                    + fc_b_ref[...])


# ---------------------------------------------------------------------------
# Full forward (embedding gathers + one tiny final transpose are plain-JAX glue)
# ---------------------------------------------------------------------------
@jax.jit
def seq2seq_forward(src, tgt, params):
    emb = params['embed']
    B, S = src.shape
    Tm1 = tgt.shape[1] - 1
    H = params['enc_whh'].shape[0]
    V = params['fc_w'].shape[1]

    # time-major flat gathers (row = step*B + b) -> no activation transposes needed
    src_emb_flat = emb[src.T.reshape(-1)]                 # [S*B, E]
    dec_emb_flat = emb[tgt[:, :Tm1].T.reshape(-1)]        # [(T-1)*B, E]

    # stack the decoder's context / hidden weights so each step needs one matmul
    dec_w_ch = jnp.concatenate([params['dec_wih_c'], params['dec_whh']], axis=0)

    vmem_spec = pl.BlockSpec(memory_space=pltpu.MemorySpace.VMEM)
    kernel = functools.partial(seq2seq_kernel, B=B, S=S, Tm1=Tm1, H=H)

    out_flat = pl.pallas_call(
        kernel,
        out_shape=jax.ShapeDtypeStruct((Tm1 * B, V), jnp.float32),
        in_specs=[vmem_spec] * 13,
        out_specs=vmem_spec,
        scratch_shapes=[pltpu.VMEM((B, S, H), jnp.float32)],
    )(src_emb_flat, dec_emb_flat,
      params['enc_wih'], params['enc_whh'], params['enc_b'],
      params['attn_w'], params['attn_b'], params['attn_v'],
      params['dec_wih_e'], dec_w_ch, params['dec_b'],
      params['fc_w'], params['fc_b'])

    # [(T-1)*B, V] (time-major flat) -> [B, T-1, V]
    return out_flat.reshape(Tm1, B, V).transpose(1, 0, 2)


# ---------------------------------------------------------------------------
# Pure-JAX reference (mirrors the PyTorch forward) for verification
# ---------------------------------------------------------------------------
def ref_forward(src, tgt, p):
    emb = p['embed']
    H = HIDDEN_DIM
    src_emb = emb[src]
    B, S, _ = src_emb.shape

    def lstm_step(x, h, c, wih, whh, b):
        g = x @ wih + h @ whh + b
        i = jax.nn.sigmoid(g[:, :H]); f = jax.nn.sigmoid(g[:, H:2 * H])
        gg = jnp.tanh(g[:, 2 * H:3 * H]); o = jax.nn.sigmoid(g[:, 3 * H:])
        c = f * c + i * gg
        return o * jnp.tanh(c), c

    h = jnp.zeros((B, H), jnp.float32)
    c = jnp.zeros((B, H), jnp.float32)
    enc_list = []
    for t in range(S):
        h, c = lstm_step(src_emb[:, t, :], h, c, p['enc_wih'], p['enc_whh'], p['enc_b'])
        enc_list.append(h)
    enc = jnp.stack(enc_list, axis=1)                   # [B, S, H]

    dec_wih = jnp.concatenate([p['dec_wih_e'], p['dec_wih_c']], axis=0)
    hd, cd = h, c
    dec_in = emb[tgt[:, 0]]
    outs = []
    for t in range(1, tgt.shape[1]):
        hrep = jnp.repeat(hd[:, None, :], S, axis=1)
        energy = jnp.tanh(jnp.concatenate([hrep, enc], axis=2) @ p['attn_w'] + p['attn_b'])
        scores = jnp.einsum('h,bsh->bs', p['attn_v'][0], energy)
        aw = jax.nn.softmax(scores, axis=1)
        context = jnp.einsum('bs,bsh->bh', aw, enc)
        x = jnp.concatenate([dec_in, context], axis=1)
        hd, cd = lstm_step(x, hd, cd, dec_wih, p['dec_whh'], p['dec_b'])
        outs.append(hd @ p['fc_w'] + p['fc_b'])
        dec_in = emb[tgt[:, t]]
    return jnp.stack(outs, axis=1)


# ---------------------------------------------------------------------------
def init_params(key):
    keys = jax.random.split(key, 12)
    E, H, V = EMBED_DIM, HIDDEN_DIM, VOCAB
    u = lambda k, shape, s: jax.random.uniform(k, shape, jnp.float32, -s, s)
    return {
        'embed':     jax.random.normal(keys[0], (V, E), jnp.float32) * 0.1,
        # encoder LSTM (weights stored transposed: [in, 4H]); b = b_ih + b_hh
        'enc_wih':   u(keys[1], (E, 4 * H), 0.05),
        'enc_whh':   u(keys[2], (H, 4 * H), 0.05),
        'enc_b':     u(keys[3], (1, 4 * H), 0.05),
        # attention: Linear(2H -> H) stored transposed [2H, H]; v [1, H]
        'attn_w':    u(keys[4], (2 * H, H), 0.05),
        'attn_b':    u(keys[5], (1, H), 0.05),
        'attn_v':    jax.random.uniform(keys[6], (1, H), jnp.float32, 0.0, 1.0),
        # decoder LSTMCell on [E + H] input, W_ih split into embed part / context part
        'dec_wih_e': u(keys[7], (E, 4 * H), 0.05),
        'dec_wih_c': u(keys[8], (H, 4 * H), 0.05),
        'dec_whh':   u(keys[9], (H, 4 * H), 0.05),
        'dec_b':     u(keys[10], (1, 4 * H), 0.05),
        # fc: Linear(H -> V) stored transposed [H, V]
        'fc_w':      u(keys[11], (H, V), 0.05),
        'fc_b':      jnp.zeros((1, V), jnp.float32),
    }


if __name__ == "__main__":
    key = jax.random.PRNGKey(0)
    kp, ks, kt = jax.random.split(key, 3)
    params = init_params(kp)

    src = jax.random.randint(ks, (BATCH, SRC_LEN), 0, VOCAB, dtype=jnp.int32)
    tgt = jax.random.randint(kt, (BATCH, TGT_LEN), 0, VOCAB, dtype=jnp.int32)

    out = seq2seq_forward(src, tgt, params)
    out = jax.block_until_ready(out)
    assert out.shape == (BATCH, TGT_LEN - 1, VOCAB), out.shape

    ref = jax.block_until_ready(ref_forward(src, tgt, params))
    np.testing.assert_allclose(np.asarray(out), np.asarray(ref), rtol=2e-2, atol=2e-2)

    print("KERNEL_OK")
</pallas_src>

<mosaic_0001>
module attributes {stable_mosaic.version = 11 : i64} {
  func.func @seq2seq_kernel(%arg0: memref<16x128xf32, #tpu.memory_space<vmem>>, %arg1: memref<10x128xf32, #tpu.memory_space<vmem>>, %arg2: memref<128x512xf32, #tpu.memory_space<vmem>>, %arg3: memref<128x512xf32, #tpu.memory_space<vmem>>, %arg4: memref<1x512xf32, #tpu.memory_space<vmem>>, %arg5: memref<256x128xf32, #tpu.memory_space<vmem>>, %arg6: memref<1x128xf32, #tpu.memory_space<vmem>>, %arg7: memref<1x128xf32, #tpu.memory_space<vmem>>, %arg8: memref<128x512xf32, #tpu.memory_space<vmem>>, %arg9: memref<256x512xf32, #tpu.memory_space<vmem>>, %arg10: memref<1x512xf32, #tpu.memory_space<vmem>>, %arg11: memref<128x128xf32, #tpu.memory_space<vmem>>, %arg12: memref<1x128xf32, #tpu.memory_space<vmem>>, %arg13: memref<10x128xf32, #tpu.memory_space<vmem>>, %arg14: memref<2x8x128xf32, #tpu.memory_space<vmem>>) attributes {dimension_semantics = [], scalar_prefetch = 0 : i64, scratch_operands = 1 : i64, tpu.core_type = #tpu.core_type<tc>} {
    %c0 = arith.constant 0 : index
    %c0_0 = arith.constant 0 : index
    %0 = vector.load %arg0[%c0, %c0_0] : memref<16x128xf32, #tpu.memory_space<vmem>>, vector<16x128xf32>
    %c0_1 = arith.constant 0 : index
    %c0_2 = arith.constant 0 : index
    %1 = vector.load %arg2[%c0_1, %c0_2] : memref<128x512xf32, #tpu.memory_space<vmem>>, vector<128x512xf32>
    %cst = arith.constant dense<0.000000e+00> : vector<16x512xf32>
    %2 = tpu.matmul %0, %1, %cst {dimension_numbers = #tpu.dot_dimension_numbers<[1], [0], [0], [1], [0, 0, 1, 1], [], []>} : vector<16x128xf32>, vector<128x512xf32>, vector<16x512xf32> -> vector<16x512xf32>
    %c0_3 = arith.constant 0 : index
    %c0_4 = arith.constant 0 : index
    %3 = vector.load %arg4[%c0_3, %c0_4] : memref<1x512xf32, #tpu.memory_space<vmem>>, vector<1x512xf32>
    %4 = vector.broadcast %3 : vector<1x512xf32> to vector<16x512xf32>
    %5 = arith.addf %2, %4 : vector<16x512xf32>
    %c0_5 = arith.constant 0 : index
    %c0_6 = arith.constant 0 : index
    %6 = vector.load %arg3[%c0_5, %c0_6] : memref<128x512xf32, #tpu.memory_space<vmem>>, vector<128x512xf32>
    %cst_7 = arith.constant 0.000000e+00 : f32
    %7 = vector.broadcast %cst_7 : f32 to vector<2x128xf32>
    %cst_8 = arith.constant 0.000000e+00 : f32
    %8 = vector.broadcast %cst_8 : f32 to vector<2x128xf32>
    %9 = vector.extract_strided_slice %5 {offsets = [0, 0], sizes = [2, 512], strides = [1, 1]} : vector<16x512xf32> to vector<2x512xf32>
    %cst_9 = arith.constant dense<0.000000e+00> : vector<2x512xf32>
    %10 = tpu.matmul %7, %6, %cst_9 {dimension_numbers = #tpu.dot_dimension_numbers<[1], [0], [0], [1], [0, 0, 1, 1], [], []>} : vector<2x128xf32>, vector<128x512xf32>, vector<2x512xf32> -> vector<2x512xf32>
    %11 = arith.addf %9, %10 : vector<2x512xf32>
    %12 = vector.extract_strided_slice %11 {offsets = [0, 0], sizes = [2, 128], strides = [1, 1]} : vector<2x512xf32> to vector<2x128xf32>
    %13 = arith.negf %12 : vector<2x128xf32>
    %14 = math.exp %13 : vector<2x128xf32>
    %cst_10 = arith.constant 1.000000e+00 : f32
    %15 = vector.broadcast %cst_10 : f32 to vector<2x128xf32>
    %16 = arith.addf %15, %14 : vector<2x128xf32>
    %17 = arith.divf %15, %16 : vector<2x128xf32>
    %18 = vector.extract_strided_slice %11 {offsets = [0, 128], sizes = [2, 128], strides = [1, 1]} : vector<2x512xf32> to vector<2x128xf32>
    %19 = arith.negf %18 : vector<2x128xf32>
    %20 = math.exp %19 : vector<2x128xf32>
    %cst_11 = arith.constant 1.000000e+00 : f32
    %21 = vector.broadcast %cst_11 : f32 to vector<2x128xf32>
    %22 = arith.addf %21, %20 : vector<2x128xf32>
    %23 = arith.divf %21, %22 : vector<2x128xf32>
    %24 = vector.extract_strided_slice %11 {offsets = [0, 256], sizes = [2, 128], strides = [1, 1]} : vector<2x512xf32> to vector<2x128xf32>
    %25 = math.tanh %24 : vector<2x128xf32>
    %26 = vector.extract_strided_slice %11 {offsets = [0, 384], sizes = [2, 128], strides = [1, 1]} : vector<2x512xf32> to vector<2x128xf32>
    %27 = arith.negf %26 : vector<2x128xf32>
    %28 = math.exp %27 : vector<2x128xf32>
    %cst_12 = arith.constant 1.000000e+00 : f32
    %29 = vector.broadcast %cst_12 : f32 to vector<2x128xf32>
    %30 = arith.addf %29, %28 : vector<2x128xf32>
    %31 = arith.divf %29, %30 : vector<2x128xf32>
    %32 = arith.mulf %23, %8 : vector<2x128xf32>
    %33 = arith.mulf %17, %25 : vector<2x128xf32>
    %34 = arith.addf %32, %33 : vector<2x128xf32>
    %35 = math.tanh %34 : vector<2x128xf32>
    %36 = arith.mulf %31, %35 : vector<2x128xf32>
    %37 = vector.shape_cast %36 : vector<2x128xf32> to vector<2x1x128xf32>
    %c0_13 = arith.constant 0 : index
    %c0_14 = arith.constant 0 : index
    %c0_15 = arith.constant 0 : index
    %38 = vector.load %arg14[%c0_13, %c0_14, %c0_15] : memref<2x8x128xf32, #tpu.memory_space<vmem>>, vector<2x1x128xf32>
    tpu.vector_store %arg14[%c0_13, %c0_14, %c0_15], %37 {strides = array<i32>} : memref<2x8x128xf32, #tpu.memory_space<vmem>>, vector<2x1x128xf32>,
    %39 = vector.extract_strided_slice %5 {offsets = [2, 0], sizes = [2, 512], strides = [1, 1]} : vector<16x512xf32> to vector<2x512xf32>
    %cst_16 = arith.constant dense<0.000000e+00> : vector<2x512xf32>
    %40 = tpu.matmul %36, %6, %cst_16 {dimension_numbers = #tpu.dot_dimension_numbers<[1], [0], [0], [1], [0, 0, 1, 1], [], []>} : vector<2x128xf32>, vector<128x512xf32>, vector<2x512xf32> -> vector<2x512xf32>
    %41 = arith.addf %39, %40 : vector<2x512xf32>
    %42 = vector.extract_strided_slice %41 {offsets = [0, 0], sizes = [2, 128], strides = [1, 1]} : vector<2x512xf32> to vector<2x128xf32>
    %43 = arith.negf %42 : vector<2x128xf32>
    %44 = math.exp %43 : vector<2x128xf32>
    %cst_17 = arith.constant 1.000000e+00 : f32
    %45 = vector.broadcast %cst_17 : f32 to vector<2x128xf32>
    %46 = arith.addf %45, %44 : vector<2x128xf32>
    %47 = arith.divf %45, %46 : vector<2x128xf32>
    %48 = vector.extract_strided_slice %41 {offsets = [0, 128], sizes = [2, 128], strides = [1, 1]} : vector<2x512xf32> to vector<2x128xf32>
    %49 = arith.negf %48 : vector<2x128xf32>
    %50 = math.exp %49 : vector<2x128xf32>
    %cst_18 = arith.constant 1.000000e+00 : f32
    %51 = vector.broadcast %cst_18 : f32 to vector<2x128xf32>
    %52 = arith.addf %51, %50 : vector<2x128xf32>
    %53 = arith.divf %51, %52 : vector<2x128xf32>
    %54 = vector.extract_strided_slice %41 {offsets = [0, 256], sizes = [2, 128], strides = [1, 1]} : vector<2x512xf32> to vector<2x128xf32>
    %55 = math.tanh %54 : vector<2x128xf32>
    %56 = vector.extract_strided_slice %41 {offsets = [0, 384], sizes = [2, 128], strides = [1, 1]} : vector<2x512xf32> to vector<2x128xf32>
    %57 = arith.negf %56 : vector<2x128xf32>
    %58 = math.exp %57 : vector<2x128xf32>
    %cst_19 = arith.constant 1.000000e+00 : f32
    %59 = vector.broadcast %cst_19 : f32 to vector<2x128xf32>
    %60 = arith.addf %59, %58 : vector<2x128xf32>
    %61 = arith.divf %59, %60 : vector<2x128xf32>
    %62 = arith.mulf %53, %34 : vector<2x128xf32>
    %63 = arith.mulf %47, %55 : vector<2x128xf32>
    %64 = arith.addf %62, %63 : vector<2x128xf32>
    %65 = math.tanh %64 : vector<2x128xf32>
    %66 = arith.mulf %61, %65 : vector<2x128xf32>
    %67 = vector.shape_cast %66 : vector<2x128xf32> to vector<2x1x128xf32>
    %c0_20 = arith.constant 0 : index
    %c1 = arith.constant 1 : index
    %c0_21 = arith.constant 0 : index
    %68 = vector.load %arg14[%c0_20, %c1, %c0_21] : memref<2x8x128xf32, #tpu.memory_space<vmem>>, vector<2x1x128xf32>
    tpu.vector_store %arg14[%c0_20, %c1, %c0_21], %67 {strides = array<i32>} : memref<2x8x128xf32, #tpu.memory_space<vmem>>, vector<2x1x128xf32>,
    %69 = vector.extract_strided_slice %5 {offsets = [4, 0], sizes = [2, 512], strides = [1, 1]} : vector<16x512xf32> to vector<2x512xf32>
    %cst_22 = arith.constant dense<0.000000e+00> : vector<2x512xf32>
    %70 = tpu.matmul %66, %6, %cst_22 {dimension_numbers = #tpu.dot_dimension_numbers<[1], [0], [0], [1], [0, 0, 1, 1], [], []>} : vector<2x128xf32>, vector<128x512xf32>, vector<2x512xf32> -> vector<2x512xf32>
    %71 = arith.addf %69, %70 : vector<2x512xf32>
    %72 = vector.extract_strided_slice %71 {offsets = [0, 0], sizes = [2, 128], strides = [1, 1]} : vector<2x512xf32> to vector<2x128xf32>
    %73 = arith.negf %72 : vector<2x128xf32>
    %74 = math.exp %73 : vector<2x128xf32>
    %cst_23 = arith.constant 1.000000e+00 : f32
    %75 = vector.broadcast %cst_23 : f32 to vector<2x128xf32>
    %76 = arith.addf %75, %74 : vector<2x128xf32>
    %77 = arith.divf %75, %76 : vector<2x128xf32>
    %78 = vector.extract_strided_slice %71 {offsets = [0, 128], sizes = [2, 128], strides = [1, 1]} : vector<2x512xf32> to vector<2x128xf32>
    %79 = arith.negf %78 : vector<2x128xf32>
    %80 = math.exp %79 : vector<2x128xf32>
    %cst_24 = arith.constant 1.000000e+00 : f32
    %81 = vector.broadcast %cst_24 : f32 to vector<2x128xf32>
    %82 = arith.addf %81, %80 : vector<2x128xf32>
    %83 = arith.divf %81, %82 : vector<2x128xf32>
    %84 = vector.extract_strided_slice %71 {offsets = [0, 256], sizes = [2, 128], strides = [1, 1]} : vector<2x512xf32> to vector<2x128xf32>
    %85 = math.tanh %84 : vector<2x128xf32>
    %86 = vector.extract_strided_slice %71 {offsets = [0, 384], sizes = [2, 128], strides = [1, 1]} : vector<2x512xf32> to vector<2x128xf32>
    %87 = arith.negf %86 : vector<2x128xf32>
    %88 = math.exp %87 : vector<2x128xf32>
    %cst_25 = arith.constant 1.000000e+00 : f32
    %89 = vector.broadcast %cst_25 : f32 to vector<2x128xf32>
    %90 = arith.addf %89, %88 : vector<2x128xf32>
    %91 = arith.divf %89, %90 : vector<2x128xf32>
    %92 = arith.mulf %83, %64 : vector<2x128xf32>
    %93 = arith.mulf %77, %85 : vector<2x128xf32>
    %94 = arith.addf %92, %93 : vector<2x128xf32>
    %95 = math.tanh %94 : vector<2x128xf32>
    %96 = arith.mulf %91, %95 : vector<2x128xf32>
    %97 = vector.shape_cast %96 : vector<2x128xf32> to vector<2x1x128xf32>
    %c0_26 = arith.constant 0 : index
    %c2 = arith.constant 2 : index
    %c0_27 = arith.constant 0 : index
    %98 = vector.load %arg14[%c0_26, %c2, %c0_27] : memref<2x8x128xf32, #tpu.memory_space<vmem>>, vector<2x1x128xf32>
    tpu.vector_store %arg14[%c0_26, %c2, %c0_27], %97 {strides = array<i32>} : memref<2x8x128xf32, #tpu.memory_space<vmem>>, vector<2x1x128xf32>,
    %99 = vector.extract_strided_slice %5 {offsets = [6, 0], sizes = [2, 512], strides = [1, 1]} : vector<16x512xf32> to vector<2x512xf32>
    %cst_28 = arith.constant dense<0.000000e+00> : vector<2x512xf32>
    %100 = tpu.matmul %96, %6, %cst_28 {dimension_numbers = #tpu.dot_dimension_numbers<[1], [0], [0], [1], [0, 0, 1, 1], [], []>} : vector<2x128xf32>, vector<128x512xf32>, vector<2x512xf32> -> vector<2x512xf32>
    %101 = arith.addf %99, %100 : vector<2x512xf32>
    %102 = vector.extract_strided_slice %101 {offsets = [0, 0], sizes = [2, 128], strides = [1, 1]} : vector<2x512xf32> to vector<2x128xf32>
    %103 = arith.negf %102 : vector<2x128xf32>
    %104 = math.exp %103 : vector<2x128xf32>
    %cst_29 = arith.constant 1.000000e+00 : f32
    %105 = vector.broadcast %cst_29 : f32 to vector<2x128xf32>
    %106 = arith.addf %105, %104 : vector<2x128xf32>
    %107 = arith.divf %105, %106 : vector<2x128xf32>
    %108 = vector.extract_strided_slice %101 {offsets = [0, 128], sizes = [2, 128], strides = [1, 1]} : vector<2x512xf32> to vector<2x128xf32>
    %109 = arith.negf %108 : vector<2x128xf32>
    %110 = math.exp %109 : vector<2x128xf32>
    %cst_30 = arith.constant 1.000000e+00 : f32
    %111 = vector.broadcast %cst_30 : f32 to vector<2x128xf32>
    %112 = arith.addf %111, %110 : vector<2x128xf32>
    %113 = arith.divf %111, %112 : vector<2x128xf32>
    %114 = vector.extract_strided_slice %101 {offsets = [0, 256], sizes = [2, 128], strides = [1, 1]} : vector<2x512xf32> to vector<2x128xf32>
    %115 = math.tanh %114 : vector<2x128xf32>
    %116 = vector.extract_strided_slice %101 {offsets = [0, 384], sizes = [2, 128], strides = [1, 1]} : vector<2x512xf32> to vector<2x128xf32>
    %117 = arith.negf %116 : vector<2x128xf32>
    %118 = math.exp %117 : vector<2x128xf32>
    %cst_31 = arith.constant 1.000000e+00 : f32
    %119 = vector.broadcast %cst_31 : f32 to vector<2x128xf32>
    %120 = arith.addf %119, %118 : vector<2x128xf32>
    %121 = arith.divf %119, %120 : vector<2x128xf32>
    %122 = arith.mulf %113, %94 : vector<2x128xf32>
    %123 = arith.mulf %107, %115 : vector<2x128xf32>
    %124 = arith.addf %122, %123 : vector<2x128xf32>
    %125 = math.tanh %124 : vector<2x128xf32>
    %126 = arith.mulf %121, %125 : vector<2x128xf32>
    %127 = vector.shape_cast %126 : vector<2x128xf32> to vector<2x1x128xf32>
    %c0_32 = arith.constant 0 : index
    %c3 = arith.constant 3 : index
    %c0_33 = arith.constant 0 : index
    %128 = vector.load %arg14[%c0_32, %c3, %c0_33] : memref<2x8x128xf32, #tpu.memory_space<vmem>>, vector<2x1x128xf32>
    tpu.vector_store %arg14[%c0_32, %c3, %c0_33], %127 {strides = array<i32>} : memref<2x8x128xf32, #tpu.memory_space<vmem>>, vector<2x1x128xf32>,
    %129 = vector.extract_strided_slice %5 {offsets = [8, 0], sizes = [2, 512], strides = [1, 1]} : vector<16x512xf32> to vector<2x512xf32>
    %cst_34 = arith.constant dense<0.000000e+00> : vector<2x512xf32>
    %130 = tpu.matmul %126, %6, %cst_34 {dimension_numbers = #tpu.dot_dimension_numbers<[1], [0], [0], [1], [0, 0, 1, 1], [], []>} : vector<2x128xf32>, vector<128x512xf32>, vector<2x512xf32> -> vector<2x512xf32>
    %131 = arith.addf %129, %130 : vector<2x512xf32>
    %132 = vector.extract_strided_slice %131 {offsets = [0, 0], sizes = [2, 128], strides = [1, 1]} : vector<2x512xf32> to vector<2x128xf32>
    %133 = arith.negf %132 : vector<2x128xf32>
    %134 = math.exp %133 : vector<2x128xf32>
    %cst_35 = arith.constant 1.000000e+00 : f32
    %135 = vector.broadcast %cst_35 : f32 to vector<2x128xf32>
    %136 = arith.addf %135, %134 : vector<2x128xf32>
    %137 = arith.divf %135, %136 : vector<2x128xf32>
    %138 = vector.extract_strided_slice %131 {offsets = [0, 128], sizes = [2, 128], strides = [1, 1]} : vector<2x512xf32> to vector<2x128xf32>
    %139 = arith.negf %138 : vector<2x128xf32>
    %140 = math.exp %139 : vector<2x128xf32>
    %cst_36 = arith.constant 1.000000e+00 : f32
    %141 = vector.broadcast %cst_36 : f32 to vector<2x128xf32>
    %142 = arith.addf %141, %140 : vector<2x128xf32>
    %143 = arith.divf %141, %142 : vector<2x128xf32>
    %144 = vector.extract_strided_slice %131 {offsets = [0, 256], sizes = [2, 128], strides = [1, 1]} : vector<2x512xf32> to vector<2x128xf32>
    %145 = math.tanh %144 : vector<2x128xf32>
    %146 = vector.extract_strided_slice %131 {offsets = [0, 384], sizes = [2, 128], strides = [1, 1]} : vector<2x512xf32> to vector<2x128xf32>
    %147 = arith.negf %146 : vector<2x128xf32>
    %148 = math.exp %147 : vector<2x128xf32>
    %cst_37 = arith.constant 1.000000e+00 : f32
    %149 = vector.broadcast %cst_37 : f32 to vector<2x128xf32>
    %150 = arith.addf %149, %148 : vector<2x128xf32>
    %151 = arith.divf %149, %150 : vector<2x128xf32>
    %152 = arith.mulf %143, %124 : vector<2x128xf32>
    %153 = arith.mulf %137, %145 : vector<2x128xf32>
    %154 = arith.addf %152, %153 : vector<2x128xf32>
    %155 = math.tanh %154 : vector<2x128xf32>
    %156 = arith.mulf %151, %155 : vector<2x128xf32>
    %157 = vector.shape_cast %156 : vector<2x128xf32> to vector<2x1x128xf32>
    %c0_38 = arith.constant 0 : index
    %c4 = arith.constant 4 : index
    %c0_39 = arith.constant 0 : index
    %158 = vector.load %arg14[%c0_38, %c4, %c0_39] : memref<2x8x128xf32, #tpu.memory_space<vmem>>, vector<2x1x128xf32>
    tpu.vector_store %arg14[%c0_38, %c4, %c0_39], %157 {strides = array<i32>} : memref<2x8x128xf32, #tpu.memory_space<vmem>>, vector<2x1x128xf32>,
    %159 = vector.extract_strided_slice %5 {offsets = [10, 0], sizes = [2, 512], strides = [1, 1]} : vector<16x512xf32> to vector<2x512xf32>
    %cst_40 = arith.constant dense<0.000000e+00> : vector<2x512xf32>
    %160 = tpu.matmul %156, %6, %cst_40 {dimension_numbers = #tpu.dot_dimension_numbers<[1], [0], [0], [1], [0, 0, 1, 1], [], []>} : vector<2x128xf32>, vector<128x512xf32>, vector<2x512xf32> -> vector<2x512xf32>
    %161 = arith.addf %159, %160 : vector<2x512xf32>
    %162 = vector.extract_strided_slice %161 {offsets = [0, 0], sizes = [2, 128], strides = [1, 1]} : vector<2x512xf32> to vector<2x128xf32>
    %163 = arith.negf %162 : vector<2x128xf32>
    %164 = math.exp %163 : vector<2x128xf32>
    %cst_41 = arith.constant 1.000000e+00 : f32
    %165 = vector.broadcast %cst_41 : f32 to vector<2x128xf32>
    %166 = arith.addf %165, %164 : vector<2x128xf32>
    %167 = arith.divf %165, %166 : vector<2x128xf32>
    %168 = vector.extract_strided_slice %161 {offsets = [0, 128], sizes = [2, 128], strides = [1, 1]} : vector<2x512xf32> to vector<2x128xf32>
    %169 = arith.negf %168 : vector<2x128xf32>
    %170 = math.exp %169 : vector<2x128xf32>
    %cst_42 = arith.constant 1.000000e+00 : f32
    %171 = vector.broadcast %cst_42 : f32 to vector<2x128xf32>
    %172 = arith.addf %171, %170 : vector<2x128xf32>
    %173 = arith.divf %171, %172 : vector<2x128xf32>
    %174 = vector.extract_strided_slice %161 {offsets = [0, 256], sizes = [2, 128], strides = [1, 1]} : vector<2x512xf32> to vector<2x128xf32>
    %175 = math.tanh %174 : vector<2x128xf32>
    %176 = vector.extract_strided_slice %161 {offsets = [0, 384], sizes = [2, 128], strides = [1, 1]} : vector<2x512xf32> to vector<2x128xf32>
    %177 = arith.negf %176 : vector<2x128xf32>
    %178 = math.exp %177 : vector<2x128xf32>
    %cst_43 = arith.constant 1.000000e+00 : f32
    %179 = vector.broadcast %cst_43 : f32 to vector<2x128xf32>
    %180 = arith.addf %179, %178 : vector<2x128xf32>
    %181 = arith.divf %179, %180 : vector<2x128xf32>
    %182 = arith.mulf %173, %154 : vector<2x128xf32>
    %183 = arith.mulf %167, %175 : vector<2x128xf32>
    %184 = arith.addf %182, %183 : vector<2x128xf32>
    %185 = math.tanh %184 : vector<2x128xf32>
    %186 = arith.mulf %181, %185 : vector<2x128xf32>
    %187 = vector.shape_cast %186 : vector<2x128xf32> to vector<2x1x128xf32>
    %c0_44 = arith.constant 0 : index
    %c5 = arith.constant 5 : index
    %c0_45 = arith.constant 0 : index
    %188 = vector.load %arg14[%c0_44, %c5, %c0_45] : memref<2x8x128xf32, #tpu.memory_space<vmem>>, vector<2x1x128xf32>
    tpu.vector_store %arg14[%c0_44, %c5, %c0_45], %187 {strides = array<i32>} : memref<2x8x128xf32, #tpu.memory_space<vmem>>, vector<2x1x128xf32>,
    %189 = vector.extract_strided_slice %5 {offsets = [12, 0], sizes = [2, 512], strides = [1, 1]} : vector<16x512xf32> to vector<2x512xf32>
    %cst_46 = arith.constant dense<0.000000e+00> : vector<2x512xf32>
    %190 = tpu.matmul %186, %6, %cst_46 {dimension_numbers = #tpu.dot_dimension_numbers<[1], [0], [0], [1], [0, 0, 1, 1], [], []>} : vector<2x128xf32>, vector<128x512xf32>, vector<2x512xf32> -> vector<2x512xf32>
    %191 = arith.addf %189, %190 : vector<2x512xf32>
    %192 = vector.extract_strided_slice %191 {offsets = [0, 0], sizes = [2, 128], strides = [1, 1]} : vector<2x512xf32> to vector<2x128xf32>
    %193 = arith.negf %192 : vector<2x128xf32>
    %194 = math.exp %193 : vector<2x128xf32>
    %cst_47 = arith.constant 1.000000e+00 : f32
    %195 = vector.broadcast %cst_47 : f32 to vector<2x128xf32>
    %196 = arith.addf %195, %194 : vector<2x128xf32>
    %197 = arith.divf %195, %196 : vector<2x128xf32>
    %198 = vector.extract_strided_slice %191 {offsets = [0, 128], sizes = [2, 128], strides = [1, 1]} : vector<2x512xf32> to vector<2x128xf32>
    %199 = arith.negf %198 : vector<2x128xf32>
    %200 = math.exp %199 : vector<2x128xf32>
    %cst_48 = arith.constant 1.000000e+00 : f32
    %201 = vector.broadcast %cst_48 : f32 to vector<2x128xf32>
    %202 = arith.addf %201, %200 : vector<2x128xf32>
    %203 = arith.divf %201, %202 : vector<2x128xf32>
    %204 = vector.extract_strided_slice %191 {offsets = [0, 256], sizes = [2, 128], strides = [1, 1]} : vector<2x512xf32> to vector<2x128xf32>
    %205 = math.tanh %204 : vector<2x128xf32>
    %206 = vector.extract_strided_slice %191 {offsets = [0, 384], sizes = [2, 128], strides = [1, 1]} : vector<2x512xf32> to vector<2x128xf32>
    %207 = arith.negf %206 : vector<2x128xf32>
    %208 = math.exp %207 : vector<2x128xf32>
    %cst_49 = arith.constant 1.000000e+00 : f32
    %209 = vector.broadcast %cst_49 : f32 to vector<2x128xf32>
    %210 = arith.addf %209, %208 : vector<2x128xf32>
    %211 = arith.divf %209, %210 : vector<2x128xf32>
    %212 = arith.mulf %203, %184 : vector<2x128xf32>
    %213 = arith.mulf %197, %205 : vector<2x128xf32>
    %214 = arith.addf %212, %213 : vector<2x128xf32>
    %215 = math.tanh %214 : vector<2x128xf32>
    %216 = arith.mulf %211, %215 : vector<2x128xf32>
    %217 = vector.shape_cast %216 : vector<2x128xf32> to vector<2x1x128xf32>
    %c0_50 = arith.constant 0 : index
    %c6 = arith.constant 6 : index
    %c0_51 = arith.constant 0 : index
    %218 = vector.load %arg14[%c0_50, %c6, %c0_51] : memref<2x8x128xf32, #tpu.memory_space<vmem>>, vector<2x1x128xf32>
    tpu.vector_store %arg14[%c0_50, %c6, %c0_51], %217 {strides = array<i32>} : memref<2x8x128xf32, #tpu.memory_space<vmem>>, vector<2x1x128xf32>,
    %219 = vector.extract_strided_slice %5 {offsets = [14, 0], sizes = [2, 512], strides = [1, 1]} : vector<16x512xf32> to vector<2x512xf32>
    %cst_52 = arith.constant dense<0.000000e+00> : vector<2x512xf32>
    %220 = tpu.matmul %216, %6, %cst_52 {dimension_numbers = #tpu.dot_dimension_numbers<[1], [0], [0], [1], [0, 0, 1, 1], [], []>} : vector<2x128xf32>, vector<128x512xf32>, vector<2x512xf32> -> vector<2x512xf32>
    %221 = arith.addf %219, %220 : vector<2x512xf32>
    %222 = vector.extract_strided_slice %221 {offsets = [0, 0], sizes = [2, 128], strides = [1, 1]} : vector<2x512xf32> to vector<2x128xf32>
    %223 = arith.negf %222 : vector<2x128xf32>
    %224 = math.exp %223 : vector<2x128xf32>
    %cst_53 = arith.constant 1.000000e+00 : f32
    %225 = vector.broadcast %cst_53 : f32 to vector<2x128xf32>
    %226 = arith.addf %225, %224 : vector<2x128xf32>
    %227 = arith.divf %225, %226 : vector<2x128xf32>
    %228 = vector.extract_strided_slice %221 {offsets = [0, 128], sizes = [2, 128], strides = [1, 1]} : vector<2x512xf32> to vector<2x128xf32>
    %229 = arith.negf %228 : vector<2x128xf32>
    %230 = math.exp %229 : vector<2x128xf32>
    %cst_54 = arith.constant 1.000000e+00 : f32
    %231 = vector.broadcast %cst_54 : f32 to vector<2x128xf32>
    %232 = arith.addf %231, %230 : vector<2x128xf32>
    %233 = arith.divf %231, %232 : vector<2x128xf32>
    %234 = vector.extract_strided_slice %221 {offsets = [0, 256], sizes = [2, 128], strides = [1, 1]} : vector<2x512xf32> to vector<2x128xf32>
    %235 = math.tanh %234 : vector<2x128xf32>
    %236 = vector.extract_strided_slice %221 {offsets = [0, 384], sizes = [2, 128], strides = [1, 1]} : vector<2x512xf32> to vector<2x128xf32>
    %237 = arith.negf %236 : vector<2x128xf32>
    %238 = math.exp %237 : vector<2x128xf32>
    %cst_55 = arith.constant 1.000000e+00 : f32
    %239 = vector.broadcast %cst_55 : f32 to vector<2x128xf32>
    %240 = arith.addf %239, %238 : vector<2x128xf32>
    %241 = arith.divf %239, %240 : vector<2x128xf32>
    %242 = arith.mulf %233, %214 : vector<2x128xf32>
    %243 = arith.mulf %227, %235 : vector<2x128xf32>
    %244 = arith.addf %242, %243 : vector<2x128xf32>
    %245 = math.tanh %244 : vector<2x128xf32>
    %246 = arith.mulf %241, %245 : vector<2x128xf32>
    %247 = vector.shape_cast %246 : vector<2x128xf32> to vector<2x1x128xf32>
    %c0_56 = arith.constant 0 : index
    %c7 = arith.constant 7 : index
    %c0_57 = arith.constant 0 : index
    %248 = vector.load %arg14[%c0_56, %c7, %c0_57] : memref<2x8x128xf32, #tpu.memory_space<vmem>>, vector<2x1x128xf32>
    tpu.vector_store %arg14[%c0_56, %c7, %c0_57], %247 {strides = array<i32>} : memref<2x8x128xf32, #tpu.memory_space<vmem>>, vector<2x1x128xf32>,
    %c0_58 = arith.constant 0 : index
    %c0_59 = arith.constant 0 : index
    %c0_60 = arith.constant 0 : index
    %249 = vector.load %arg14[%c0_58, %c0_59, %c0_60] : memref<2x8x128xf32, #tpu.memory_space<vmem>>, vector<2x8x128xf32>
    %250 = vector.shape_cast %249 : vector<2x8x128xf32> to vector<16x128xf32>
    %c0_61 = arith.constant 0 : index
    %c0_62 = arith.constant 0 : index
    %251 = vector.load %arg5[%c0_61, %c0_62] : memref<256x128xf32, #tpu.memory_space<vmem>>, vector<128x128xf32>
    %c128 = arith.constant 128 : index
    %c0_63 = arith.constant 0 : index
    %252 = vector.load %arg5[%c128, %c0_63] : memref<256x128xf32, #tpu.memory_space<vmem>>, vector<128x128xf32>
    %cst_64 = arith.constant dense<0.000000e+00> : vector<16x128xf32>
    %253 = tpu.matmul %250, %252, %cst_64 {dimension_numbers = #tpu.dot_dimension_numbers<[1], [0], [0], [1], [0, 0, 1, 1], [], []>} : vector<16x128xf32>, vector<128x128xf32>, vector<16x128xf32> -> vector<16x128xf32>
    %254 = vector.shape_cast %253 : vector<16x128xf32> to vector<2x8x128xf32>
    %c0_65 = arith.constant 0 : index
    %c0_66 = arith.constant 0 : index
    %255 = vector.load %arg6[%c0_65, %c0_66] : memref<1x128xf32, #tpu.memory_space<vmem>>, vector<1x128xf32>
    %256 = vector.shape_cast %255 : vector<1x128xf32> to vector<1x1x128xf32>
    %257 = vector.broadcast %256 : vector<1x1x128xf32> to vector<2x8x128xf32>
    %258 = arith.addf %254, %257 : vector<2x8x128xf32>
    %c0_67 = arith.constant 0 : index
    %c0_68 = arith.constant 0 : index
    %259 = vector.load %arg7[%c0_67, %c0_68] : memref<1x128xf32, #tpu.memory_space<vmem>>, vector<1x128xf32>
    %c0_69 = arith.constant 0 : index
    %c0_70 = arith.constant 0 : index
    %260 = vector.load %arg1[%c0_69, %c0_70] : memref<10x128xf32, #tpu.memory_space<vmem>>, vector<10x128xf32>
    %c0_71 = arith.constant 0 : index
    %c0_72 = arith.constant 0 : index
    %261 = vector.load %arg8[%c0_71, %c0_72] : memref<128x512xf32, #tpu.memory_space<vmem>>, vector<128x512xf32>
    %cst_73 = arith.constant dense<0.000000e+00> : vector<10x512xf32>
    %262 = tpu.matmul %260, %261, %cst_73 {dimension_numbers = #tpu.dot_dimension_numbers<[1], [0], [0], [1], [0, 0, 1, 1], [], []>} : vector<10x128xf32>, vector<128x512xf32>, vector<10x512xf32> -> vector<10x512xf32>
    %c0_74 = arith.constant 0 : index
    %c0_75 = arith.constant 0 : index
    %263 = vector.load %arg10[%c0_74, %c0_75] : memref<1x512xf32, #tpu.memory_space<vmem>>, vector<1x512xf32>
    %264 = vector.broadcast %263 : vector<1x512xf32> to vector<10x512xf32>
    %265 = arith.addf %262, %264 : vector<10x512xf32>
    %c0_76 = arith.constant 0 : index
    %c0_77 = arith.constant 0 : index
    %266 = vector.load %arg9[%c0_76, %c0_77] : memref<256x512xf32, #tpu.memory_space<vmem>>, vector<256x512xf32>
    %cst_78 = arith.constant dense<0.000000e+00> : vector<2x128xf32>
    %267 = tpu.matmul %246, %251, %cst_78 {dimension_numbers = #tpu.dot_dimension_numbers<[1], [0], [0], [1], [0, 0, 1, 1], [], []>} : vector<2x128xf32>, vector<128x128xf32>, vector<2x128xf32> -> vector<2x128xf32>
    %268 = vector.shape_cast %267 : vector<2x128xf32> to vector<2x1x128xf32>
    %269 = vector.broadcast %268 : vector<2x1x128xf32> to vector<2x8x128xf32>
    %270 = arith.addf %269, %258 : vector<2x8x128xf32>
    %271 = math.tanh %270 : vector<2x8x128xf32>
    %272 = vector.shape_cast %259 : vector<1x128xf32> to vector<1x1x128xf32>
    %273 = vector.broadcast %272 : vector<1x1x128xf32> to vector<2x8x128xf32>
    %274 = arith.mulf %271, %273 : vector<2x8x128xf32>
    %cst_79 = arith.constant dense<0.000000e+00> : vector<2x8xf32>
    %275 = vector.multi_reduction <add>, %274, %cst_79 [2] : vector<2x8x128xf32> to vector<2x8xf32>
    %cst_80 = arith.constant dense<0xFF800000> : vector<2xf32>
    %276 = vector.multi_reduction <maximumf>, %275, %cst_80 [1] : vector<2x8xf32> to vector<2xf32>
    %277 = vector.shape_cast %276 : vector<2xf32> to vector<2x1xf32>
    %278 = vector.broadcast %277 : vector<2x1xf32> to vector<2x8xf32>
    %279 = arith.subf %275, %278 : vector<2x8xf32>
    %280 = math.exp %279 : vector<2x8xf32>
    %cst_81 = arith.constant dense<0.000000e+00> : vector<2xf32>
    %281 = vector.multi_reduction <add>, %280, %cst_81 [1] : vector<2x8xf32> to vector<2xf32>
    %282 = vector.shape_cast %281 : vector<2xf32> to vector<2x1xf32>
    %283 = tpu.reciprocal %282 {approx = true} : vector<2x1xf32> -> vector<2x1xf32>
    %284 = vector.broadcast %283 : vector<2x1xf32> to vector<2x8xf32>
    %285 = arith.mulf %280, %284 : vector<2x8xf32>
    %286 = vector.shape_cast %285 : vector<2x8xf32> to vector<2x8x1xf32>
    %287 = vector.broadcast %286 : vector<2x8x1xf32> to vector<2x8x128xf32>
    %288 = arith.mulf %287, %249 : vector<2x8x128xf32>
    %cst_82 = arith.constant dense<0.000000e+00> : vector<2x128xf32>
    %289 = vector.multi_reduction <add>, %288, %cst_82 [1] : vector<2x8x128xf32> to vector<2x128xf32>
    %290 = tpu.concatenate %289, %246 in 1 : vector<2x128xf32>, vector<2x128xf32> -> vector<2x256xf32>
    %291 = vector.extract_strided_slice %265 {offsets = [0, 0], sizes = [2, 512], strides = [1, 1]} : vector<10x512xf32> to vector<2x512xf32>
    %cst_83 = arith.constant dense<0.000000e+00> : vector<2x512xf32>
    %292 = tpu.matmul %290, %266, %cst_83 {dimension_numbers = #tpu.dot_dimension_numbers<[1], [0], [0], [1], [0, 0, 1, 1], [], []>} : vector<2x256xf32>, vector<256x512xf32>, vector<2x512xf32> -> vector<2x512xf32>
    %293 = arith.addf %291, %292 : vector<2x512xf32>
    %294 = vector.extract_strided_slice %293 {offsets = [0, 0], sizes = [2, 128], strides = [1, 1]} : vector<2x512xf32> to vector<2x128xf32>
    %295 = arith.negf %294 : vector<2x128xf32>
    %296 = math.exp %295 : vector<2x128xf32>
    %cst_84 = arith.constant 1.000000e+00 : f32
    %297 = vector.broadcast %cst_84 : f32 to vector<2x128xf32>
    %298 = arith.addf %297, %296 : vector<2x128xf32>
    %299 = arith.divf %297, %298 : vector<2x128xf32>
    %300 = vector.extract_strided_slice %293 {offsets = [0, 128], sizes = [2, 128], strides = [1, 1]} : vector<2x512xf32> to vector<2x128xf32>
    %301 = arith.negf %300 : vector<2x128xf32>
    %302 = math.exp %301 : vector<2x128xf32>
    %cst_85 = arith.constant 1.000000e+00 : f32
    %303 = vector.broadcast %cst_85 : f32 to vector<2x128xf32>
    %304 = arith.addf %303, %302 : vector<2x128xf32>
    %305 = arith.divf %303, %304 : vector<2x128xf32>
    %306 = vector.extract_strided_slice %293 {offsets = [0, 256], sizes = [2, 128], strides = [1, 1]} : vector<2x512xf32> to vector<2x128xf32>
    %307 = math.tanh %306 : vector<2x128xf32>
    %308 = vector.extract_strided_slice %293 {offsets = [0, 384], sizes = [2, 128], strides = [1, 1]} : vector<2x512xf32> to vector<2x128xf32>
    %309 = arith.negf %308 : vector<2x128xf32>
    %310 = math.exp %309 : vector<2x128xf32>
    %cst_86 = arith.constant 1.000000e+00 : f32
    %311 = vector.broadcast %cst_86 : f32 to vector<2x128xf32>
    %312 = arith.addf %311, %310 : vector<2x128xf32>
    %313 = arith.divf %311, %312 : vector<2x128xf32>
    %314 = arith.mulf %305, %244 : vector<2x128xf32>
    %315 = arith.mulf %299, %307 : vector<2x128xf32>
    %316 = arith.addf %314, %315 : vector<2x128xf32>
    %317 = math.tanh %316 : vector<2x128xf32>
    %318 = arith.mulf %313, %317 : vector<2x128xf32>
    %cst_87 = arith.constant dense<0.000000e+00> : vector<2x128xf32>
    %319 = tpu.matmul %318, %251, %cst_87 {dimension_numbers = #tpu.dot_dimension_numbers<[1], [0], [0], [1], [0, 0, 1, 1], [], []>} : vector<2x128xf32>, vector<128x128xf32>, vector<2x128xf32> -> vector<2x128xf32>
    %320 = vector.shape_cast %319 : vector<2x128xf32> to vector<2x1x128xf32>
    %321 = vector.broadcast %320 : vector<2x1x128xf32> to vector<2x8x128xf32>
    %322 = arith.addf %321, %258 : vector<2x8x128xf32>
    %323 = math.tanh %322 : vector<2x8x128xf32>
    %324 = vector.shape_cast %259 : vector<1x128xf32> to vector<1x1x128xf32>
    %325 = vector.broadcast %324 : vector<1x1x128xf32> to vector<2x8x128xf32>
    %326 = arith.mulf %323, %325 : vector<2x8x128xf32>
    %cst_88 = arith.constant dense<0.000000e+00> : vector<2x8xf32>
    %327 = vector.multi_reduction <add>, %326, %cst_88 [2] : vector<2x8x128xf32> to vector<2x8xf32>
    %cst_89 = arith.constant dense<0xFF800000> : vector<2xf32>
    %328 = vector.multi_reduction <maximumf>, %327, %cst_89 [1] : vector<2x8xf32> to vector<2xf32>
    %329 = vector.shape_cast %328 : vector<2xf32> to vector<2x1xf32>
    %330 = vector.broadcast %329 : vector<2x1xf32> to vector<2x8xf32>
    %331 = arith.subf %327, %330 : vector<2x8xf32>
    %332 = math.exp %331 : vector<2x8xf32>
    %cst_90 = arith.constant dense<0.000000e+00> : vector<2xf32>
    %333 = vector.multi_reduction <add>, %332, %cst_90 [1] : vector<2x8xf32> to vector<2xf32>
    %334 = vector.shape_cast %333 : vector<2xf32> to vector<2x1xf32>
    %335 = tpu.reciprocal %334 {approx = true} : vector<2x1xf32> -> vector<2x1xf32>
    %336 = vector.broadcast %335 : vector<2x1xf32> to vector<2x8xf32>
    %337 = arith.mulf %332, %336 : vector<2x8xf32>
    %338 = vector.shape_cast %337 : vector<2x8xf32> to vector<2x8x1xf32>
    %339 = vector.broadcast %338 : vector<2x8x1xf32> to vector<2x8x128xf32>
    %340 = arith.mulf %339, %249 : vector<2x8x128xf32>
    %cst_91 = arith.constant dense<0.000000e+00> : vector<2x128xf32>
    %341 = vector.multi_reduction <add>, %340, %cst_91 [1] : vector<2x8x128xf32> to vector<2x128xf32>
    %342 = tpu.concatenate %341, %318 in 1 : vector<2x128xf32>, vector<2x128xf32> -> vector<2x256xf32>
    %343 = vector.extract_strided_slice %265 {offsets = [2, 0], sizes = [2, 512], strides = [1, 1]} : vector<10x512xf32> to vector<2x512xf32>
    %cst_92 = arith.constant dense<0.000000e+00> : vector<2x512xf32>
    %344 = tpu.matmul %342, %266, %cst_92 {dimension_numbers = #tpu.dot_dimension_numbers<[1], [0], [0], [1], [0, 0, 1, 1], [], []>} : vector<2x256xf32>, vector<256x512xf32>, vector<2x512xf32> -> vector<2x512xf32>
    %345 = arith.addf %343, %344 : vector<2x512xf32>
    %346 = vector.extract_strided_slice %345 {offsets = [0, 0], sizes = [2, 128], strides = [1, 1]} : vector<2x512xf32> to vector<2x128xf32>
    %347 = arith.negf %346 : vector<2x128xf32>
    %348 = math.exp %347 : vector<2x128xf32>
    %cst_93 = arith.constant 1.000000e+00 : f32
    %349 = vector.broadcast %cst_93 : f32 to vector<2x128xf32>
    %350 = arith.addf %349, %348 : vector<2x128xf32>
    %351 = arith.divf %349, %350 : vector<2x128xf32>
    %352 = vector.extract_strided_slice %345 {offsets = [0, 128], sizes = [2, 128], strides = [1, 1]} : vector<2x512xf32> to vector<2x128xf32>
    %353 = arith.negf %352 : vector<2x128xf32>
    %354 = math.exp %353 : vector<2x128xf32>
    %cst_94 = arith.constant 1.000000e+00 : f32
    %355 = vector.broadcast %cst_94 : f32 to vector<2x128xf32>
    %356 = arith.addf %355, %354 : vector<2x128xf32>
    %357 = arith.divf %355, %356 : vector<2x128xf32>
    %358 = vector.extract_strided_slice %345 {offsets = [0, 256], sizes = [2, 128], strides = [1, 1]} : vector<2x512xf32> to vector<2x128xf32>
    %359 = math.tanh %358 : vector<2x128xf32>
    %360 = vector.extract_strided_slice %345 {offsets = [0, 384], sizes = [2, 128], strides = [1, 1]} : vector<2x512xf32> to vector<2x128xf32>
    %361 = arith.negf %360 : vector<2x128xf32>
    %362 = math.exp %361 : vector<2x128xf32>
    %cst_95 = arith.constant 1.000000e+00 : f32
    %363 = vector.broadcast %cst_95 : f32 to vector<2x128xf32>
    %364 = arith.addf %363, %362 : vector<2x128xf32>
    %365 = arith.divf %363, %364 : vector<2x128xf32>
    %366 = arith.mulf %357, %316 : vector<2x128xf32>
    %367 = arith.mulf %351, %359 : vector<2x128xf32>
    %368 = arith.addf %366, %367 : vector<2x128xf32>
    %369 = math.tanh %368 : vector<2x128xf32>
    %370 = arith.mulf %365, %369 : vector<2x128xf32>
    %cst_96 = arith.constant dense<0.000000e+00> : vector<2x128xf32>
    %371 = tpu.matmul %370, %251, %cst_96 {dimension_numbers = #tpu.dot_dimension_numbers<[1], [0], [0], [1], [0, 0, 1, 1], [], []>} : vector<2x128xf32>, vector<128x128xf32>, vector<2x128xf32> -> vector<2x128xf32>
    %372 = vector.shape_cast %371 : vector<2x128xf32> to vector<2x1x128xf32>
    %373 = vector.broadcast %372 : vector<2x1x128xf32> to vector<2x8x128xf32>
    %374 = arith.addf %373, %258 : vector<2x8x128xf32>
    %375 = math.tanh %374 : vector<2x8x128xf32>
    %376 = vector.shape_cast %259 : vector<1x128xf32> to vector<1x1x128xf32>
    %377 = vector.broadcast %376 : vector<1x1x128xf32> to vector<2x8x128xf32>
    %378 = arith.mulf %375, %377 : vector<2x8x128xf32>
    %cst_97 = arith.constant dense<0.000000e+00> : vector<2x8xf32>
    %379 = vector.multi_reduction <add>, %378, %cst_97 [2] : vector<2x8x128xf32> to vector<2x8xf32>
    %cst_98 = arith.constant dense<0xFF800000> : vector<2xf32>
    %380 = vector.multi_reduction <maximumf>, %379, %cst_98 [1] : vector<2x8xf32> to vector<2xf32>
    %381 = vector.shape_cast %380 : vector<2xf32> to vector<2x1xf32>
    %382 = vector.broadcast %381 : vector<2x1xf32> to vector<2x8xf32>
    %383 = arith.subf %379, %382 : vector<2x8xf32>
    %384 = math.exp %383 : vector<2x8xf32>
    %cst_99 = arith.constant dense<0.000000e+00> : vector<2xf32>
    %385 = vector.multi_reduction <add>, %384, %cst_99 [1] : vector<2x8xf32> to vector<2xf32>
    %386 = vector.shape_cast %385 : vector<2xf32> to vector<2x1xf32>
    %387 = tpu.reciprocal %386 {approx = true} : vector<2x1xf32> -> vector<2x1xf32>
    %388 = vector.broadcast %387 : vector<2x1xf32> to vector<2x8xf32>
    %389 = arith.mulf %384, %388 : vector<2x8xf32>
    %390 = vector.shape_cast %389 : vector<2x8xf32> to vector<2x8x1xf32>
    %391 = vector.broadcast %390 : vector<2x8x1xf32> to vector<2x8x128xf32>
    %392 = arith.mulf %391, %249 : vector<2x8x128xf32>
    %cst_100 = arith.constant dense<0.000000e+00> : vector<2x128xf32>
    %393 = vector.multi_reduction <add>, %392, %cst_100 [1] : vector<2x8x128xf32> to vector<2x128xf32>
    %394 = tpu.concatenate %393, %370 in 1 : vector<2x128xf32>, vector<2x128xf32> -> vector<2x256xf32>
    %395 = vector.extract_strided_slice %265 {offsets = [4, 0], sizes = [2, 512], strides = [1, 1]} : vector<10x512xf32> to vector<2x512xf32>
    %cst_101 = arith.constant dense<0.000000e+00> : vector<2x512xf32>
    %396 = tpu.matmul %394, %266, %cst_101 {dimension_numbers = #tpu.dot_dimension_numbers<[1], [0], [0], [1], [0, 0, 1, 1], [], []>} : vector<2x256xf32>, vector<256x512xf32>, vector<2x512xf32> -> vector<2x512xf32>
    %397 = arith.addf %395, %396 : vector<2x512xf32>
    %398 = vector.extract_strided_slice %397 {offsets = [0, 0], sizes = [2, 128], strides = [1, 1]} : vector<2x512xf32> to vector<2x128xf32>
    %399 = arith.negf %398 : vector<2x128xf32>
    %400 = math.exp %399 : vector<2x128xf32>
    %cst_102 = arith.constant 1.000000e+00 : f32
    %401 = vector.broadcast %cst_102 : f32 to vector<2x128xf32>
    %402 = arith.addf %401, %400 : vector<2x128xf32>
    %403 = arith.divf %401, %402 : vector<2x128xf32>
    %404 = vector.extract_strided_slice %397 {offsets = [0, 128], sizes = [2, 128], strides = [1, 1]} : vector<2x512xf32> to vector<2x128xf32>
    %405 = arith.negf %404 : vector<2x128xf32>
    %406 = math.exp %405 : vector<2x128xf32>
    %cst_103 = arith.constant 1.000000e+00 : f32
    %407 = vector.broadcast %cst_103 : f32 to vector<2x128xf32>
    %408 = arith.addf %407, %406 : vector<2x128xf32>
    %409 = arith.divf %407, %408 : vector<2x128xf32>
    %410 = vector.extract_strided_slice %397 {offsets = [0, 256], sizes = [2, 128], strides = [1, 1]} : vector<2x512xf32> to vector<2x128xf32>
    %411 = math.tanh %410 : vector<2x128xf32>
    %412 = vector.extract_strided_slice %397 {offsets = [0, 384], sizes = [2, 128], strides = [1, 1]} : vector<2x512xf32> to vector<2x128xf32>
    %413 = arith.negf %412 : vector<2x128xf32>
    %414 = math.exp %413 : vector<2x128xf32>
    %cst_104 = arith.constant 1.000000e+00 : f32
    %415 = vector.broadcast %cst_104 : f32 to vector<2x128xf32>
    %416 = arith.addf %415, %414 : vector<2x128xf32>
    %417 = arith.divf %415, %416 : vector<2x128xf32>
    %418 = arith.mulf %409, %368 : vector<2x128xf32>
    %419 = arith.mulf %403, %411 : vector<2x128xf32>
    %420 = arith.addf %418, %419 : vector<2x128xf32>
    %421 = math.tanh %420 : vector<2x128xf32>
    %422 = arith.mulf %417, %421 : vector<2x128xf32>
    %cst_105 = arith.constant dense<0.000000e+00> : vector<2x128xf32>
    %423 = tpu.matmul %422, %251, %cst_105 {dimension_numbers = #tpu.dot_dimension_numbers<[1], [0], [0], [1], [0, 0, 1, 1], [], []>} : vector<2x128xf32>, vector<128x128xf32>, vector<2x128xf32> -> vector<2x128xf32>
    %424 = vector.shape_cast %423 : vector<2x128xf32> to vector<2x1x128xf32>
    %425 = vector.broadcast %424 : vector<2x1x128xf32> to vector<2x8x128xf32>
    %426 = arith.addf %425, %258 : vector<2x8x128xf32>
    %427 = math.tanh %426 : vector<2x8x128xf32>
    %428 = vector.shape_cast %259 : vector<1x128xf32> to vector<1x1x128xf32>
    %429 = vector.broadcast %428 : vector<1x1x128xf32> to vector<2x8x128xf32>
    %430 = arith.mulf %427, %429 : vector<2x8x128xf32>
    %cst_106 = arith.constant dense<0.000000e+00> : vector<2x8xf32>
    %431 = vector.multi_reduction <add>, %430, %cst_106 [2] : vector<2x8x128xf32> to vector<2x8xf32>
    %cst_107 = arith.constant dense<0xFF800000> : vector<2xf32>
    %432 = vector.multi_reduction <maximumf>, %431, %cst_107 [1] : vector<2x8xf32> to vector<2xf32>
    %433 = vector.shape_cast %432 : vector<2xf32> to vector<2x1xf32>
    %434 = vector.broadcast %433 : vector<2x1xf32> to vector<2x8xf32>
    %435 = arith.subf %431, %434 : vector<2x8xf32>
    %436 = math.exp %435 : vector<2x8xf32>
    %cst_108 = arith.constant dense<0.000000e+00> : vector<2xf32>
    %437 = vector.multi_reduction <add>, %436, %cst_108 [1] : vector<2x8xf32> to vector<2xf32>
    %438 = vector.shape_cast %437 : vector<2xf32> to vector<2x1xf32>
    %439 = tpu.reciprocal %438 {approx = true} : vector<2x1xf32> -> vector<2x1xf32>
    %440 = vector.broadcast %439 : vector<2x1xf32> to vector<2x8xf32>
    %441 = arith.mulf %436, %440 : vector<2x8xf32>
    %442 = vector.shape_cast %441 : vector<2x8xf32> to vector<2x8x1xf32>
    %443 = vector.broadcast %442 : vector<2x8x1xf32> to vector<2x8x128xf32>
    %444 = arith.mulf %443, %249 : vector<2x8x128xf32>
    %cst_109 = arith.constant dense<0.000000e+00> : vector<2x128xf32>
    %445 = vector.multi_reduction <add>, %444, %cst_109 [1] : vector<2x8x128xf32> to vector<2x128xf32>
    %446 = tpu.concatenate %445, %422 in 1 : vector<2x128xf32>, vector<2x128xf32> -> vector<2x256xf32>
    %447 = vector.extract_strided_slice %265 {offsets = [6, 0], sizes = [2, 512], strides = [1, 1]} : vector<10x512xf32> to vector<2x512xf32>
    %cst_110 = arith.constant dense<0.000000e+00> : vector<2x512xf32>
    %448 = tpu.matmul %446, %266, %cst_110 {dimension_numbers = #tpu.dot_dimension_numbers<[1], [0], [0], [1], [0, 0, 1, 1], [], []>} : vector<2x256xf32>, vector<256x512xf32>, vector<2x512xf32> -> vector<2x512xf32>
    %449 = arith.addf %447, %448 : vector<2x512xf32>
    %450 = vector.extract_strided_slice %449 {offsets = [0, 0], sizes = [2, 128], strides = [1, 1]} : vector<2x512xf32> to vector<2x128xf32>
    %451 = arith.negf %450 : vector<2x128xf32>
    %452 = math.exp %451 : vector<2x128xf32>
    %cst_111 = arith.constant 1.000000e+00 : f32
    %453 = vector.broadcast %cst_111 : f32 to vector<2x128xf32>
    %454 = arith.addf %453, %452 : vector<2x128xf32>
    %455 = arith.divf %453, %454 : vector<2x128xf32>
    %456 = vector.extract_strided_slice %449 {offsets = [0, 128], sizes = [2, 128], strides = [1, 1]} : vector<2x512xf32> to vector<2x128xf32>
    %457 = arith.negf %456 : vector<2x128xf32>
    %458 = math.exp %457 : vector<2x128xf32>
    %cst_112 = arith.constant 1.000000e+00 : f32
    %459 = vector.broadcast %cst_112 : f32 to vector<2x128xf32>
    %460 = arith.addf %459, %458 : vector<2x128xf32>
    %461 = arith.divf %459, %460 : vector<2x128xf32>
    %462 = vector.extract_strided_slice %449 {offsets = [0, 256], sizes = [2, 128], strides = [1, 1]} : vector<2x512xf32> to vector<2x128xf32>
    %463 = math.tanh %462 : vector<2x128xf32>
    %464 = vector.extract_strided_slice %449 {offsets = [0, 384], sizes = [2, 128], strides = [1, 1]} : vector<2x512xf32> to vector<2x128xf32>
    %465 = arith.negf %464 : vector<2x128xf32>
    %466 = math.exp %465 : vector<2x128xf32>
    %cst_113 = arith.constant 1.000000e+00 : f32
    %467 = vector.broadcast %cst_113 : f32 to vector<2x128xf32>
    %468 = arith.addf %467, %466 : vector<2x128xf32>
    %469 = arith.divf %467, %468 : vector<2x128xf32>
    %470 = arith.mulf %461, %420 : vector<2x128xf32>
    %471 = arith.mulf %455, %463 : vector<2x128xf32>
    %472 = arith.addf %470, %471 : vector<2x128xf32>
    %473 = math.tanh %472 : vector<2x128xf32>
    %474 = arith.mulf %469, %473 : vector<2x128xf32>
    %cst_114 = arith.constant dense<0.000000e+00> : vector<2x128xf32>
    %475 = tpu.matmul %474, %251, %cst_114 {dimension_numbers = #tpu.dot_dimension_numbers<[1], [0], [0], [1], [0, 0, 1, 1], [], []>} : vector<2x128xf32>, vector<128x128xf32>, vector<2x128xf32> -> vector<2x128xf32>
    %476 = vector.shape_cast %475 : vector<2x128xf32> to vector<2x1x128xf32>
    %477 = vector.broadcast %476 : vector<2x1x128xf32> to vector<2x8x128xf32>
    %478 = arith.addf %477, %258 : vector<2x8x128xf32>
    %479 = math.tanh %478 : vector<2x8x128xf32>
    %480 = vector.shape_cast %259 : vector<1x128xf32> to vector<1x1x128xf32>
    %481 = vector.broadcast %480 : vector<1x1x128xf32> to vector<2x8x128xf32>
    %482 = arith.mulf %479, %481 : vector<2x8x128xf32>
    %cst_115 = arith.constant dense<0.000000e+00> : vector<2x8xf32>
    %483 = vector.multi_reduction <add>, %482, %cst_115 [2] : vector<2x8x128xf32> to vector<2x8xf32>
    %cst_116 = arith.constant dense<0xFF800000> : vector<2xf32>
    %484 = vector.multi_reduction <maximumf>, %483, %cst_116 [1] : vector<2x8xf32> to vector<2xf32>
    %485 = vector.shape_cast %484 : vector<2xf32> to vector<2x1xf32>
    %486 = vector.broadcast %485 : vector<2x1xf32> to vector<2x8xf32>
    %487 = arith.subf %483, %486 : vector<2x8xf32>
    %488 = math.exp %487 : vector<2x8xf32>
    %cst_117 = arith.constant dense<0.000000e+00> : vector<2xf32>
    %489 = vector.multi_reduction <add>, %488, %cst_117 [1] : vector<2x8xf32> to vector<2xf32>
    %490 = vector.shape_cast %489 : vector<2xf32> to vector<2x1xf32>
    %491 = tpu.reciprocal %490 {approx = true} : vector<2x1xf32> -> vector<2x1xf32>
    %492 = vector.broadcast %491 : vector<2x1xf32> to vector<2x8xf32>
    %493 = arith.mulf %488, %492 : vector<2x8xf32>
    %494 = vector.shape_cast %493 : vector<2x8xf32> to vector<2x8x1xf32>
    %495 = vector.broadcast %494 : vector<2x8x1xf32> to vector<2x8x128xf32>
    %496 = arith.mulf %495, %249 : vector<2x8x128xf32>
    %cst_118 = arith.constant dense<0.000000e+00> : vector<2x128xf32>
    %497 = vector.multi_reduction <add>, %496, %cst_118 [1] : vector<2x8x128xf32> to vector<2x128xf32>
    %498 = tpu.concatenate %497, %474 in 1 : vector<2x128xf32>, vector<2x128xf32> -> vector<2x256xf32>
    %499 = vector.extract_strided_slice %265 {offsets = [8, 0], sizes = [2, 512], strides = [1, 1]} : vector<10x512xf32> to vector<2x512xf32>
    %cst_119 = arith.constant dense<0.000000e+00> : vector<2x512xf32>
    %500 = tpu.matmul %498, %266, %cst_119 {dimension_numbers = #tpu.dot_dimension_numbers<[1], [0], [0], [1], [0, 0, 1, 1], [], []>} : vector<2x256xf32>, vector<256x512xf32>, vector<2x512xf32> -> vector<2x512xf32>
    %501 = arith.addf %499, %500 : vector<2x512xf32>
    %502 = vector.extract_strided_slice %501 {offsets = [0, 0], sizes = [2, 128], strides = [1, 1]} : vector<2x512xf32> to vector<2x128xf32>
    %503 = arith.negf %502 : vector<2x128xf32>
    %504 = math.exp %503 : vector<2x128xf32>
    %cst_120 = arith.constant 1.000000e+00 : f32
    %505 = vector.broadcast %cst_120 : f32 to vector<2x128xf32>
    %506 = arith.addf %505, %504 : vector<2x128xf32>
    %507 = arith.divf %505, %506 : vector<2x128xf32>
    %508 = vector.extract_strided_slice %501 {offsets = [0, 128], sizes = [2, 128], strides = [1, 1]} : vector<2x512xf32> to vector<2x128xf32>
    %509 = arith.negf %508 : vector<2x128xf32>
    %510 = math.exp %509 : vector<2x128xf32>
    %cst_121 = arith.constant 1.000000e+00 : f32
    %511 = vector.broadcast %cst_121 : f32 to vector<2x128xf32>
    %512 = arith.addf %511, %510 : vector<2x128xf32>
    %513 = arith.divf %511, %512 : vector<2x128xf32>
    %514 = vector.extract_strided_slice %501 {offsets = [0, 256], sizes = [2, 128], strides = [1, 1]} : vector<2x512xf32> to vector<2x128xf32>
    %515 = math.tanh %514 : vector<2x128xf32>
    %516 = vector.extract_strided_slice %501 {offsets = [0, 384], sizes = [2, 128], strides = [1, 1]} : vector<2x512xf32> to vector<2x128xf32>
    %517 = arith.negf %516 : vector<2x128xf32>
    %518 = math.exp %517 : vector<2x128xf32>
    %cst_122 = arith.constant 1.000000e+00 : f32
    %519 = vector.broadcast %cst_122 : f32 to vector<2x128xf32>
    %520 = arith.addf %519, %518 : vector<2x128xf32>
    %521 = arith.divf %519, %520 : vector<2x128xf32>
    %522 = arith.mulf %513, %472 : vector<2x128xf32>
    %523 = arith.mulf %507, %515 : vector<2x128xf32>
    %524 = arith.addf %522, %523 : vector<2x128xf32>
    %525 = math.tanh %524 : vector<2x128xf32>
    %526 = arith.mulf %521, %525 : vector<2x128xf32>
    %527 = tpu.concatenate %318, %370, %422, %474, %526 in 0 : vector<2x128xf32>, vector<2x128xf32>, vector<2x128xf32>, vector<2x128xf32>, vector<2x128xf32> -> vector<10x128xf32>
    %c0_123 = arith.constant 0 : index
    %c0_124 = arith.constant 0 : index
    %528 = vector.load %arg11[%c0_123, %c0_124] : memref<128x128xf32, #tpu.memory_space<vmem>>, vector<128x128xf32>
    %cst_125 = arith.constant dense<0.000000e+00> : vector<10x128xf32>
    %529 = tpu.matmul %527, %528, %cst_125 {dimension_numbers = #tpu.dot_dimension_numbers<[1], [0], [0], [1], [0, 0, 1, 1], [], []>} : vector<10x128xf32>, vector<128x128xf32>, vector<10x128xf32> -> vector<10x128xf32>
    %c0_126 = arith.constant 0 : index
    %c0_127 = arith.constant 0 : index
    %530 = vector.load %arg12[%c0_126, %c0_127] : memref<1x128xf32, #tpu.memory_space<vmem>>, vector<1x128xf32>
    %531 = vector.broadcast %530 : vector<1x128xf32> to vector<10x128xf32>
    %532 = arith.addf %529, %531 : vector<10x128xf32>
    %c0_128 = arith.constant 0 : index
    %c0_129 = arith.constant 0 : index
    %533 = vector.load %arg13[%c0_128, %c0_129] : memref<10x128xf32, #tpu.memory_space<vmem>>, vector<10x128xf32>
    tpu.vector_store %arg13[%c0_128, %c0_129], %532 {strides = array<i32>} : memref<10x128xf32, #tpu.memory_space<vmem>>, vector<10x128xf32>,
    return
  }
}

</mosaic_0001>

<bundles_post_ra>
// kernel: seq2seq_forward.1
= control target key start
LH: loop header
LB: loop body
LE: loop exit
PB: predicated region body
PF: predicated region fallthrough
CT: control target
= control target key end

     0   :  { %v9258_v3 = vmov 0.0   ;;  %vm6763_vm0 = vmmov 0   ;;  %vm2663_vm1 = vcmask 1041409   ;;  %vm2666_vm2 = vcmask 58368   ;;  %s9242_s2 = inlined_call_operand.vmem [shape: f32[128,512], index: 2, kind: input, shape index: {}]   ;;  %s9243_s3 = inlined_call_operand.vmem [shape: f32[128,512], index: 3, kind: input, shape index: {}]   ;;  %s9244_s0 = inlined_call_operand.vmem [shape: f32[16,128], index: 0, kind: input, shape index: {}]   ;;  %s9245_s4 = inlined_call_operand.vmem [shape: f32[1,512], index: 4, kind: input, shape index: {}]   ;;  %s9246_s8 = inlined_call_operand.vmem [shape: f32[128,512], index: 8, kind: input, shape index: {}]   ;;  %s9247_s5 = inlined_call_operand.vmem [shape: f32[256,128], index: 5, kind: input, shape index: {}]   ;;  %s9248_s1 = inlined_call_operand.vmem [shape: f32[10,128], index: 1, kind: input, shape index: {}]   ;;  %s9249_s6 = inlined_call_operand.vmem [shape: f32[1,128], index: 6, kind: input, shape index: {}]   ;;  %s9250_s7 = inlined_call_operand.vmem [shape: f32[1,128], index: 7, kind: input, shape index: {}]   ;;  %s9251_s9 = inlined_call_operand.vmem [shape: f32[256,512], index: 9, kind: input, shape index: {}]   ;;  %s9252_s10 = inlined_call_operand.vmem [shape: f32[1,512], index: 10, kind: input, shape index: {}]   ;;  %s9253_s11 = inlined_call_operand.vmem [shape: f32[128,128], index: 11, kind: input, shape index: {}]   ;;  %s9254_s12 = inlined_call_operand.vmem [shape: f32[1,128], index: 12, kind: input, shape index: {}]   ;;  %s9255_s13 = inlined_call_operand.vmem [shape: f32[10,128], index: 13, kind: output, shape index: {}]  }
   0x1   :  { %v47_v0 = vld [vmem:[%s9242_s2 + $0x8] sm:$0xff]  ;;  %v49_v2 = vld [vmem:[%s9242_s2 + $0x18] sm:$0xff]  ;;  %196 = vmatprep.mubr.f32.mxu0 %v9258_v3  ;;  %273 = vmatprep.mubr.f32.mxu1 %v9258_v3  ;;  %v46_v6 = vld [vmem:[%s9242_s2] sm:$0xff]  ;;  %vm4492_vm3 = vcmask 1041408   ;;  %vm4494_vm4 = vcmask 1043456   ;;  %vm4496_vm5 = vcmask 1045504  }
   0x2   :  { %v51_v1 = vld [vmem:[%s9242_s2 + $0x28] sm:$0xff]  ;;  %v53_v5 = vld [vmem:[%s9242_s2 + $0x38] sm:$0xff]  ;;  %v50_v7 = vld [vmem:[%s9242_s2 + $0x20] sm:$0xff] }
   0x3   :  { %v5018_v4 = vpack.c.bf16 %v51_v1, %v47_v0  ;;  %v5050_v8 = vpack.c.bf16 %v53_v5, %v49_v2  ;;  %v5020_v9 = vpack.c.bf16 %v50_v7, %v46_v6  ;;  %v48_v10 = vld [vmem:[%s9242_s2 + $0x10] sm:$0xff]  ;;  %v55_v12 = vld [vmem:[%s9242_s2 + $0x48] sm:$0xff]  ;;  %v57_v15 = vld [vmem:[%s9242_s2 + $0x58] sm:$0xff] }
   0x4   :  { %v52_v11 = vld [vmem:[%s9242_s2 + $0x30] sm:$0xff]  ;;  %v59_v14 = vld [vmem:[%s9242_s2 + $0x68] sm:$0xff]  ;;  %v61_v16 = vld [vmem:[%s9242_s2 + $0x78] sm:$0xff] }
   0x5   :  { %5019 = vmatprep.subr.bf16.mxu0 %v5018_v4  ;;  %v5052_v13 = vpack.c.bf16 %v52_v11, %v48_v10  ;;  %5051 = vmatprep.subr.bf16.mxu1 %v5050_v8  ;;  %v5022_v17 = vpack.c.bf16 %v59_v14, %v55_v12  ;;  %v5054_v18 = vpack.c.bf16 %v61_v16, %v57_v15  ;;  %v54_v19 = vld [vmem:[%s9242_s2 + $0x40] sm:$0xff]  ;;  %v56_v21 = vld [vmem:[%s9242_s2 + $0x50] sm:$0xff]  ;;  %v63_v24 = vld [vmem:[%s9242_s2 + $0x88] sm:$0xff] }
   0x6   :  { %5021 = vmatpush1.bf16.msra.mxu0 %v5020_v9  ;;  %v58_v20 = vld [vmem:[%s9242_s2 + $0x60] sm:$0xff]  ;;  %v60_v23 = vld [vmem:[%s9242_s2 + $0x70] sm:$0xff]  ;;  %v67_v25 = vld [vmem:[%s9242_s2 + $0xa8] sm:$0xff] }
   0x7   :  { %5053 = vmatpush1.bf16.msra.mxu1 %v5052_v13  ;;  %v5024_v22 = vpack.c.bf16 %v58_v20, %v54_v19  ;;  %5023 = vmatprep.subr.bf16.mxu0 %v5022_v17  ;;  %v5056_v26 = vpack.c.bf16 %v60_v23, %v56_v21  ;;  %v5026_v27 = vpack.c.bf16 %v67_v25, %v63_v24  ;;  %v65_v28 = vld [vmem:[%s9242_s2 + $0x98] sm:$0xff]  ;;  %v62_v30 = vld [vmem:[%s9242_s2 + $0x80] sm:$0xff]  ;;  %v64_v33 = vld [vmem:[%s9242_s2 + $0x90] sm:$0xff] }
   0x8   :  { %5055 = vmatprep.subr.bf16.mxu1 %v5054_v18  ;;  %v69_v29 = vld [vmem:[%s9242_s2 + $0xb8] sm:$0xff]  ;;  %v66_v32 = vld [vmem:[%s9242_s2 + $0xa0] sm:$0xff]  ;;  %v68_v34 = vld [vmem:[%s9242_s2 + $0xb0] sm:$0xff] }
   0x9   :  { %v5058_v31 = vpack.c.bf16 %v69_v29, %v65_v28  ;;  %v5028_v35 = vpack.c.bf16 %v66_v32, %v62_v30  ;;  %v71_v36 = vld [vmem:[%s9242_s2 + $0xc8] sm:$0xff]  ;;  %v73_v38 = vld [vmem:[%s9242_s2 + $0xd8] sm:$0xff]  ;;  %v5060_v39 = vpack.c.bf16 %v68_v34, %v64_v33  ;;  %v70_v42 = vld [vmem:[%s9242_s2 + $0xc0] sm:$0xff] }
   0xa   :  { %5025 = vmatpush1.bf16.msra.mxu0 %v5024_v22  ;;  %v75_v37 = vld [vmem:[%s9242_s2 + $0xe8] sm:$0xff]  ;;  %v77_v41 = vld [vmem:[%s9242_s2 + $0xf8] sm:$0xff]  ;;  %v74_v43 = vld [vmem:[%s9242_s2 + $0xe0] sm:$0xff] }
   0xb   :  { %5057 = vmatpush1.bf16.msra.mxu1 %v5056_v26  ;;  %5027 = vmatprep.subr.bf16.mxu0 %v5026_v27  ;;  %v5030_v40 = vpack.c.bf16 %v75_v37, %v71_v36  ;;  %v5062_v44 = vpack.c.bf16 %v77_v41, %v73_v38  ;;  %v72_v45 = vld [vmem:[%s9242_s2 + $0xd0] sm:$0xff]  ;;  %v79_v47 = vld [vmem:[%s9242_s2 + $0x108] sm:$0xff]  ;;  %v81_v49 = vld [vmem:[%s9242_s2 + $0x118] sm:$0xff]  ;;  %v5032_v51 = vpack.c.bf16 %v74_v43, %v70_v42 }
   0xc   :  { %5059 = vmatprep.subr.bf16.mxu1 %v5058_v31  ;;  %v76_v46 = vld [vmem:[%s9242_s2 + $0xf0] sm:$0xff]  ;;  %v83_v48 = vld [vmem:[%s9242_s2 + $0x128] sm:$0xff]  ;;  %v85_v50 = vld [vmem:[%s9242_s2 + $0x138] sm:$0xff] }
   0xd   :  { %v5064_v52 = vpack.c.bf16 %v76_v46, %v72_v45  ;;  %v5034_v53 = vpack.c.bf16 %v83_v48, %v79_v47  ;;  %v78_v54 = vld [vmem:[%s9242_s2 + $0x100] sm:$0xff]  ;;  %v80_v56 = vld [vmem:[%s9242_s2 + $0x110] sm:$0xff]  ;;  %v5066_v57 = vpack.c.bf16 %v85_v50, %v81_v49  ;;  %v87_v59 = vld [vmem:[%s9242_s2 + $0x148] sm:$0xff] }
   0xe   :  { %5029 = vmatpush1.bf16.msra.mxu0 %v5028_v35  ;;  %v82_v55 = vld [vmem:[%s9242_s2 + $0x120] sm:$0xff]  ;;  %v84_v58 = vld [vmem:[%s9242_s2 + $0x130] sm:$0xff]  ;;  %v91_v60 = vld [vmem:[%s9242_s2 + $0x168] sm:$0xff] }
   0xf   :  { %5061 = vmatpush1.bf16.msra.mxu1 %v5060_v39  ;;  %5031 = vmatprep.subr.bf16.mxu0 %v5030_v40  ;;  %v89_v61 = vld [vmem:[%s9242_s2 + $0x158] sm:$0xff]  ;;  %v5036_v63 = vpack.c.bf16 %v82_v55, %v78_v54  ;;  %v5068_v0 = vpack.c.bf16 %v84_v58, %v80_v56  ;;  %v5038_v1 = vpack.c.bf16 %v91_v60, %v87_v59  ;;  %v86_v2 = vld [vmem:[%s9242_s2 + $0x140] sm:$0xff]  ;;  %v88_v5 = vld [vmem:[%s9242_s2 + $0x150] sm:$0xff] }
  0x10   :  { %5063 = vmatprep.subr.bf16.mxu1 %v5062_v44  ;;  %v93_v62 = vld [vmem:[%s9242_s2 + $0x178] sm:$0xff]  ;;  %v90_v4 = vld [vmem:[%s9242_s2 + $0x160] sm:$0xff]  ;;  %v92_v7 = vld [vmem:[%s9242_s2 + $0x170] sm:$0xff] }
  0x11   :  { %v5070_v6 = vpack.c.bf16 %v93_v62, %v89_v61  ;;  %v95_v8 = vld [vmem:[%s9242_s2 + $0x188] sm:$0xff]  ;;  %v97_v10 = vld [vmem:[%s9242_s2 + $0x198] sm:$0xff]  ;;  %v5040_v12 = vpack.c.bf16 %v90_v4, %v86_v2  ;;  %v5072_v13 = vpack.c.bf16 %v92_v7, %v88_v5  ;;  %v94_v15 = vld [vmem:[%s9242_s2 + $0x180] sm:$0xff] }
  0x12   :  { %5033 = vmatpush1.bf16.msra.mxu0 %v5032_v51  ;;  %v99_v9 = vld [vmem:[%s9242_s2 + $0x1a8] sm:$0xff]  ;;  %v101_v11 = vld [vmem:[%s9242_s2 + $0x1b8] sm:$0xff]  ;;  %v98_v16 = vld [vmem:[%s9242_s2 + $0x1a0] sm:$0xff] }
  0x13   :  { %5065 = vmatpush1.bf16.msra.mxu1 %v5064_v52  ;;  %5035 = vmatprep.subr.bf16.mxu0 %v5034_v53  ;;  %v5042_v14 = vpack.c.bf16 %v99_v9, %v95_v8  ;;  %v96_v17 = vld [vmem:[%s9242_s2 + $0x190] sm:$0xff]  ;;  %v5074_v18 = vpack.c.bf16 %v101_v11, %v97_v10  ;;  %v103_v20 = vld [vmem:[%s9242_s2 + $0x1c8] sm:$0xff]  ;;  %v105_v22 = vld [vmem:[%s9242_s2 + $0x1d8] sm:$0xff]  ;;  %v5044_v24 = vpack.c.bf16 %v98_v16, %v94_v15 }
  0x14   :  { %5067 = vmatprep.subr.bf16.mxu1 %v5066_v57  ;;  %v100_v19 = vld [vmem:[%s9242_s2 + $0x1b0] sm:$0xff]  ;;  %v107_v21 = vld [vmem:[%s9242_s2 + $0x1e8] sm:$0xff]  ;;  %v109_v23 = vld [vmem:[%s9242_s2 + $0x1f8] sm:$0xff] }
  0x15   :  { %v5076_v25 = vpack.c.bf16 %v100_v19, %v96_v17  ;;  %v5046_v26 = vpack.c.bf16 %v107_v21, %v103_v20  ;;  %v102_v27 = vld [vmem:[%s9242_s2 + $0x1c0] sm:$0xff]  ;;  %v104_v29 = vld [vmem:[%s9242_s2 + $0x1d0] sm:$0xff]  ;;  %v5078_v30 = vpack.c.bf16 %v109_v23, %v105_v22  ;;  %v287_v32 = vld [vmem:[%s9243_s3 + $0x8] sm:$0xff] }
  0x16   :  { %5037 = vmatpush1.bf16.msra.mxu0 %v5036_v63  ;;  %v106_v28 = vld [vmem:[%s9242_s2 + $0x1e0] sm:$0xff]  ;;  %v108_v31 = vld [vmem:[%s9242_s2 + $0x1f0] sm:$0xff]  ;;  %v291_v33 = vld [vmem:[%s9243_s3 + $0x28] sm:$0xff] }
  0x17   :  { %5069 = vmatpush1.bf16.msra.mxu1 %v5068_v0  ;;  %5039 = vmatprep.subr.bf16.mxu0 %v5038_v1  ;;  %v289_v34 = vld [vmem:[%s9243_s3 + $0x18] sm:$0xff]  ;;  %v5048_v36 = vpack.c.bf16 %v106_v28, %v102_v27  ;;  %v5080_v37 = vpack.c.bf16 %v108_v31, %v104_v29  ;;  %v7041_v38 = vpack.c.bf16 %v291_v33, %v287_v32  ;;  %v286_v39 = vld [vmem:[%s9243_s3] sm:$0xff]  ;;  %v288_v41 = vld [vmem:[%s9243_s3 + $0x10] sm:$0xff] }
  0x18   :  { %5071 = vmatprep.subr.bf16.mxu1 %v5070_v6  ;;  %v293_v35 = vld [vmem:[%s9243_s3 + $0x38] sm:$0xff]  ;;  %v290_v40 = vld [vmem:[%s9243_s3 + $0x20] sm:$0xff]  ;;  %v292_v43 = vld [vmem:[%s9243_s3 + $0x30] sm:$0xff] }
  0x19   :  { %v7052_v42 = vpack.c.bf16 %v293_v35, %v289_v34  ;;  %v295_v44 = vld [vmem:[%s9243_s3 + $0x48] sm:$0xff]  ;;  %v297_v46 = vld [vmem:[%s9243_s3 + $0x58] sm:$0xff]  ;;  %v44_v48 = vld [vmem:[%s9244_s0] sm:$0xff]  ;;  %v7072_v49 = vpack.c.bf16 %v290_v40, %v286_v39  ;;  %v7075_v50 = vpack.c.bf16 %v292_v43, %v288_v41 }
  0x1a   :  { %5041 = vmatpush1.bf16.msra.mxu0 %v5040_v12  ;;  %v299_v45 = vld [vmem:[%s9243_s3 + $0x68] sm:$0xff]  ;;  %v301_v47 = vld [vmem:[%s9243_s3 + $0x78] sm:$0xff]  ;;  %v294_v52 = vld [vmem:[%s9243_s3 + $0x40] sm:$0xff] }
  0x1b   :  { %5073 = vmatpush1.bf16.msra.mxu1 %v5072_v13  ;;  %5043 = vmatprep.subr.bf16.mxu0 %v5042_v14  ;;  %v7077_v51 = vpack.c.bf16 %v299_v45, %v295_v44  ;;  %v298_v53 = vld [vmem:[%s9243_s3 + $0x60] sm:$0xff]  ;;  %v296_v54 = vld [vmem:[%s9243_s3 + $0x50] sm:$0xff]  ;;  %v7089_v55 = vpack.c.bf16 %v301_v47, %v297_v46  ;;  %v303_v57 = vld [vmem:[%s9243_s3 + $0x88] sm:$0xff] }
  0x1c   :  { %5075 = vmatprep.subr.bf16.mxu1 %v5074_v18  ;;  %v300_v56 = vld [vmem:[%s9243_s3 + $0x70] sm:$0xff]  ;;  %v307_v58 = vld [vmem:[%s9243_s3 + $0xa8] sm:$0xff]  ;;  %v305_v59 = vld [vmem:[%s9243_s3 + $0x98] sm:$0xff]  ;;  %v7107_v61 = vpack.c.bf16 %v298_v53, %v294_v52 }
  0x1d   :  { %v309_v60 = vld [vmem:[%s9243_s3 + $0xb8] sm:$0xff]  ;;  %v7111_v62 = vpack.c.bf16 %v300_v56, %v296_v54  ;;  %v7113_v63 = vpack.c.bf16 %v307_v58, %v303_v57  ;;  %v302_v0 = vld [vmem:[%s9243_s3 + $0x80] sm:$0xff]  ;;  %v304_v2 = vld [vmem:[%s9243_s3 + $0x90] sm:$0xff] }
  0x1e   :  { %5045 = vmatpush1.bf16.msra.mxu0 %v5044_v24  ;;  %v306_v1 = vld [vmem:[%s9243_s3 + $0xa0] sm:$0xff]  ;;  %v7125_v4 = vpack.c.bf16 %v309_v60, %v305_v59  ;;  %v308_v5 = vld [vmem:[%s9243_s3 + $0xb0] sm:$0xff]  ;;  %v311_v6 = vld [vmem:[%s9243_s3 + $0xc8] sm:$0xff] }
  0x1f   :  { %5077 = vmatpush1.bf16.msra.mxu1 %v5076_v25  ;;  %5047 = vmatprep.subr.bf16.mxu0 %v5046_v26  ;;  %v315_v7 = vld [vmem:[%s9243_s3 + $0xe8] sm:$0xff]  ;;  %v313_v8 = vld [vmem:[%s9243_s3 + $0xd8] sm:$0xff]  ;;  %v7145_v10 = vpack.c.bf16 %v306_v1, %v302_v0  ;;  %v7152_v12 = vpack.c.bf16 %v308_v5, %v304_v2  ;;  %v310_v14 = vld [vmem:[%s9243_s3 + $0xc0] sm:$0xff] }
  0x20   :  { %5079 = vmatprep.subr.bf16.mxu1 %v5078_v30  ;;  %v317_v9 = vld [vmem:[%s9243_s3 + $0xf8] sm:$0xff]  ;;  %v45_v11 = vld [vmem:[%s9244_s0 + $0x8] sm:$0xff]  ;;  %v7154_v13 = vpack.c.bf16 %v315_v7, %v311_v6  ;;  %v314_v15 = vld [vmem:[%s9243_s3 + $0xe0] sm:$0xff] }
  0x21   :  { %v312_v16 = vld [vmem:[%s9243_s3 + $0xd0] sm:$0xff]  ;;  %v7166_v17 = vpack.c.bf16 %v317_v9, %v313_v8  ;;  %v319_v19 = vld [vmem:[%s9243_s3 + $0x108] sm:$0xff]  ;;  %v321_v21 = vld [vmem:[%s9243_s3 + $0x118] sm:$0xff]  ;;  %v7185_v23 = vpack.c.bf16 %v314_v15, %v310_v14 }
  0x22   :  { %5049 = vmatpush1.bf16.msra.mxu0 %v5048_v36  ;;  %v316_v18 = vld [vmem:[%s9243_s3 + $0xf0] sm:$0xff]  ;;  %v323_v20 = vld [vmem:[%s9243_s3 + $0x128] sm:$0xff]  ;;  %v325_v22 = vld [vmem:[%s9243_s3 + $0x138] sm:$0xff] }
  0x23   :  { %5081 = vmatpush1.bf16.msra.mxu1 %v5080_v37  ;;  %5083 = vmatprep.subr.bf16.mxu0 %v7041_v38  ;;  %v7190_v24 = vpack.c.bf16 %v316_v18, %v312_v16  ;;  %v7192_v25 = vpack.c.bf16 %v323_v20, %v319_v19  ;;  %v318_v26 = vld [vmem:[%s9243_s3 + $0x100] sm:$0xff]  ;;  %v320_v28 = vld [vmem:[%s9243_s3 + $0x110] sm:$0xff]  ;;  %v7204_v29 = vpack.c.bf16 %v325_v22, %v321_v21  ;;  %v327_v31 = vld [vmem:[%s9243_s3 + $0x148] sm:$0xff]  ;;  %v112_v20 = vlaneseq }
  0x24   :  { %5115 = vmatprep.subr.bf16.mxu1 %v7052_v42  ;;  %v322_v27 = vld [vmem:[%s9243_s3 + $0x120] sm:$0xff]  ;;  %v324_v30 = vld [vmem:[%s9243_s3 + $0x130] sm:$0xff]  ;;  %v331_v32 = vld [vmem:[%s9243_s3 + $0x168] sm:$0xff] }
  0x25   :  { %197 = vmatmul.mubr.f32.vlgmr.msra.gmra.mrb[0].mxu0 %v44_v48  ;;  %v329_v33 = vld [vmem:[%s9243_s3 + $0x158] sm:$0xff]  ;;  %v7222_v35 = vpack.c.bf16 %v322_v27, %v318_v26  ;;  %v7226_v36 = vpack.c.bf16 %v324_v30, %v320_v28  ;;  %v7228_v37 = vpack.c.bf16 %v331_v32, %v327_v31  ;;  %v326_v39 = vld [vmem:[%s9243_s3 + $0x140] sm:$0xff]  ;;  %v328_v41 = vld [vmem:[%s9243_s3 + $0x150] sm:$0xff]  ;;  %v7366_v21 = vshrl.u32 %v112_v20, 7 }
  0x26   :  { %274 = vmatmul.mubr.f32.vlgmr.msra.gmra.mrb[0].mxu1 %v44_v48  ;;  %5085 = vmatpush1.bf16.msra.mxu0 %v7072_v49  ;;  %v333_v34 = vld [vmem:[%s9243_s3 + $0x178] sm:$0xff]  ;;  %v330_v40 = vld [vmem:[%s9243_s3 + $0x160] sm:$0xff]  ;;  %v332_v44 = vld [vmem:[%s9243_s3 + $0x170] sm:$0xff] }
  0x27   :  { %5117 = vmatpush1.bf16.msra.mxu1 %v7075_v50  ;;  %5087 = vmatprep.subr.bf16.mxu0 %v7077_v51  ;;  %v7240_v43 = vpack.c.bf16 %v333_v34, %v329_v33  ;;  %v335_v45 = vld [vmem:[%s9243_s3 + $0x188] sm:$0xff]  ;;  %v337_v47 = vld [vmem:[%s9243_s3 + $0x198] sm:$0xff]  ;;  %v7258_v52 = vpack.c.bf16 %v330_v40, %v326_v39  ;;  %v7262_v53 = vpack.c.bf16 %v332_v44, %v328_v41  ;;  %v334_v56 = vld [vmem:[%s9243_s3 + $0x180] sm:$0xff]  ;;  %v7369_v28 = vsub.s32 0, %v7366_v21 }
  0x28   :  { %5119 = vmatprep.subr.bf16.mxu1 %v7089_v55  ;;  %202 = vmatprep.mubr.f32.mxu0 %v9258_v3  ;;  %v339_v46 = vld [vmem:[%s9243_s3 + $0x1a8] sm:$0xff]  ;;  %v341_v48 = vld [vmem:[%s9243_s3 + $0x1b8] sm:$0xff]  ;;  %v338_v57 = vld [vmem:[%s9243_s3 + $0x1a0] sm:$0xff]  ;;  %9403 = vst [vmem:[#allocation3_spill] sm:$0xff] %v7366_v21  ;;  %v7375_v32 = vsub.s32 1, %v7366_v21  ;;  %v9256_v33 = vsub.s32 2, %v7366_v21 }
  0x29   :  { %279 = vmatprep.mubr.f32.mxu1 %v9258_v3  ;;  %203 = vmatmul.mubr.f32.gmra.mrb[2].mxu0 %v45_v11  ;;  %v7264_v54 = vpack.c.bf16 %v339_v46, %v335_v45  ;;  %v336_v58 = vld [vmem:[%s9243_s3 + $0x190] sm:$0xff]  ;;  %v7276_v59 = vpack.c.bf16 %v341_v48, %v337_v47  ;;  %v343_v0 = vld [vmem:[%s9243_s3 + $0x1c8] sm:$0xff]  ;;  %v345_v2 = vld [vmem:[%s9243_s3 + $0x1d8] sm:$0xff]  ;;  %v7294_v6 = vpack.c.bf16 %v338_v57, %v334_v56  ;;  %v9257_v34 = vsub.s32 3, %v7366_v21 }
  0x2a   :  { %5089 = vmatpush1.bf16.msra.mxu0 %v7107_v61  ;;  %280 = vmatmul.mubr.f32.gmra.mrb[2].mxu1 %v45_v11  ;;  %v340_v60 = vld [vmem:[%s9243_s3 + $0x1b0] sm:$0xff]  ;;  %v347_v1 = vld [vmem:[%s9243_s3 + $0x1e8] sm:$0xff]  ;;  %v349_v5 = vld [vmem:[%s9243_s3 + $0x1f8] sm:$0xff]  ;;  %9404 = vst [vmem:[#allocation4_spill] sm:$0xff] %v7369_v28 }
  0x2b   :  { %5121 = vmatpush1.bf16.msra.mxu1 %v7111_v62  ;;  %5091 = vmatprep.subr.bf16.mxu0 %v7113_v63  ;;  %v7298_v7 = vpack.c.bf16 %v340_v60, %v336_v58  ;;  %v7300_v8 = vpack.c.bf16 %v347_v1, %v343_v0  ;;  %v342_v9 = vld [vmem:[%s9243_s3 + $0x1c0] sm:$0xff]  ;;  %v7309_v14 = vpack.c.bf16 %v349_v5, %v345_v2  ;;  %v344_v15 = vld [vmem:[%s9243_s3 + $0x1d0] sm:$0xff] }
  0x2c   :  { %5123 = vmatprep.subr.bf16.mxu1 %v7125_v4  ;;  %414 = vmatprep.mubr.f32.mxu0 %v9258_v3  ;;  %v346_v11 = vld [vmem:[%s9243_s3 + $0x1e0] sm:$0xff]  ;;  %v348_v16 = vld [vmem:[%s9243_s3 + $0x1f0] sm:$0xff]  ;;  %9405 = vst [vmem:[#allocation5_spill] sm:$0xff] %v7375_v32 }
  0x2d   :  { %485 = vmatprep.mubr.f32.mxu1 %v9258_v3  ;;  %v7318_v18 = vpack.c.bf16 %v346_v11, %v342_v9  ;;  %v7322_v19 = vpack.c.bf16 %v348_v16, %v344_v15  ;;  %v110_v31 = vld [vmem:[%s9245_s4] sm:$0xf] }
  0x2e   :  { %5093 = vmatpush1.bf16.msra.mxu0 %v7145_v10  ;;  %v115_v39 = vrot.slane %v110_v31, %v7369_v28  ;;  %v119_v40 = vrot.slane %v110_v31, %v7375_v32  ;;  %v123_v41 = vrot.slane %v110_v31, %v9256_v33  ;;  %v127_v45 = vrot.slane %v110_v31, %v9257_v34 }
  0x2f   :  { %5125 = vmatpush1.bf16.msra.mxu1 %v7152_v12  ;;  %5095 = vmatprep.subr.bf16.mxu0 %v7154_v13 }
  0x30   :  { %5127 = vmatprep.subr.bf16.mxu1 %v7166_v17 }
  0x32   :  { %5097 = vmatpush1.bf16.msra.mxu0 %v7185_v23 }
  0x33   :  { %5129 = vmatpush1.bf16.msra.mxu1 %v7190_v24  ;;  %5099 = vmatprep.subr.bf16.mxu0 %v7192_v25 }
  0x34   :  { %5131 = vmatprep.subr.bf16.mxu1 %v7204_v29 }
  0x36   :  { %5101 = vmatpush1.bf16.msra.mxu0 %v7222_v35 }
  0x37   :  { %5133 = vmatpush1.bf16.msra.mxu1 %v7226_v36  ;;  %5103 = vmatprep.subr.bf16.mxu0 %v7228_v37 }
  0x38   :  { %5135 = vmatprep.subr.bf16.mxu1 %v7240_v43 }
  0x3a   :  { %5105 = vmatpush1.bf16.msra.mxu0 %v7258_v52 }
  0x3b   :  { %5137 = vmatpush1.bf16.msra.mxu1 %v7262_v53  ;;  %5107 = vmatprep.subr.bf16.mxu0 %v7264_v54 }
  0x3c   :  { %5139 = vmatprep.subr.bf16.mxu1 %v7276_v59 }
  0x3e   :  { %5109 = vmatpush1.bf16.msra.mxu0 %v7294_v6 }
  0x3f   :  { %5141 = vmatpush1.bf16.msra.mxu1 %v7298_v7  ;;  %5111 = vmatprep.subr.bf16.mxu0 %v7300_v8 }
  0x40   :  { %5143 = vmatprep.subr.bf16.mxu1 %v7309_v14 }
  0x42   :  { %5113 = vmatpush1.bf16.msra.mxu0 %v7318_v18 }
  0x43   :  { %5145 = vmatpush1.bf16.msra.mxu1 %v7322_v19  ;;  %5147 = vmatprep.subr.bf16.mxu0 %v7041_v38 }
  0x44   :  { %5179 = vmatprep.subr.bf16.mxu1 %v7052_v42 }
  0x45   :  { %415 = vmatmul.mubr.f32.vlgmr.msra.gmra.mrb[4].mxu0 %v9258_v3 }
  0x46   :  { %486 = vmatmul.mubr.f32.vlgmr.msra.gmra.mrb[4].mxu1 %v9258_v3  ;;  %5149 = vmatpush1.bf16.msra.mxu0 %v7072_v49 }
  0x47   :  { %5181 = vmatpush1.bf16.msra.mxu1 %v7075_v50  ;;  %5151 = vmatprep.subr.bf16.mxu0 %v7077_v51 }
  0x48   :  { %5183 = vmatprep.subr.bf16.mxu1 %v7089_v55  ;;  %611 = vmatprep.mubr.f32.mxu0 %v9258_v3 }
  0x49   :  { %682 = vmatprep.mubr.f32.mxu1 %v9258_v3 }
  0x4a   :  { %5153 = vmatpush1.bf16.msra.mxu0 %v7107_v61 }
  0x4b   :  { %5185 = vmatpush1.bf16.msra.mxu1 %v7111_v62  ;;  %5155 = vmatprep.subr.bf16.mxu0 %v7113_v63 }
  0x4c   :  { %5187 = vmatprep.subr.bf16.mxu1 %v7125_v4 }
  0x4e   :  { %5157 = vmatpush1.bf16.msra.mxu0 %v7145_v10 }
  0x4f   :  { %5189 = vmatpush1.bf16.msra.mxu1 %v7152_v12  ;;  %5159 = vmatprep.subr.bf16.mxu0 %v7154_v13 }
  0x50   :  { %5191 = vmatprep.subr.bf16.mxu1 %v7166_v17 }
  0x52   :  { %5161 = vmatpush1.bf16.msra.mxu0 %v7185_v23 }
  0x53   :  { %5193 = vmatpush1.bf16.msra.mxu1 %v7190_v24  ;;  %5163 = vmatprep.subr.bf16.mxu0 %v7192_v25 }
  0x54   :  { %5195 = vmatprep.subr.bf16.mxu1 %v7204_v29 }
  0x56   :  { %5165 = vmatpush1.bf16.msra.mxu0 %v7222_v35 }
  0x57   :  { %5197 = vmatpush1.bf16.msra.mxu1 %v7226_v36  ;;  %5167 = vmatprep.subr.bf16.mxu0 %v7228_v37 }
  0x58   :  { %5199 = vmatprep.subr.bf16.mxu1 %v7240_v43 }
  0x5a   :  { %5169 = vmatpush1.bf16.msra.mxu0 %v7258_v52 }
  0x5b   :  { %5201 = vmatpush1.bf16.msra.mxu1 %v7262_v53  ;;  %5171 = vmatprep.subr.bf16.mxu0 %v7264_v54 }
  0x5c   :  { %5203 = vmatprep.subr.bf16.mxu1 %v7276_v59 }
  0x5e   :  { %5173 = vmatpush1.bf16.msra.mxu0 %v7294_v6 }
  0x5f   :  { %5205 = vmatpush1.bf16.msra.mxu1 %v7298_v7  ;;  %5175 = vmatprep.subr.bf16.mxu0 %v7300_v8 }
  0x60   :  { %5207 = vmatprep.subr.bf16.mxu1 %v7309_v14 }
  0x62   :  { %5177 = vmatpush1.bf16.msra.mxu0 %v7318_v18 }
  0x63   :  { %5209 = vmatpush1.bf16.msra.mxu1 %v7322_v19  ;;  %5211 = vmatprep.subr.bf16.mxu0 %v7041_v38 }
  0x64   :  { %5243 = vmatprep.subr.bf16.mxu1 %v7052_v42 }
  0xf8   :  { %v198_v22 = vpop.f32.mrb[0].mxu0 }
  0xf9   :  { %v200_v26 = vpop.f32.mrb[1].mxu0  ;;  %v275_v27 = vpop.f32.mrb[0].mxu1  ;;  %v7393_v0 = vadd.f32 %v198_v22, %v115_v39 }
  0xfa   :  { %v277_v30 = vpop.f32.mrb[1].mxu1  ;;  %v7395_v1 = vadd.f32 %v200_v26, %v119_v40  ;;  %v7402_v22 = vadd.f32 %v275_v27, %v123_v41 }
  0xfc   :  { %v204_v44 = vpop.f32.mrb[2].mxu0 }
  0xfd   :  { %v7385_v46 = vadd.f32 %v204_v44, %v115_v39  ;;  %v206_v47 = vpop.f32.mrb[3].mxu0  ;;  %v281_v48 = vpop.f32.mrb[2].mxu1 }
  0xfe   :  { %v7387_v56 = vadd.f32 %v206_v47, %v119_v40  ;;  %v7389_v57 = vadd.f32 %v281_v48, %v123_v41  ;;  %v283_v58 = vpop.f32.mrb[3].mxu1  ;;  %v7399_v47 = vadd.f32 %v277_v30, %v127_v45  ;;  %v6761_v41 = vmov 1966171168  }
  0xff   :  { %v7391_v60 = vadd.f32 %v283_v58, %v127_v45 }
 0x118   :  { %v416_v2 = vpop.f32.mrb[4].mxu0 }
 0x119   :  { %v492_v5 = vadd.f32 %v416_v2, %v7393_v0  ;;  %v487_v9 = vpop.f32.mrb[4].mxu1  ;;  %v418_v11 = vpop.f32.mrb[5].mxu0 }
 0x11a   :  { %v493_v15 = vadd.f32 %v418_v11, %v7395_v1  ;;  %v489_v16 = vpop.f32.mrb[5].mxu1  ;;  %v494_v39 = vadd.f32 %v487_v9, %v7402_v22  ;;  %v522_v9 = vunpack.c.l.s4 %v6761_v41 }
 0x11b   :  { %v4602_v31 = vmul.f32 -1.442695, %v492_v5  ;;  %v495_v48 = vadd.f32 %v489_v16, %v7399_v47 }
 0x11c   :  { %v4603_v44 = vmul.f32 -1.442695, %v493_v15 }
 0x11d   :  { %6497 = vpow2.f32 %v4602_v31  ;;  %v4604_v26 = vmul.f32 -1.442695, %v495_v48  ;;  %v523_v48 = vunpack.c.0.s8 %v522_v9 }
 0x11e   :  { %6499 = vpow2.f32 %v4603_v44 }
 0x11f   :  { %6501 = vpow2.f32 %v4604_v26 }
 0x120   :  { %6503 = vtanh.f32 %v494_v39  ;;  %v7409_v39 = vsub.s32 %v523_v48, %v7366_v21 }
 0x122   :  { %9406 = vst [vmem:[#allocation6_spill] sm:$0xff] %v7409_v39 }
 0x127   :  { %v6498_v40 = vpop.eup %6497 }
 0x128   :  { %v6500_v58 = vpop.eup %6499  ;;  %v499_v2 = vadd.f32 1.0, %v6498_v40 }
 0x129   :  { %v505_v11 = vadd.f32 1.0, %v6500_v58  ;;  %v6502_v5 = vpop.eup %6501 }
 0x12a   :  { %6505 = vrcp.f32 %v499_v2  ;;  %v6504_v15 = vpop.eup %6503  ;;  %v512_v44 = vadd.f32 1.0, %v6502_v5 }
 0x12b   :  { %6507 = vrcp.f32 %v505_v11 }
 0x12c   :  { %6509 = vrcp.f32 %v512_v44 }
 0x134   :  { %v6506_v30 = vpop.eup %6505 }
 0x135   :  { %v6508_v45 = vpop.eup %6507  ;;  %v516_v31 = vmul.f32 %v6506_v30, %v6504_v15 }
 0x136   :  { %v515_v16 = vmul.f32 0.0, %v6508_v45  ;;  %v6510_v26 = vpop.eup %6509 }
 0x138   :  { %v7405_v27 = vadd.f32 %v516_v31, %v515_v16 }
 0x13a   :  { %6511 = vtanh.f32 %v7405_v27 }
 0x144   :  { %v6512_v40 = vpop.eup %6511 }
 0x145   :  { %v519_v58 = vmul.f32 %v6512_v40, %v6510_v26 }
 0x147   :  { %v527_v2 = vrot.slane %v519_v58, %v7409_v39  ;;  %612 = vmatmul.mubr.f32.vlgmr.msra.gmra.mrb[6].mxu0 %v519_v58  ;;  %683 = vmatmul.mubr.f32.vlgmr.msra.gmra.mrb[6].mxu1 %v519_v58 }
 0x148   :  { %5213 = vmatpush1.bf16.msra.mxu0 %v7072_v49  ;;  %5245 = vmatpush1.bf16.msra.mxu1 %v7075_v50 }
 0x149   :  { %v528_v11 = vcombine.high %v527_v2, %v527_v2  ;;  %4605 = vst.sshfl [vmem:[#allocation2] sm:$0x1 pattern:$0x73625140] %v527_v2  ;;  %5215 = vmatprep.subr.bf16.mxu0 %v7077_v51  ;;  %5247 = vmatprep.subr.bf16.mxu1 %v7089_v55 }
 0x14a   :  { %827 = vmatprep.mubr.f32.mxu0 %v9258_v3  ;;  %898 = vmatprep.mubr.f32.mxu1 %v9258_v3 }
 0x14b   :  { %4606 = vst.sshfl [vmem:[#allocation2 + $0x8] sm:$0x1 pattern:$0x73625140] %v528_v11 }
 0x14c   :  { %5217 = vmatpush1.bf16.msra.mxu0 %v7107_v61  ;;  %5249 = vmatpush1.bf16.msra.mxu1 %v7111_v62 }
 0x14d   :  { %5219 = vmatprep.subr.bf16.mxu0 %v7113_v63  ;;  %5251 = vmatprep.subr.bf16.mxu1 %v7125_v4 }
 0x150   :  { %5221 = vmatpush1.bf16.msra.mxu0 %v7145_v10  ;;  %5253 = vmatpush1.bf16.msra.mxu1 %v7152_v12 }
 0x151   :  { %5223 = vmatprep.subr.bf16.mxu0 %v7154_v13  ;;  %5255 = vmatprep.subr.bf16.mxu1 %v7166_v17 }
 0x154   :  { %5225 = vmatpush1.bf16.msra.mxu0 %v7185_v23  ;;  %5257 = vmatpush1.bf16.msra.mxu1 %v7190_v24 }
 0x155   :  { %5227 = vmatprep.subr.bf16.mxu0 %v7192_v25  ;;  %5259 = vmatprep.subr.bf16.mxu1 %v7204_v29 }
 0x158   :  { %5229 = vmatpush1.bf16.msra.mxu0 %v7222_v35  ;;  %5261 = vmatpush1.bf16.msra.mxu1 %v7226_v36 }
 0x159   :  { %5231 = vmatprep.subr.bf16.mxu0 %v7228_v37  ;;  %5263 = vmatprep.subr.bf16.mxu1 %v7240_v43 }
 0x15c   :  { %5233 = vmatpush1.bf16.msra.mxu0 %v7258_v52  ;;  %5265 = vmatpush1.bf16.msra.mxu1 %v7262_v53 }
 0x15d   :  { %5235 = vmatprep.subr.bf16.mxu0 %v7264_v54  ;;  %5267 = vmatprep.subr.bf16.mxu1 %v7276_v59 }
 0x160   :  { %5237 = vmatpush1.bf16.msra.mxu0 %v7294_v6  ;;  %5269 = vmatpush1.bf16.msra.mxu1 %v7298_v7 }
 0x161   :  { %5239 = vmatprep.subr.bf16.mxu0 %v7300_v8  ;;  %5271 = vmatprep.subr.bf16.mxu1 %v7309_v14 }
 0x164   :  { %5241 = vmatpush1.bf16.msra.mxu0 %v7318_v18  ;;  %5273 = vmatpush1.bf16.msra.mxu1 %v7322_v19 }
 0x165   :  { %5275 = vmatprep.subr.bf16.mxu0 %v7041_v38  ;;  %5307 = vmatprep.subr.bf16.mxu1 %v7052_v42 }
 0x21a   :  { %v613_v5 = vpop.f32.mrb[6].mxu0  ;;  %v684_v15 = vpop.f32.mrb[6].mxu1 }
 0x21b   :  { %v693_v30 = vrot.slane %v613_v5, 6  ;;  %v615_v45 = vpop.f32.mrb[7].mxu0  ;;  %v686_v31 = vpop.f32.mrb[7].mxu1  ;;  %v695_v58 = vrot.slane %v684_v15, 6 }
 0x21c   :  { %v694_v44 = vrot.slane %v615_v45, 6  ;;  %v696_v26 = vrot.slane %v686_v31, 6  ;;  %v725_v31 = vrot.slane %v7405_v27, 6 }
 0x21d   :  { %v701_v16 = vadd.f32 %v693_v30, %v7393_v0  ;;  %v703_v11 = vadd.f32 %v695_v58, %v7402_v22 }
 0x21e   :  { %v702_v41 = vadd.f32 %v694_v44, %v7395_v1  ;;  %v704_v40 = vadd.f32 %v696_v26, %v7399_v47 }
 0x21f   :  { %v4607_v9 = vmul.f32 -1.442695, %v701_v16 }
 0x220   :  { %v4608_v48 = vmul.f32 -1.442695, %v702_v41  ;;  %v4609_v2 = vmul.f32 -1.442695, %v704_v40 }
 0x221   :  { %6513 = vpow2.f32 %v4607_v9 }
 0x222   :  { %6515 = vpow2.f32 %v4608_v48 }
 0x223   :  { %6517 = vpow2.f32 %v4609_v2 }
 0x224   :  { %6519 = vtanh.f32 %v703_v11 }
 0x22b   :  { %v6514_v33 = vpop.eup %6513 }
 0x22c   :  { %v6516_v5 = vpop.eup %6515  ;;  %v708_v34 = vadd.f32 1.0, %v6514_v33 }
 0x22d   :  { %v714_v45 = vadd.f32 1.0, %v6516_v5  ;;  %v6518_v30 = vpop.eup %6517 }
 0x22e   :  { %6521 = vrcp.f32 %v708_v34  ;;  %v6520_v44 = vpop.eup %6519  ;;  %v721_v48 = vadd.f32 1.0, %v6518_v30 }
 0x22f   :  { %6523 = vrcp.f32 %v714_v45 }
 0x230   :  { %6525 = vrcp.f32 %v721_v48 }
 0x238   :  { %v6522_v16 = vpop.eup %6521 }
 0x239   :  { %v6524_v41 = vpop.eup %6523  ;;  %v728_v9 = vmul.f32 %v6522_v16, %v6520_v44 }
 0x23a   :  { %v727_v15 = vmul.f32 %v6524_v41, %v725_v31  ;;  %v6526_v33 = vpop.eup %6525 }
 0x23c   :  { %v7451_v26 = vadd.f32 %v728_v9, %v727_v15 }
 0x23e   :  { %6527 = vtanh.f32 %v7451_v26 }
 0x248   :  { %v6528_v40 = vpop.eup %6527 }
 0x249   :  { %v731_v58 = vmul.f32 %v6528_v40, %v6526_v33 }
 0x24b   :  { %v739_v34 = vrot.slane %v731_v58, %v7409_v39  ;;  %v761_v2 = vrot.slane %v731_v58, 2 }
 0x24d   :  { %v740_v11 = vcombine.high %v739_v34, %v739_v34  ;;  %v747_v5 = vrot.slane %v739_v34, %v7409_v39  ;;  %828 = vmatmul.mubr.f32.vlgmr.msra.gmra.mrb[8].mxu0 %v761_v2  ;;  %899 = vmatmul.mubr.f32.vlgmr.msra.gmra.mrb[8].mxu1 %v761_v2 }
 0x24e   :  { %5277 = vmatpush1.bf16.msra.mxu0 %v7072_v49  ;;  %5309 = vmatpush1.bf16.msra.mxu1 %v7075_v50 }
 0x24f   :  { %v754_v27 = vrot.slane %v740_v11, %v7409_v39  ;;  %v755_v45 = vcombine.high %v747_v5, %v747_v5  ;;  %5279 = vmatprep.subr.bf16.mxu0 %v7077_v51  ;;  %5311 = vmatprep.subr.bf16.mxu1 %v7089_v55 }
 0x250   :  { %1042 = vmatprep.mubr.f32.mxu0 %v9258_v3  ;;  %1113 = vmatprep.mubr.f32.mxu1 %v9258_v3 }
 0x251   :  { %v756_v30 = vcombine.high %v754_v27, %v754_v27  ;;  %759 = vst [vmem:[#allocation2 + $0x1] sm:$0x1] %v755_v45 }
 0x252   :  { %5281 = vmatpush1.bf16.msra.mxu0 %v7107_v61  ;;  %5313 = vmatpush1.bf16.msra.mxu1 %v7111_v62 }
 0x253   :  { %760 = vst [vmem:[#allocation2 + $0x9] sm:$0x1] %v756_v30  ;;  %5283 = vmatprep.subr.bf16.mxu0 %v7113_v63  ;;  %5315 = vmatprep.subr.bf16.mxu1 %v7125_v4 }
 0x256   :  { %5285 = vmatpush1.bf16.msra.mxu0 %v7145_v10  ;;  %5317 = vmatpush1.bf16.msra.mxu1 %v7152_v12 }
 0x257   :  { %5287 = vmatprep.subr.bf16.mxu0 %v7154_v13  ;;  %5319 = vmatprep.subr.bf16.mxu1 %v7166_v17 }
 0x25a   :  { %5289 = vmatpush1.bf16.msra.mxu0 %v7185_v23  ;;  %5321 = vmatpush1.bf16.msra.mxu1 %v7190_v24 }
 0x25b   :  { %5291 = vmatprep.subr.bf16.mxu0 %v7192_v25  ;;  %5323 = vmatprep.subr.bf16.mxu1 %v7204_v29 }
 0x25e   :  { %5293 = vmatpush1.bf16.msra.mxu0 %v7222_v35  ;;  %5325 = vmatpush1.bf16.msra.mxu1 %v7226_v36 }
 0x25f   :  { %5295 = vmatprep.subr.bf16.mxu0 %v7228_v37  ;;  %5327 = vmatprep.subr.bf16.mxu1 %v7240_v43 }
 0x262   :  { %5297 = vmatpush1.bf16.msra.mxu0 %v7258_v52  ;;  %5329 = vmatpush1.bf16.msra.mxu1 %v7262_v53 }
 0x263   :  { %5299 = vmatprep.subr.bf16.mxu0 %v7264_v54  ;;  %5331 = vmatprep.subr.bf16.mxu1 %v7276_v59 }
 0x266   :  { %5301 = vmatpush1.bf16.msra.mxu0 %v7294_v6  ;;  %5333 = vmatpush1.bf16.msra.mxu1 %v7298_v7 }
 0x267   :  { %5303 = vmatprep.subr.bf16.mxu0 %v7300_v8  ;;  %5335 = vmatprep.subr.bf16.mxu1 %v7309_v14 }
 0x26a   :  { %5305 = vmatpush1.bf16.msra.mxu0 %v7318_v18  ;;  %5337 = vmatpush1.bf16.msra.mxu1 %v7322_v19 }
 0x26b   :  { %5339 = vmatprep.subr.bf16.mxu0 %v7041_v38  ;;  %5371 = vmatprep.subr.bf16.mxu1 %v7052_v42 }
 0x320   :  { %v829_v44 = vpop.f32.mrb[8].mxu0  ;;  %v900_v16 = vpop.f32.mrb[8].mxu1 }
 0x321   :  { %v909_v31 = vrot.slane %v829_v44, 4  ;;  %v831_v41 = vpop.f32.mrb[9].mxu0  ;;  %v902_v9 = vpop.f32.mrb[9].mxu1  ;;  %v911_v11 = vrot.slane %v900_v16, 4 }
 0x322   :  { %v910_v48 = vrot.slane %v831_v41, 4  ;;  %v912_v34 = vrot.slane %v902_v9, 4  ;;  %v941_v9 = vrot.slane %v7451_v26, 6 }
 0x323   :  { %v917_v15 = vadd.f32 %v909_v31, %v7393_v0  ;;  %v919_v27 = vadd.f32 %v911_v11, %v7402_v22 }
 0x324   :  { %v918_v33 = vadd.f32 %v910_v48, %v7395_v1  ;;  %v920_v2 = vadd.f32 %v912_v34, %v7399_v47 }
 0x325   :  { %v4610_v40 = vmul.f32 -1.442695, %v917_v15 }
 0x326   :  { %v4611_v58 = vmul.f32 -1.442695, %v918_v33  ;;  %v4612_v5 = vmul.f32 -1.442695, %v920_v2 }
 0x327   :  { %6529 = vpow2.f32 %v4610_v40 }
 0x328   :  { %6531 = vpow2.f32 %v4611_v58 }
 0x329   :  { %6533 = vpow2.f32 %v4612_v5 }
 0x32a   :  { %6535 = vtanh.f32 %v919_v27 }
 0x331   :  { %v6530_v45 = vpop.eup %6529 }
 0x332   :  { %v6532_v30 = vpop.eup %6531  ;;  %v924_v44 = vadd.f32 1.0, %v6530_v45 }
 0x333   :  { %v930_v41 = vadd.f32 1.0, %v6532_v30  ;;  %v6534_v31 = vpop.eup %6533 }
 0x334   :  { %6537 = vrcp.f32 %v924_v44  ;;  %v6536_v48 = vpop.eup %6535  ;;  %v937_v58 = vadd.f32 1.0, %v6534_v31 }
 0x335   :  { %6539 = vrcp.f32 %v930_v41 }
 0x336   :  { %6541 = vrcp.f32 %v937_v58 }
 0x33e   :  { %v6538_v15 = vpop.eup %6537 }
 0x33f   :  { %v6540_v33 = vpop.eup %6539  ;;  %v944_v40 = vmul.f32 %v6538_v15, %v6536_v48 }
 0x340   :  { %v943_v16 = vmul.f32 %v6540_v33, %v941_v9  ;;  %v6542_v2 = vpop.eup %6541 }
 0x342   :  { %v7496_v34 = vadd.f32 %v944_v40, %v943_v16 }
 0x344   :  { %6543 = vtanh.f32 %v7496_v34 }
 0x34e   :  { %v6544_v11 = vpop.eup %6543 }
 0x34f   :  { %v947_v5 = vmul.f32 %v6544_v11, %v6542_v2 }
 0x351   :  { %v949_v27 = vcombine.high %v947_v5, %v947_v5  ;;  %v976_v45 = vrot.slane %v947_v5, 4 }
 0x353   :  { %v956_v30 = vrot.slane %v949_v27, %v7409_v39  ;;  %1043 = vmatmul.mubr.f32.vlgmr.msra.gmra.mrb[10].mxu0 %v976_v45  ;;  %1114 = vmatmul.mubr.f32.vlgmr.msra.gmra.mrb[10].mxu1 %v976_v45 }
 0x354   :  { %5341 = vmatpush1.bf16.msra.mxu0 %v7072_v49  ;;  %5373 = vmatpush1.bf16.msra.mxu1 %v7075_v50 }
 0x355   :  { %v957_v26 = vcombine.high %v956_v30, %v956_v30  ;;  %4613 = vst.sshfl [vmem:[#allocation2 + $0x2] sm:$0x1 pattern:$0x73625140] %v956_v30  ;;  %5343 = vmatprep.subr.bf16.mxu0 %v7077_v51  ;;  %5375 = vmatprep.subr.bf16.mxu1 %v7089_v55 }
 0x356   :  { %1259 = vmatprep.mubr.f32.mxu0 %v9258_v3  ;;  %1330 = vmatprep.mubr.f32.mxu1 %v9258_v3 }
 0x357   :  { %4614 = vst.sshfl [vmem:[#allocation2 + $0xa] sm:$0x1 pattern:$0x73625140] %v957_v26 }
 0x358   :  { %5345 = vmatpush1.bf16.msra.mxu0 %v7107_v61  ;;  %5377 = vmatpush1.bf16.msra.mxu1 %v7111_v62 }
 0x359   :  { %5347 = vmatprep.subr.bf16.mxu0 %v7113_v63  ;;  %5379 = vmatprep.subr.bf16.mxu1 %v7125_v4 }
 0x35c   :  { %5349 = vmatpush1.bf16.msra.mxu0 %v7145_v10  ;;  %5381 = vmatpush1.bf16.msra.mxu1 %v7152_v12 }
 0x35d   :  { %5351 = vmatprep.subr.bf16.mxu0 %v7154_v13  ;;  %5383 = vmatprep.subr.bf16.mxu1 %v7166_v17 }
 0x360   :  { %5353 = vmatpush1.bf16.msra.mxu0 %v7185_v23  ;;  %5385 = vmatpush1.bf16.msra.mxu1 %v7190_v24 }
 0x361   :  { %5355 = vmatprep.subr.bf16.mxu0 %v7192_v25  ;;  %5387 = vmatprep.subr.bf16.mxu1 %v7204_v29 }
 0x364   :  { %5357 = vmatpush1.bf16.msra.mxu0 %v7222_v35  ;;  %5389 = vmatpush1.bf16.msra.mxu1 %v7226_v36 }
 0x365   :  { %5359 = vmatprep.subr.bf16.mxu0 %v7228_v37  ;;  %5391 = vmatprep.subr.bf16.mxu1 %v7240_v43 }
 0x368   :  { %5361 = vmatpush1.bf16.msra.mxu0 %v7258_v52  ;;  %5393 = vmatpush1.bf16.msra.mxu1 %v7262_v53 }
 0x369   :  { %5363 = vmatprep.subr.bf16.mxu0 %v7264_v54  ;;  %5395 = vmatprep.subr.bf16.mxu1 %v7276_v59 }
 0x36c   :  { %5365 = vmatpush1.bf16.msra.mxu0 %v7294_v6  ;;  %5397 = vmatpush1.bf16.msra.mxu1 %v7298_v7 }
 0x36d   :  { %5367 = vmatprep.subr.bf16.mxu0 %v7300_v8  ;;  %5399 = vmatprep.subr.bf16.mxu1 %v7309_v14 }
 0x370   :  { %5369 = vmatpush1.bf16.msra.mxu0 %v7318_v18  ;;  %5401 = vmatpush1.bf16.msra.mxu1 %v7322_v19 }
 0x371   :  { %5403 = vmatprep.subr.bf16.mxu0 %v7041_v38  ;;  %5435 = vmatprep.subr.bf16.mxu1 %v7052_v42 }
 0x426   :  { %v1044_v44 = vpop.f32.mrb[10].mxu0  ;;  %v1115_v41 = vpop.f32.mrb[10].mxu1 }
 0x427   :  { %v1124_v31 = vrot.slane %v1044_v44, 2  ;;  %v1046_v48 = vpop.f32.mrb[11].mxu0  ;;  %v1117_v15 = vpop.f32.mrb[11].mxu1  ;;  %v1126_v5 = vrot.slane %v1115_v41, 2 }
 0x428   :  { %v1125_v9 = vrot.slane %v1046_v48, 2  ;;  %v1127_v2 = vrot.slane %v1117_v15, 2  ;;  %v1156_v15 = vrot.slane %v7496_v34, 6 }
 0x429   :  { %v1132_v33 = vadd.f32 %v1124_v31, %v7393_v0  ;;  %v1134_v45 = vadd.f32 %v1126_v5, %v7402_v22 }
 0x42a   :  { %v1133_v40 = vadd.f32 %v1125_v9, %v7395_v1  ;;  %v1135_v11 = vadd.f32 %v1127_v2, %v7399_v47 }
 0x42b   :  { %v4615_v58 = vmul.f32 -1.442695, %v1132_v33 }
 0x42c   :  { %v4616_v16 = vmul.f32 -1.442695, %v1133_v40  ;;  %v4617_v27 = vmul.f32 -1.442695, %v1135_v11 }
 0x42d   :  { %6545 = vpow2.f32 %v4615_v58 }
 0x42e   :  { %6547 = vpow2.f32 %v4616_v16 }
 0x42f   :  { %6549 = vpow2.f32 %v4617_v27 }
 0x430   :  { %6551 = vtanh.f32 %v1134_v45 }
 0x437   :  { %v6546_v30 = vpop.eup %6545 }
 0x438   :  { %v6548_v26 = vpop.eup %6547  ;;  %v1139_v44 = vadd.f32 1.0, %v6546_v30 }
 0x439   :  { %v1145_v48 = vadd.f32 1.0, %v6548_v26  ;;  %v6550_v0 = vpop.eup %6549 }
 0x43a   :  { %6553 = vrcp.f32 %v1139_v44  ;;  %v6552_v1 = vpop.eup %6551  ;;  %v1152_v47 = vadd.f32 1.0, %v6550_v0 }
 0x43b   :  { %6555 = vrcp.f32 %v1145_v48 }
 0x43c   :  { %6557 = vrcp.f32 %v1152_v47 }
 0x444   :  { %v6554_v31 = vpop.eup %6553 }
 0x445   :  { %v6556_v9 = vpop.eup %6555  ;;  %v1159_v33 = vmul.f32 %v6554_v31, %v6552_v1 }
 0x446   :  { %v1158_v41 = vmul.f32 %v6556_v9, %v1156_v15  ;;  %v6558_v22 = vpop.eup %6557 }
 0x448   :  { %v7539_v40 = vadd.f32 %v1159_v33, %v1158_v41 }
 0x44a   :  { %6559 = vtanh.f32 %v7539_v40 }
 0x454   :  { %v6560_v58 = vpop.eup %6559 }
 0x455   :  { %v1162_v16 = vmul.f32 %v6560_v58, %v6558_v22 }
 0x457   :  { %v1164_v2 = vcombine.high %v1162_v16, %v1162_v16  ;;  %v1193_v11 = vrot.slane %v1162_v16, 6 }
 0x459   :  { %v1171_v5 = vrot.slane %v1164_v2, %v7409_v39  ;;  %1260 = vmatmul.mubr.f32.vlgmr.msra.gmra.mrb[12].mxu0 %v1193_v11  ;;  %1331 = vmatmul.mubr.f32.vlgmr.msra.gmra.mrb[12].mxu1 %v1193_v11 }
 0x45a   :  { %5405 = vmatpush1.bf16.msra.mxu0 %v7072_v49  ;;  %5437 = vmatpush1.bf16.msra.mxu1 %v7075_v50 }
 0x45b   :  { %v1172_v34 = vcombine.high %v1171_v5, %v1171_v5  ;;  %v1179_v27 = vrot.slane %v1171_v5, %v7409_v39  ;;  %5407 = vmatprep.subr.bf16.mxu0 %v7077_v51  ;;  %5439 = vmatprep.subr.bf16.mxu1 %v7089_v55 }
 0x45c   :  { %1459 = vmatprep.mubr.f32.mxu0 %v9258_v3  ;;  %1530 = vmatprep.mubr.f32.mxu1 %v9258_v3 }
 0x45d   :  { %v1186_v45 = vrot.slane %v1172_v34, %v7409_v39  ;;  %v1187_v30 = vcombine.high %v1179_v27, %v1179_v27 }
 0x45e   :  { %5409 = vmatpush1.bf16.msra.mxu0 %v7107_v61  ;;  %5441 = vmatpush1.bf16.msra.mxu1 %v7111_v62 }
 0x45f   :  { %v1188_v26 = vcombine.high %v1186_v45, %v1186_v45  ;;  %1191 = vst [vmem:[#allocation2 + $0x3] sm:$0x1] %v1187_v30  ;;  %5411 = vmatprep.subr.bf16.mxu0 %v7113_v63  ;;  %5443 = vmatprep.subr.bf16.mxu1 %v7125_v4  ;;  %v1361_v45 = vrot.slane %v7539_v40, 6 }
 0x461   :  { %1192 = vst [vmem:[#allocation2 + $0xb] sm:$0x1] %v1188_v26 }
 0x462   :  { %5413 = vmatpush1.bf16.msra.mxu0 %v7145_v10  ;;  %5445 = vmatpush1.bf16.msra.mxu1 %v7152_v12 }
 0x463   :  { %5415 = vmatprep.subr.bf16.mxu0 %v7154_v13  ;;  %5447 = vmatprep.subr.bf16.mxu1 %v7166_v17 }
 0x466   :  { %5417 = vmatpush1.bf16.msra.mxu0 %v7185_v23  ;;  %5449 = vmatpush1.bf16.msra.mxu1 %v7190_v24 }
 0x467   :  { %5419 = vmatprep.subr.bf16.mxu0 %v7192_v25  ;;  %5451 = vmatprep.subr.bf16.mxu1 %v7204_v29 }
 0x46a   :  { %5421 = vmatpush1.bf16.msra.mxu0 %v7222_v35  ;;  %5453 = vmatpush1.bf16.msra.mxu1 %v7226_v36 }
 0x46b   :  { %5423 = vmatprep.subr.bf16.mxu0 %v7228_v37  ;;  %5455 = vmatprep.subr.bf16.mxu1 %v7240_v43 }
 0x46e   :  { %5425 = vmatpush1.bf16.msra.mxu0 %v7258_v52  ;;  %5457 = vmatpush1.bf16.msra.mxu1 %v7262_v53 }
 0x46f   :  { %5427 = vmatprep.subr.bf16.mxu0 %v7264_v54  ;;  %5459 = vmatprep.subr.bf16.mxu1 %v7276_v59 }
 0x472   :  { %5429 = vmatpush1.bf16.msra.mxu0 %v7294_v6  ;;  %5461 = vmatpush1.bf16.msra.mxu1 %v7298_v7 }
 0x473   :  { %5431 = vmatprep.subr.bf16.mxu0 %v7300_v8  ;;  %5463 = vmatprep.subr.bf16.mxu1 %v7309_v14 }
 0x476   :  { %5433 = vmatpush1.bf16.msra.mxu0 %v7318_v18  ;;  %5465 = vmatpush1.bf16.msra.mxu1 %v7322_v19 }
 0x477   :  { %5467 = vmatprep.subr.bf16.mxu0 %v7041_v38  ;;  %5499 = vmatprep.subr.bf16.mxu1 %v7052_v42 }
 0x52c   :  { %v1261_v44 = vpop.f32.mrb[12].mxu0  ;;  %v1332_v48 = vpop.f32.mrb[12].mxu1 }
 0x52d   :  { %v1337_v0 = vadd.f32 %v1261_v44, %v7385_v46  ;;  %v1263_v1 = vpop.f32.mrb[13].mxu0  ;;  %v1334_v31 = vpop.f32.mrb[13].mxu1  ;;  %v1339_v22 = vadd.f32 %v1332_v48, %v7389_v57 }
 0x52e   :  { %v1338_v15 = vadd.f32 %v1263_v1, %v7387_v56  ;;  %v1340_v47 = vadd.f32 %v1334_v31, %v7391_v60 }
 0x52f   :  { %v4618_v9 = vmul.f32 -1.442695, %v1337_v0 }
 0x530   :  { %v4619_v33 = vmul.f32 -1.442695, %v1338_v15  ;;  %v4620_v41 = vmul.f32 -1.442695, %v1340_v47 }
 0x531   :  { %6561 = vpow2.f32 %v4618_v9 }
 0x532   :  { %6563 = vpow2.f32 %v4619_v33 }
 0x533   :  { %6565 = vpow2.f32 %v4620_v41 }
 0x534   :  { %6567 = vtanh.f32 %v1339_v22 }
 0x53b   :  { %v6562_v58 = vpop.eup %6561 }
 0x53c   :  { %v6564_v16 = vpop.eup %6563  ;;  %v1344_v2 = vadd.f32 1.0, %v6562_v58 }
 0x53d   :  { %v1350_v11 = vadd.f32 1.0, %v6564_v16  ;;  %v6566_v5 = vpop.eup %6565 }
 0x53e   :  { %6569 = vrcp.f32 %v1344_v2  ;;  %v6568_v34 = vpop.eup %6567  ;;  %v1357_v44 = vadd.f32 1.0, %v6566_v5 }
 0x53f   :  { %6571 = vrcp.f32 %v1350_v11 }
 0x540   :  { %6573 = vrcp.f32 %v1357_v44 }
 0x548   :  { %v6570_v27 = vpop.eup %6569 }
 0x549   :  { %v6572_v30 = vpop.eup %6571  ;;  %v1364_v26 = vmul.f32 %v6570_v27, %v6568_v34 }
 0x54a   :  { %v1363_v0 = vmul.f32 %v6572_v30, %v1361_v45  ;;  %v6574_v48 = vpop.eup %6573 }
 0x54c   :  { %v7584_v1 = vadd.f32 %v1364_v26, %v1363_v0 }
 0x54e   :  { %6575 = vtanh.f32 %v7584_v1 }
 0x558   :  { %v6576_v31 = vpop.eup %6575 }
 0x559   :  { %v1367_v15 = vmul.f32 %v6576_v31, %v6574_v48 }
 0x55b   :  { %v1375_v9 = vrot.slane %v1367_v15, %v7409_v39  ;;  %1460 = vmatmul.mubr.f32.vlgmr.msra.gmra.mrb[14].mxu0 %v1367_v15  ;;  %1531 = vmatmul.mubr.f32.vlgmr.msra.gmra.mrb[14].mxu1 %v1367_v15 }
 0x55c   :  { %5469 = vmatpush1.bf16.msra.mxu0 %v7072_v49  ;;  %5501 = vmatpush1.bf16.msra.mxu1 %v7075_v50 }
 0x55d   :  { %v1376_v40 = vcombine.high %v1375_v9, %v1375_v9  ;;  %4621 = vst.sshfl [vmem:[#allocation2 + $0x4] sm:$0x1 pattern:$0x73625140] %v1375_v9  ;;  %5471 = vmatprep.subr.bf16.mxu0 %v7077_v51  ;;  %5503 = vmatprep.subr.bf16.mxu1 %v7089_v55 }
 0x55e   :  { %1675 = vmatprep.mubr.f32.mxu0 %v9258_v3  ;;  %1746 = vmatprep.mubr.f32.mxu1 %v9258_v3 }
 0x55f   :  { %4622 = vst.sshfl [vmem:[#allocation2 + $0xc] sm:$0x1 pattern:$0x73625140] %v1376_v40  ;;  %v1573_v40 = vrot.slane %v7584_v1, 6 }
 0x560   :  { %5473 = vmatpush1.bf16.msra.mxu0 %v7107_v61  ;;  %5505 = vmatpush1.bf16.msra.mxu1 %v7111_v62 }
 0x561   :  { %5475 = vmatprep.subr.bf16.mxu0 %v7113_v63  ;;  %5507 = vmatprep.subr.bf16.mxu1 %v7125_v4 }
 0x564   :  { %5477 = vmatpush1.bf16.msra.mxu0 %v7145_v10  ;;  %5509 = vmatpush1.bf16.msra.mxu1 %v7152_v12 }
 0x565   :  { %5479 = vmatprep.subr.bf16.mxu0 %v7154_v13  ;;  %5511 = vmatprep.subr.bf16.mxu1 %v7166_v17 }
 0x568   :  { %5481 = vmatpush1.bf16.msra.mxu0 %v7185_v23  ;;  %5513 = vmatpush1.bf16.msra.mxu1 %v7190_v24 }
 0x569   :  { %5483 = vmatprep.subr.bf16.mxu0 %v7192_v25  ;;  %5515 = vmatprep.subr.bf16.mxu1 %v7204_v29 }
 0x56c   :  { %5485 = vmatpush1.bf16.msra.mxu0 %v7222_v35  ;;  %5517 = vmatpush1.bf16.msra.mxu1 %v7226_v36 }
 0x56d   :  { %5487 = vmatprep.subr.bf16.mxu0 %v7228_v37  ;;  %5519 = vmatprep.subr.bf16.mxu1 %v7240_v43 }
 0x570   :  { %5489 = vmatpush1.bf16.msra.mxu0 %v7258_v52  ;;  %5521 = vmatpush1.bf16.msra.mxu1 %v7262_v53 }
 0x571   :  { %5491 = vmatprep.subr.bf16.mxu0 %v7264_v54  ;;  %5523 = vmatprep.subr.bf16.mxu1 %v7276_v59 }
 0x574   :  { %5493 = vmatpush1.bf16.msra.mxu0 %v7294_v6  ;;  %5525 = vmatpush1.bf16.msra.mxu1 %v7298_v7 }
 0x575   :  { %5495 = vmatprep.subr.bf16.mxu0 %v7300_v8  ;;  %5527 = vmatprep.subr.bf16.mxu1 %v7309_v14 }
 0x578   :  { %5497 = vmatpush1.bf16.msra.mxu0 %v7318_v18  ;;  %5529 = vmatpush1.bf16.msra.mxu1 %v7322_v19 }
 0x579   :  { %5531 = vmatprep.subr.bf16.mxu0 %v7041_v38  ;;  %5563 = vmatprep.subr.bf16.mxu1 %v7052_v42 }
 0x62e   :  { %v1461_v33 = vpop.f32.mrb[14].mxu0  ;;  %v1532_v47 = vpop.f32.mrb[14].mxu1 }
 0x62f   :  { %v1541_v41 = vrot.slane %v1461_v33, 6  ;;  %v1463_v22 = vpop.f32.mrb[15].mxu0  ;;  %v1534_v58 = vpop.f32.mrb[15].mxu1  ;;  %v1543_v38 = vrot.slane %v1532_v47, 6 }
 0x630   :  { %v1542_v16 = vrot.slane %v1463_v22, 6  ;;  %v1544_v27 = vrot.slane %v1534_v58, 6 }
 0x631   :  { %v1549_v2 = vadd.f32 %v1541_v41, %v7385_v46  ;;  %v1551_v42 = vadd.f32 %v1543_v38, %v7389_v57 }
 0x632   :  { %v1550_v11 = vadd.f32 %v1542_v16, %v7387_v56  ;;  %v1552_v45 = vadd.f32 %v1544_v27, %v7391_v60 }
 0x633   :  { %v4623_v5 = vmul.f32 -1.442695, %v1549_v2 }
 0x634   :  { %v4624_v34 = vmul.f32 -1.442695, %v1550_v11  ;;  %v4625_v30 = vmul.f32 -1.442695, %v1552_v45 }
 0x635   :  { %6577 = vpow2.f32 %v4623_v5 }
 0x636   :  { %6579 = vpow2.f32 %v4624_v34 }
 0x637   :  { %6581 = vpow2.f32 %v4625_v30 }
 0x638   :  { %6583 = vtanh.f32 %v1551_v42 }
 0x63f   :  { %v6578_v26 = vpop.eup %6577 }
 0x640   :  { %v6580_v44 = vpop.eup %6579  ;;  %v1556_v0 = vadd.f32 1.0, %v6578_v26 }
 0x641   :  { %v1562_v48 = vadd.f32 1.0, %v6580_v44  ;;  %v6582_v31 = vpop.eup %6581  ;;  %v2162_v44 = vld [vmem:[%s9246_s8] sm:$0xff] }
 0x642   :  { %6585 = vrcp.f32 %v1556_v0  ;;  %v6584_v15 = vpop.eup %6583  ;;  %v1569_v22 = vadd.f32 1.0, %v6582_v31  ;;  %v2166_v0 = vld [vmem:[%s9246_s8 + $0x20] sm:$0xff]  ;;  %v2171_v31 = vld [vmem:[%s9246_s8 + $0x48] sm:$0xff] }
 0x643   :  { %6587 = vrcp.f32 %v1562_v48 }
 0x644   :  { %6589 = vrcp.f32 %v1569_v22 }
 0x64c   :  { %v6586_v9 = vpop.eup %6585 }
 0x64d   :  { %v6588_v33 = vpop.eup %6587  ;;  %v1576_v41 = vmul.f32 %v6586_v9, %v6584_v15  ;;  %v2175_v15 = vld [vmem:[%s9246_s8 + $0x68] sm:$0xff] }
 0x64e   :  { %v1575_v47 = vmul.f32 %v6588_v33, %v1573_v40  ;;  %v6590_v16 = vpop.eup %6589  ;;  %v5628_v40 = vpack.c.bf16 %v2166_v0, %v2162_v44  ;;  %v5630_v22 = vpack.c.bf16 %v2175_v15, %v2171_v31  ;;  %v9260_v0 = vmov 0.0|0.0   ;;  %v2045_v31 = vld [vmem:[%s9247_s5 + $0x10] sm:$0xff]  ;;  %v2046_v15 = vld [vmem:[%s9247_s5 + $0x18] sm:$0xff] }
 0x650   :  { %v7627_v58 = vadd.f32 %v1576_v41, %v1575_v47  ;;  %v2170_v47 = vld [vmem:[%s9246_s8 + $0x40] sm:$0xff] }
 0x652   :  { %6591 = vtanh.f32 %v7627_v58 }
 0x65c   :  { %v6592_v2 = vpop.eup %6591 }
 0x65d   :  { %v1579_v11 = vmul.f32 %v6592_v2, %v6590_v16  ;;  %v2179_v16 = vld [vmem:[%s9246_s8 + $0x88] sm:$0xff] }
 0x65e   :  { %v2183_v2 = vld [vmem:[%s9246_s8 + $0xa8] sm:$0xff] }
 0x65f   :  { %v1587_v5 = vrot.slane %v1579_v11, %v7409_v39  ;;  %v1609_v34 = vrot.slane %v1579_v11, 2 }
 0x661   :  { %v1588_v27 = vcombine.high %v1587_v5, %v1587_v5  ;;  %v1595_v45 = vrot.slane %v1587_v5, %v7409_v39  ;;  %1676 = vmatmul.mubr.f32.vlgmr.msra.gmra.mrb[16].mxu0 %v1609_v34  ;;  %1747 = vmatmul.mubr.f32.vlgmr.msra.gmra.mrb[16].mxu1 %v1609_v34 }
 0x662   :  { %5533 = vmatpush1.bf16.msra.mxu0 %v7072_v49  ;;  %5565 = vmatpush1.bf16.msra.mxu1 %v7075_v50  ;;  %v2163_v49 = vld [vmem:[%s9246_s8 + $0x8] sm:$0xff] }
 0x663   :  { %v1602_v1 = vrot.slane %v1588_v27, %v7409_v39  ;;  %v1603_v38 = vcombine.high %v1595_v45, %v1595_v45  ;;  %5535 = vmatprep.subr.bf16.mxu0 %v7077_v51  ;;  %5567 = vmatprep.subr.bf16.mxu1 %v7089_v55  ;;  %v2167_v50 = vld [vmem:[%s9246_s8 + $0x28] sm:$0xff]  ;;  %v5634_v27 = vpack.c.bf16 %v2183_v2, %v2179_v16  ;;  %v2178_v45 = vld [vmem:[%s9246_s8 + $0x80] sm:$0xff] }
 0x664   :  { %1890 = vmatprep.mubr.f32.mxu0 %v9258_v3  ;;  %1961 = vmatprep.mubr.f32.mxu1 %v9258_v3  ;;  %v5626_v51 = vpack.c.bf16 %v2167_v50, %v2163_v49  ;;  %v2059_v16 = vld [vmem:[%s9247_s5 + $0x80] sm:$0xff]  ;;  %v2060_v2 = vld [vmem:[%s9247_s5 + $0x88] sm:$0xff] }
 0x665   :  { %v1604_v30 = vcombine.high %v1602_v1, %v1602_v1  ;;  %1607 = vst [vmem:[#allocation2 + $0x5] sm:$0x1] %v1603_v38  ;;  %v2182_v1 = vld [vmem:[%s9246_s8 + $0xa0] sm:$0xff]  ;;  %v2187_v38 = vld [vmem:[%s9246_s8 + $0xc8] sm:$0xff] }
 0x666   :  { %5537 = vmatpush1.bf16.msra.mxu0 %v7107_v61  ;;  %5569 = vmatpush1.bf16.msra.mxu1 %v7111_v62  ;;  %v5636_v49 = vpack.c.bf16 %v2182_v1, %v2178_v45  ;;  %v2061_v45 = vld [vmem:[%s9247_s5 + $0x90] sm:$0xff]  ;;  %v2062_v1 = vld [vmem:[%s9247_s5 + $0x98] sm:$0xff] }
 0x667   :  { %1608 = vst [vmem:[#allocation2 + $0xd] sm:$0x1] %v1604_v30  ;;  %5539 = vmatprep.subr.bf16.mxu0 %v7113_v63  ;;  %5571 = vmatprep.subr.bf16.mxu1 %v7125_v4  ;;  %v2191_v30 = vld [vmem:[%s9246_s8 + $0xe8] sm:$0xff] }
 0x668   :  { %v5638_v50 = vpack.c.bf16 %v2191_v30, %v2187_v38  ;;  %v2053_v38 = vld [vmem:[%s9247_s5 + $0x50] sm:$0xff]  ;;  %v5598_v30 = vpack.c.bf16 %v2062_v1, %v2061_v45 }
 0x66a   :  { %5541 = vmatpush1.bf16.msra.mxu0 %v7145_v10  ;;  %5573 = vmatpush1.bf16.msra.mxu1 %v7152_v12 }
 0x66b   :  { %5543 = vmatprep.subr.bf16.mxu0 %v7154_v13  ;;  %5575 = vmatprep.subr.bf16.mxu1 %v7166_v17 }
 0x66e   :  { %5545 = vmatpush1.bf16.msra.mxu0 %v7185_v23  ;;  %5577 = vmatpush1.bf16.msra.mxu1 %v7190_v24 }
 0x66f   :  { %5547 = vmatprep.subr.bf16.mxu0 %v7192_v25  ;;  %5579 = vmatprep.subr.bf16.mxu1 %v7204_v29 }
 0x672   :  { %5549 = vmatpush1.bf16.msra.mxu0 %v7222_v35  ;;  %5581 = vmatpush1.bf16.msra.mxu1 %v7226_v36 }
 0x673   :  { %5551 = vmatprep.subr.bf16.mxu0 %v7228_v37  ;;  %5583 = vmatprep.subr.bf16.mxu1 %v7240_v43 }
 0x676   :  { %5553 = vmatpush1.bf16.msra.mxu0 %v7258_v52  ;;  %5585 = vmatpush1.bf16.msra.mxu1 %v7262_v53 }
 0x677   :  { %5555 = vmatprep.subr.bf16.mxu0 %v7264_v54  ;;  %5587 = vmatprep.subr.bf16.mxu1 %v7276_v59 }
 0x67a   :  { %5557 = vmatpush1.bf16.msra.mxu0 %v7294_v6  ;;  %5589 = vmatpush1.bf16.msra.mxu1 %v7298_v7  ;;  %v1789_v7 = vrot.slane %v7627_v58, 6  ;;  %v2174_v58 = vld [vmem:[%s9246_s8 + $0x60] sm:$0xff] }
 0x67b   :  { %5559 = vmatprep.subr.bf16.mxu0 %v7300_v8  ;;  %5591 = vmatprep.subr.bf16.mxu1 %v7309_v14  ;;  %v5632_v5 = vpack.c.bf16 %v2174_v58, %v2170_v47  ;;  %v2050_v47 = vld [vmem:[%s9247_s5 + $0x38] sm:$0xff] }
 0x67e   :  { %5561 = vmatpush1.bf16.msra.mxu0 %v7318_v18  ;;  %5593 = vmatpush1.bf16.msra.mxu1 %v7322_v19 }
 0x67f   :  { %5627 = vmatprep.subr.bf16.mxu1 %v5626_v51  ;;  %v2186_v51 = vld [vmem:[%s9246_s8 + $0xc0] sm:$0xff] }
 0x734   :  { %v1677_v55 = vpop.f32.mrb[16].mxu0  ;;  %v1748_v61 = vpop.f32.mrb[16].mxu1 }
 0x735   :  { %v1757_v62 = vrot.slane %v1677_v55, 4  ;;  %v1679_v63 = vpop.f32.mrb[17].mxu0  ;;  %v1750_v4 = vpop.f32.mrb[17].mxu1  ;;  %v1759_v29 = vrot.slane %v1748_v61, 4  ;;  %v2190_v55 = vld [vmem:[%s9246_s8 + $0xe0] sm:$0xff] }
 0x736   :  { %v1758_v10 = vrot.slane %v1679_v63, 4  ;;  %v1760_v24 = vrot.slane %v1750_v4, 4  ;;  %v5640_v61 = vpack.c.bf16 %v2190_v55, %v2186_v51  ;;  %v2199_v63 = vld [vmem:[%s9246_s8 + $0x128] sm:$0xff] }
 0x737   :  { %v1765_v12 = vadd.f32 %v1757_v62, %v7385_v46  ;;  %v1767_v36 = vadd.f32 %v1759_v29, %v7389_v57  ;;  %v2195_v62 = vld [vmem:[%s9246_s8 + $0x108] sm:$0xff]  ;;  %v2206_v29 = vld [vmem:[%s9246_s8 + $0x160] sm:$0xff] }
 0x738   :  { %v1766_v13 = vadd.f32 %v1758_v10, %v7387_v56  ;;  %v1768_v25 = vadd.f32 %v1760_v24, %v7391_v60  ;;  %v5642_v4 = vpack.c.bf16 %v2199_v63, %v2195_v62  ;;  %v2194_v10 = vld [vmem:[%s9246_s8 + $0x100] sm:$0xff]  ;;  %v2064_v51 = vld [vmem:[%s9247_s5 + $0xa8] sm:$0xff]  ;;  %v2065_v63 = vld [vmem:[%s9247_s5 + $0xb0] sm:$0xff] }
 0x739   :  { %v4626_v17 = vmul.f32 -1.442695, %v1765_v12  ;;  %v2198_v12 = vld [vmem:[%s9246_s8 + $0x120] sm:$0xff] }
 0x73a   :  { %v4627_v23 = vmul.f32 -1.442695, %v1766_v13  ;;  %v4628_v35 = vmul.f32 -1.442695, %v1768_v25  ;;  %v5644_v13 = vpack.c.bf16 %v2198_v12, %v2194_v10  ;;  %v2202_v25 = vld [vmem:[%s9246_s8 + $0x140] sm:$0xff]  ;;  %v2066_v10 = vld [vmem:[%s9247_s5 + $0xb8] sm:$0xff] }
 0x73b   :  { %6593 = vpow2.f32 %v4626_v17  ;;  %v2203_v17 = vld [vmem:[%s9246_s8 + $0x148] sm:$0xff]  ;;  %v2055_v62 = vld [vmem:[%s9247_s5 + $0x60] sm:$0xff] }
 0x73c   :  { %6595 = vpow2.f32 %v4627_v23  ;;  %v2207_v23 = vld [vmem:[%s9246_s8 + $0x168] sm:$0xff] }
 0x73d   :  { %6597 = vpow2.f32 %v4628_v35  ;;  %v5646_v24 = vpack.c.bf16 %v2207_v23, %v2203_v17  ;;  %v5648_v35 = vpack.c.bf16 %v2206_v29, %v2202_v25  ;;  %v7870_v12 = vld [vmem:[%s9248_s1 + $0x8] sm:$0x3]  ;;  %v2067_v23 = vld [vmem:[%s9247_s5 + $0xc0] sm:$0xff]  ;;  %v2057_v25 = vld [vmem:[%s9247_s5 + $0x70] sm:$0xff] }
 0x73e   :  { %6599 = vtanh.f32 %v1767_v36  ;;  %v2211_v36 = vld [vmem:[%s9246_s8 + $0x188] sm:$0xff]  ;;  %v2058_v29 = vld [vmem:[%s9247_s5 + $0x78] sm:$0xff] }
 0x745   :  { %v6594_v37 = vpop.eup %6593 }
 0x746   :  { %v6596_v43 = vpop.eup %6595  ;;  %v1772_v52 = vadd.f32 1.0, %v6594_v37  ;;  %v2215_v37 = vld [vmem:[%s9246_s8 + $0x1a8] sm:$0xff] }
 0x747   :  { %v1778_v53 = vadd.f32 1.0, %v6596_v43  ;;  %v6598_v54 = vpop.eup %6597  ;;  %v5650_v43 = vpack.c.bf16 %v2215_v37, %v2211_v36  ;;  %v7892_v36 = vpack.c.bf16 %v2058_v29, %v2057_v25  ;;  %v2069_v37 = vld [vmem:[%s9247_s5 + $0xd0] sm:$0xff] }
 0x748   :  { %6601 = vrcp.f32 %v1772_v52  ;;  %v6600_v59 = vpop.eup %6599  ;;  %v1785_v18 = vadd.f32 1.0, %v6598_v54  ;;  %v2210_v52 = vld [vmem:[%s9246_s8 + $0x180] sm:$0xff] }
 0x749   :  { %6603 = vrcp.f32 %v1778_v53  ;;  %v2214_v53 = vld [vmem:[%s9246_s8 + $0x1a0] sm:$0xff] }
 0x74a   :  { %6605 = vrcp.f32 %v1785_v18  ;;  %v5652_v54 = vpack.c.bf16 %v2214_v53, %v2210_v52  ;;  %v2071_v53 = vld [vmem:[%s9247_s5 + $0xe0] sm:$0xff] }
 0x752   :  { %v6602_v6 = vpop.eup %6601 }
 0x753   :  { %v6604_v8 = vpop.eup %6603  ;;  %v1792_v14 = vmul.f32 %v6602_v6, %v6600_v59  ;;  %v2219_v59 = vld [vmem:[%s9246_s8 + $0x1c8] sm:$0xff] }
 0x754   :  { %v1791_v19 = vmul.f32 %v6604_v8, %v1789_v7  ;;  %v6606_v26 = vpop.eup %6605  ;;  %v2223_v6 = vld [vmem:[%s9246_s8 + $0x1e8] sm:$0xff]  ;;  %v2218_v8 = vld [vmem:[%s9246_s8 + $0x1c0] sm:$0xff] }
 0x755   :  { %v5654_v7 = vpack.c.bf16 %v2223_v6, %v2219_v59  ;;  %v2073_v6 = vld [vmem:[%s9247_s5 + $0xf0] sm:$0xff] }
 0x756   :  { %v7676_v42 = vadd.f32 %v1792_v14, %v1791_v19  ;;  %v2222_v14 = vld [vmem:[%s9246_s8 + $0x1e0] sm:$0xff] }
 0x757   :  { %v5656_v18 = vpack.c.bf16 %v2222_v14, %v2218_v8  ;;  %v2043_v19 = vld [vmem:[%s9247_s5] sm:$0xff]  ;;  %v2165_v14 = vld [vmem:[%s9246_s8 + $0x18] sm:$0xff] }
 0x758   :  { %6607 = vtanh.f32 %v7676_v42 }
 0x762   :  { %v6608_v48 = vpop.eup %6607 }
 0x763   :  { %v1795_v9 = vmul.f32 %v6608_v48, %v6606_v26  ;;  %v2044_v26 = vld [vmem:[%s9247_s5 + $0x8] sm:$0xff]  ;;  %v7783_v48 = vld [vmem:[%s9248_s1] sm:$0xff] }
 0x764   :  { %v7777_v44 = vpack.c.bf16 %v2044_v26, %v2043_v19 }
 0x765   :  { %v1797_v33 = vcombine.high %v1795_v9, %v1795_v9  ;;  %v1824_v41 = vrot.slane %v1795_v9, 4  ;;  %v7795_v9 = vpack.c.bf16 %v2046_v15, %v2045_v31 }
 0x767   :  { %v1804_v11 = vrot.slane %v1797_v33, %v7409_v39  ;;  %1891 = vmatmul.mubr.f32.vlgmr.msra.gmra.mrb[18].mxu0 %v1824_v41  ;;  %1962 = vmatmul.mubr.f32.vlgmr.msra.gmra.mrb[18].mxu1 %v1824_v41  ;;  %v2048_v33 = vld [vmem:[%s9247_s5 + $0x28] sm:$0xff] }
 0x768   :  { %5629 = vmatpush1.bf16.msra.mxu1 %v5628_v40  ;;  %2312 = vmatprep.mubr.f32.mxu1 %v9258_v3  ;;  %v2047_v40 = vld [vmem:[%s9247_s5 + $0x20] sm:$0xff] }
 0x769   :  { %v1805_v34 = vcombine.high %v1804_v11, %v1804_v11  ;;  %4629 = vst.sshfl [vmem:[#allocation2 + $0x6] sm:$0x1 pattern:$0x73625140] %v1804_v11  ;;  %5631 = vmatprep.subr.bf16.mxu1 %v5630_v22  ;;  %v7805_v41 = vpack.c.bf16 %v2048_v33, %v2047_v40  ;;  %v2049_v22 = vld [vmem:[%s9247_s5 + $0x30] sm:$0xff]  ;;  %v5594_v11 = vpack.c.bf16 %v2060_v2, %v2059_v16 }
 0x76a   :  { %v7815_v58 = vpack.c.bf16 %v2050_v47, %v2049_v22 }
 0x76b   :  { %4630 = vst.sshfl [vmem:[#allocation2 + $0xe] sm:$0x1 pattern:$0x73625140] %v1805_v34  ;;  %v2052_v34 = vld [vmem:[%s9247_s5 + $0x48] sm:$0xff]  ;;  %5595 = vmatprep.subr.bf16.mxu0 %v5594_v11 }
 0x76c   :  { %5633 = vmatpush1.bf16.msra.mxu1 %v5632_v5  ;;  %v2051_v5 = vld [vmem:[%s9247_s5 + $0x40] sm:$0xff]  ;;  %5597 = vmatpush3.bf16.msra.mxu0 %v5594_v11 }
 0x76d   :  { %5635 = vmatprep.subr.bf16.mxu1 %v5634_v27  ;;  %v7831_v27 = vpack.c.bf16 %v2052_v34, %v2051_v5  ;;  %5599 = vmatprep.subr.bf16.mxu0 %v5598_v30 }
 0x770   :  { %5637 = vmatpush1.bf16.msra.mxu1 %v5636_v49  ;;  %v2054_v49 = vld [vmem:[%s9247_s5 + $0x58] sm:$0xff]  ;;  %5601 = vmatpush3.bf16.msra.mxu0 %v5598_v30 }
 0x771   :  { %5639 = vmatprep.subr.bf16.mxu1 %v5638_v50  ;;  %v2063_v50 = vld [vmem:[%s9247_s5 + $0xa0] sm:$0xff]  ;;  %v7852_v55 = vpack.c.bf16 %v2054_v49, %v2053_v38 }
 0x774   :  { %5641 = vmatpush1.bf16.msra.mxu1 %v5640_v61  ;;  %v5602_v61 = vpack.c.bf16 %v2064_v51, %v2063_v50 }
 0x775   :  { %5643 = vmatprep.subr.bf16.mxu1 %v5642_v4  ;;  %v2056_v4 = vld [vmem:[%s9247_s5 + $0x68] sm:$0xff] }
 0x776   :  { %5603 = vmatprep.subr.bf16.mxu0 %v5602_v61  ;;  %v7876_v17 = vpack.c.bf16 %v2056_v4, %v2055_v62  ;;  %v2004_v62 = vrot.slane %v7676_v42, 6 }
 0x777   :  { %5605 = vmatpush3.bf16.msra.mxu0 %v5602_v61 }
 0x778   :  { %5645 = vmatpush1.bf16.msra.mxu1 %v5644_v13  ;;  %v5606_v13 = vpack.c.bf16 %v2066_v10, %v2065_v63 }
 0x779   :  { %5647 = vmatprep.subr.bf16.mxu1 %v5646_v24  ;;  %v2068_v24 = vld [vmem:[%s9247_s5 + $0xc8] sm:$0xff] }
 0x77a   :  { %5607 = vmatprep.subr.bf16.mxu0 %v5606_v13 }
 0x77b   :  { %5609 = vmatpush3.bf16.msra.mxu0 %v5606_v13 }
 0x77c   :  { %5649 = vmatpush1.bf16.msra.mxu1 %v5648_v35  ;;  %v5610_v35 = vpack.c.bf16 %v2068_v24, %v2067_v23 }
 0x77d   :  { %5651 = vmatprep.subr.bf16.mxu1 %v5650_v43  ;;  %v2070_v43 = vld [vmem:[%s9247_s5 + $0xd8] sm:$0xff] }
 0x77e   :  { %5611 = vmatprep.subr.bf16.mxu0 %v5610_v35  ;;  %v5614_v52 = vpack.c.bf16 %v2070_v43, %v2069_v37 }
 0x77f   :  { %5613 = vmatpush3.bf16.msra.mxu0 %v5610_v35 }
 0x780   :  { %5653 = vmatpush1.bf16.msra.mxu1 %v5652_v54  ;;  %5615 = vmatprep.subr.bf16.mxu0 %v5614_v52  ;;  %v2072_v54 = vld [vmem:[%s9247_s5 + $0xe8] sm:$0xff] }
 0x781   :  { %5655 = vmatprep.subr.bf16.mxu1 %v5654_v7  ;;  %v5618_v59 = vpack.c.bf16 %v2072_v54, %v2071_v53  ;;  %v2074_v7 = vld [vmem:[%s9247_s5 + $0xf8] sm:$0xff]  ;;  %v2164_v54 = vld [vmem:[%s9246_s8 + $0x10] sm:$0xff] }
 0x782   :  { %v5622_v8 = vpack.c.bf16 %v2074_v7, %v2073_v6  ;;  %v2173_v6 = vld [vmem:[%s9246_s8 + $0x58] sm:$0xff] }
 0x783   :  { %5617 = vmatpush3.bf16.msra.mxu0 %v5614_v52  ;;  %v2177_v7 = vld [vmem:[%s9246_s8 + $0x78] sm:$0xff] }
 0x784   :  { %5657 = vmatpush1.bf16.msra.mxu1 %v5656_v18  ;;  %5619 = vmatprep.subr.bf16.mxu0 %v5618_v59  ;;  %v2169_v18 = vld [vmem:[%s9246_s8 + $0x38] sm:$0xff] }
 0x785   :  { %5690 = vmatprep.subr.bf16.mxu1 %v9260_v0  ;;  %v5658_v19 = vpack.c.bf16 %v2169_v18, %v2165_v14  ;;  %v5662_v18 = vpack.c.bf16 %v2177_v7, %v2173_v6 }
 0x787   :  { %2313 = vmatmul.mubr.f32.vlgmr.msra.gmra.mrb[20].mxu1 %v7783_v48  ;;  %5621 = vmatpush3.bf16.msra.mxu0 %v5618_v59  ;;  %v2168_v59 = vld [vmem:[%s9246_s8 + $0x30] sm:$0xff] }
 0x788   :  { %5692 = vmatpush3.bf16.msra.mxu1 %v7777_v44  ;;  %2318 = vmatprep.mubr.f32.mxu1 %v9258_v3  ;;  %v5660_v14 = vpack.c.bf16 %v2168_v59, %v2164_v54  ;;  %v2224_v54 = vld [vmem:[%s9246_s8 + $0x1f0] sm:$0xff] }
 0x789   :  { %5693 = vmatprep.subr.bf16.mxu1 %v9260_v0  ;;  %5623 = vmatprep.subr.bf16.mxu0 %v5622_v8 }
 0x78b   :  { %2319 = vmatmul.mubr.f32.gmra.mrb[22].mxu1 %v7870_v12  ;;  %5625 = vmatpush3.bf16.msra.mxu0 %v5622_v8 }
 0x78c   :  { %5695 = vmatpush3.bf16.msra.mxu1 %v7795_v9  ;;  %4840 = vmatprep.mubr.msk.f32.mxu1 %vm6763_vm0, %v9258_v3 }
 0x78d   :  { %5696 = vmatprep.subr.bf16.mxu1 %v9260_v0  ;;  %5659 = vmatprep.subr.bf16.mxu0 %v5658_v19  ;;  %v2172_v19 = vld [vmem:[%s9246_s8 + $0x50] sm:$0xff] }
 0x790   :  { %5698 = vmatpush3.bf16.msra.mxu1 %v7805_v41 }
 0x791   :  { %5699 = vmatprep.subr.bf16.mxu1 %v9260_v0 }
 0x794   :  { %5701 = vmatpush3.bf16.msra.mxu1 %v7815_v58 }
 0x795   :  { %5702 = vmatprep.subr.bf16.mxu1 %v9260_v0 }
 0x798   :  { %5704 = vmatpush3.bf16.msra.mxu1 %v7831_v27 }
 0x799   :  { %5705 = vmatprep.subr.bf16.mxu1 %v9260_v0 }
 0x79c   :  { %5707 = vmatpush3.bf16.msra.mxu1 %v7852_v55 }
 0x79d   :  { %5708 = vmatprep.subr.bf16.mxu1 %v9260_v0 }
 0x7a0   :  { %5710 = vmatpush3.bf16.msra.mxu1 %v7876_v17 }
 0x7a1   :  { %5711 = vmatprep.subr.bf16.mxu1 %v9260_v0 }
 0x7a4   :  { %5713 = vmatpush3.bf16.msra.mxu1 %v7892_v36 }
 0x83a   :  { %v1892_v26 = vpop.f32.mrb[18].mxu0  ;;  %v1963_v31 = vpop.f32.mrb[18].mxu1 }
 0x83b   :  { %v1972_v15 = vrot.slane %v1892_v26, 2  ;;  %v1894_v40 = vpop.f32.mrb[19].mxu0  ;;  %v1965_v33 = vpop.f32.mrb[19].mxu1  ;;  %v1974_v45 = vrot.slane %v1963_v31, 2  ;;  %v2176_v26 = vld [vmem:[%s9246_s8 + $0x70] sm:$0xff] }
 0x83c   :  { %v1973_v22 = vrot.slane %v1894_v40, 2  ;;  %v1975_v5 = vrot.slane %v1965_v33, 2  ;;  %v2185_v40 = vld [vmem:[%s9246_s8 + $0xb8] sm:$0xff]  ;;  %v5664_v33 = vpack.c.bf16 %v2176_v26, %v2172_v19 }
 0x83d   :  { %v1980_v47 = vadd.f32 %v1972_v15, %v7385_v46  ;;  %v1982_v38 = vadd.f32 %v1974_v45, %v7389_v57  ;;  %v2181_v15 = vld [vmem:[%s9246_s8 + $0x98] sm:$0xff]  ;;  %v2188_v45 = vld [vmem:[%s9246_s8 + $0xd0] sm:$0xff] }
 0x83e   :  { %v1981_v16 = vadd.f32 %v1973_v22, %v7387_v56  ;;  %v1983_v34 = vadd.f32 %v1975_v5, %v7391_v60  ;;  %v5666_v22 = vpack.c.bf16 %v2185_v40, %v2181_v15 }
 0x83f   :  { %v4631_v2 = vmul.f32 -1.442695, %v1980_v47  ;;  %v2180_v47 = vld [vmem:[%s9246_s8 + $0x90] sm:$0xff] }
 0x840   :  { %v4632_v11 = vmul.f32 -1.442695, %v1981_v16  ;;  %v4633_v1 = vmul.f32 -1.442695, %v1983_v34  ;;  %v2184_v16 = vld [vmem:[%s9246_s8 + $0xb0] sm:$0xff] }
 0x841   :  { %6609 = vpow2.f32 %v4631_v2  ;;  %v2189_v2 = vld [vmem:[%s9246_s8 + $0xd8] sm:$0xff]  ;;  %v5668_v5 = vpack.c.bf16 %v2184_v16, %v2180_v47 }
 0x842   :  { %6611 = vpow2.f32 %v4632_v11  ;;  %v2193_v11 = vld [vmem:[%s9246_s8 + $0xf8] sm:$0xff] }
 0x843   :  { %6613 = vpow2.f32 %v4633_v1  ;;  %v5670_v34 = vpack.c.bf16 %v2193_v11, %v2189_v2  ;;  %v2192_v1 = vld [vmem:[%s9246_s8 + $0xf0] sm:$0xff] }
 0x844   :  { %6615 = vtanh.f32 %v1982_v38  ;;  %v2197_v38 = vld [vmem:[%s9246_s8 + $0x118] sm:$0xff] }
 0x84b   :  { %v6610_v30 = vpop.eup %6609 }
 0x84c   :  { %v6612_v49 = vpop.eup %6611  ;;  %v1987_v50 = vadd.f32 1.0, %v6610_v30  ;;  %v2201_v30 = vld [vmem:[%s9246_s8 + $0x138] sm:$0xff] }
 0x84d   :  { %v1993_v51 = vadd.f32 1.0, %v6612_v49  ;;  %v6614_v46 = vpop.eup %6613  ;;  %v5672_v49 = vpack.c.bf16 %v2192_v1, %v2188_v45 }
 0x84e   :  { %6617 = vrcp.f32 %v1987_v50  ;;  %v6616_v56 = vpop.eup %6615  ;;  %v2000_v60 = vadd.f32 1.0, %v6614_v46  ;;  %v5674_v50 = vpack.c.bf16 %v2201_v30, %v2197_v38  ;;  %v2200_v46 = vld [vmem:[%s9246_s8 + $0x130] sm:$0xff]  ;;  %v2654_v30 = vand.u32 127, %v112_v20 }
 0x84f   :  { %6619 = vrcp.f32 %v1993_v51  ;;  %v2196_v51 = vld [vmem:[%s9246_s8 + $0x110] sm:$0xff] }
 0x850   :  { %6621 = vrcp.f32 %v2000_v60  ;;  %v2208_v60 = vld [vmem:[%s9246_s8 + $0x170] sm:$0xff] }
 0x858   :  { %v6618_v61 = vpop.eup %6617 }
 0x859   :  { %v6620_v63 = vpop.eup %6619  ;;  %v2007_v4 = vmul.f32 %v6618_v61, %v6616_v56  ;;  %v2205_v56 = vld [vmem:[%s9246_s8 + $0x158] sm:$0xff] }
 0x85a   :  { %v2006_v10 = vmul.f32 %v6620_v63, %v2004_v62  ;;  %v6622_v57 = vpop.eup %6621  ;;  %v2209_v61 = vld [vmem:[%s9246_s8 + $0x178] sm:$0xff]  ;;  %v5676_v62 = vpack.c.bf16 %v2200_v46, %v2196_v51  ;;  %v8036_v6 = vpop.f32.mrb[20].mxu1 }
 0x85b   :  { %v5678_v63 = vpack.c.bf16 %v2209_v61, %v2205_v56  ;;  %v8038_v7 = vpop.f32.mrb[21].mxu1 }
 0x85c   :  { %v7925_v13 = vadd.f32 %v2007_v4, %v2006_v10  ;;  %v2204_v4 = vld [vmem:[%s9246_s8 + $0x150] sm:$0xff]  ;;  %v2213_v10 = vld [vmem:[%s9246_s8 + $0x198] sm:$0xff] }
 0x85e   :  { %9407 = vst [vmem:[#allocation7_spill] sm:$0xff] %v7925_v13  ;;  %6623 = vtanh.f32 %v7925_v13 }
 0x868   :  { %v6624_v23 = vpop.eup %6623 }
 0x869   :  { %v2010_v24 = vmul.f32 %v6624_v23, %v6622_v57  ;;  %v2217_v57 = vld [vmem:[%s9246_s8 + $0x1b8] sm:$0xff]  ;;  %v5680_v23 = vpack.c.bf16 %v2208_v60, %v2204_v4 }
 0x86b   :  { %v2012_v25 = vcombine.high %v2010_v24, %v2010_v24  ;;  %v7928_v29 = vrot.slane %v2010_v24, 6  ;;  %v5682_v24 = vpack.c.bf16 %v2217_v57, %v2213_v10 }
 0x86d   :  { %v2019_v35 = vrot.slane %v2012_v25, %v7409_v39  ;;  %4841 = vmatmul.mubr.f32.vlgmr.msra.gmra.mrb[24].mxu1 %v7928_v29  ;;  %v2212_v25 = vld [vmem:[%s9246_s8 + $0x190] sm:$0xff] }
 0x86e   :  { %2885 = vmatprep.mubr.f32.mxu1 %v7928_v29 }
 0x86f   :  { %v2020_v42 = vcombine.high %v2019_v35, %v2019_v35  ;;  %v2027_v37 = vrot.slane %v2019_v35, %v7409_v39  ;;  %v2216_v35 = vld [vmem:[%s9246_s8 + $0x1b0] sm:$0xff] }
 0x871   :  { %v2034_v43 = vrot.slane %v2020_v42, %v7409_v39  ;;  %v2035_v52 = vcombine.high %v2027_v37, %v2027_v37  ;;  %v2221_v42 = vld [vmem:[%s9246_s8 + $0x1d8] sm:$0xff] }
 0x872   :  { %v2225_v37 = vld [vmem:[%s9246_s8 + $0x1f8] sm:$0xff] }
 0x873   :  { %v2036_v53 = vcombine.high %v2034_v43, %v2034_v43  ;;  %2039 = vst [vmem:[#allocation2 + $0x7] sm:$0x1] %v2035_v52  ;;  %v5684_v43 = vpack.c.bf16 %v2216_v35, %v2212_v25  ;;  %v5686_v52 = vpack.c.bf16 %v2225_v37, %v2221_v42 }
 0x875   :  { %2040 = vst [vmem:[#allocation2 + $0xf] sm:$0x1] %v2036_v53  ;;  %v2220_v53 = vld [vmem:[%s9246_s8 + $0x1d0] sm:$0xff] }
 0x876   :  { %v5688_v59 = vpack.c.bf16 %v2224_v54, %v2220_v53 }
 0x87a   :  { %v7947_v8 = vld [vmem:[#allocation2] sm:$0xff] }
 0x87b   :  { %4805 = vmatprep.mubr.f32.mxu0 %v7947_v8 }
 0x87c   :  { %v7956_v31 = vld [vmem:[#allocation2 + $0x8] sm:$0xff] }
 0x87d   :  { %4806 = vmatmul.mubr.f32.vlgmr.msra.gmra.mrb[20].mxu0 %v7956_v31 }
 0x87e   :  { %5661 = vmatpush1.bf16.msra.mxu0 %v5660_v14  ;;  %2389 = vmatprep.mubr.f32.mxu0 %v9258_v3 }
 0x87f   :  { %5663 = vmatprep.subr.bf16.mxu0 %v5662_v18 }
 0x882   :  { %5665 = vmatpush1.bf16.msra.mxu0 %v5664_v33 }
 0x883   :  { %5667 = vmatprep.subr.bf16.mxu0 %v5666_v22 }
 0x886   :  { %5669 = vmatpush1.bf16.msra.mxu0 %v5668_v5  ;;  %v8057_v5 = vld [vmem:[%s9250_s7] ss:$0 sm:$0xff] }
 0x887   :  { %5671 = vmatprep.subr.bf16.mxu0 %v5670_v34  ;;  %9410 = vst [vmem:[#allocation10_spill] sm:$0xff] %v8057_v5 }
 0x88a   :  { %5673 = vmatpush1.bf16.msra.mxu0 %v5672_v49 }
 0x88b   :  { %5675 = vmatprep.subr.bf16.mxu0 %v5674_v50  ;;  %v8063_v50 = vsub.s32 %v2654_v30, %v7366_v21  ;;  %v2410_v30 = vld [vmem:[%s9251_s9 + $0x40] sm:$0xff] }
 0x88d   :  { %9411 = vst [vmem:[#allocation11_spill] sm:$0xff] %v8063_v50 }
 0x88e   :  { %5677 = vmatpush1.bf16.msra.mxu0 %v5676_v62 }
 0x88f   :  { %5679 = vmatprep.subr.bf16.mxu0 %v5678_v63  ;;  %v6764_v63 = vmov 0  }
 0x890   :  { %6496 = vset.pattern.permute.xlu0 %v6764_v63  ;;  %6495 = vset.pattern.permute.xlu1 %v6764_v63 }
 0x892   :  { %5681 = vmatpush1.bf16.msra.mxu0 %v5680_v23 }
 0x893   :  { %5683 = vmatprep.subr.bf16.mxu0 %v5682_v24 }
 0x896   :  { %5685 = vmatpush1.bf16.msra.mxu0 %v5684_v43 }
 0x897   :  { %5687 = vmatprep.subr.bf16.mxu0 %v5686_v52 }
 0x89a   :  { %5689 = vmatpush1.bf16.msra.mxu0 %v5688_v59  ;;  %v2403_v59 = vld [vmem:[%s9251_s9 + $0x8] sm:$0xff] }
 0x89d   :  { %2390 = vmatmul.mubr.f32.vlgmr.msra.gmra.mrb[22].mxu0 %v7783_v48  ;;  %v4634_v48 = vld [vmem:[%s9249_s6] ss:$0 sm:$0xff] }
 0x89e   :  { %2395 = vmatprep.mubr.f32.mxu0 %v9258_v3 }
 0x8a1   :  { %2396 = vmatmul.mubr.f32.gmra.mrb[24].mxu0 %v7870_v12 }
 0x8a2   :  { %2814 = vmatprep.mubr.f32.mxu0 %v7928_v29 }
 0x940   :  { %v2598_v14 = vpop.f32.mrb[24].mxu1 }
 0x941   :  { %v4842_v18 = vpop.f32.mrb[25].mxu1  ;;  %v2609_v19 = vrot.slane %v2598_v14, %v7409_v39  ;;  %v2407_v14 = vld [vmem:[%s9251_s9 + $0x28] sm:$0xff] }
 0x942   :  { %v2405_v18 = vld [vmem:[%s9251_s9 + $0x18] sm:$0xff] }
 0x943   :  { %v2610_v26 = vcombine.high %v2609_v19, %v2609_v19  ;;  %v2617_v15 = vrot.slane %v2609_v19, %v7409_v39  ;;  %v8090_v19 = vpack.c.bf16 %v2407_v14, %v2403_v59  ;;  %v2433_v14 = vld [vmem:[%s9251_s9 + $0xf8] sm:$0xff] }
 0x945   :  { %v2624_v40 = vrot.slane %v2610_v26, %v7409_v39  ;;  %v2628_v22 = vrot.slane %v2617_v15, %v7369_v28  ;;  %9412 = vst [vmem:[#allocation12_spill] sm:$0xff] %v8090_v19  ;;  %v2409_v26 = vld [vmem:[%s9251_s9 + $0x38] sm:$0xff]  ;;  %v2402_v15 = vld [vmem:[%s9251_s9] sm:$0xff]  ;;  %5715 = vmatprep.subr.bf16.mxu0 %v8090_v19 }
 0x946   :  { %v2474_v39 = vld [vmem:[%s9251_s9 + $0x240] sm:$0xff] }
 0x947   :  { %v2632_v47 = vrot.slane %v2624_v40, %v7369_v28  ;;  %v2406_v40 = vld [vmem:[%s9251_s9 + $0x20] sm:$0xff] }
 0x950   :  { %v4807_v12 = vpop.f32.mrb[20].mxu0 }
 0x951   :  { %v8046_v33 = vadd.f32 %v4807_v12, %v4634_v48  ;;  %v2141_v29 = vpop.f32.mrb[21].mxu0  ;;  %v8103_v12 = vpack.c.bf16 %v2406_v40, %v2402_v15  ;;  %v2428_v40 = vld [vmem:[%s9251_s9 + $0xd0] sm:$0xff] }
 0x952   :  { %v8050_v16 = vadd.f32 %v4634_v48, %v2141_v29  ;;  %v8101_v48 = vpack.c.bf16 %v2409_v26, %v2405_v18  ;;  %v2404_v29 = vld [vmem:[%s9251_s9 + $0x10] sm:$0xff]  ;;  %v2426_v18 = vld [vmem:[%s9251_s9 + $0xc0] sm:$0xff] }
 0x953   :  { %9408 = vst [vmem:[#allocation8_spill] sm:$0xff] %v8046_v33  ;;  %v2636_v11 = vadd.f32 %v2632_v47, %v8046_v33  ;;  %9413 = vst [vmem:[#allocation13_spill] sm:$0xff] %v8103_v12  ;;  %v2411_v47 = vld [vmem:[%s9251_s9 + $0x48] sm:$0xff]  ;;  %5717 = vmatpush1.bf16.msra.mxu0 %v8103_v12  ;;  %v2430_v26 = vld [vmem:[%s9251_s9 + $0xe0] sm:$0xff] }
 0x954   :  { %9409 = vst [vmem:[#allocation9_spill] sm:$0xff] %v8050_v16  ;;  %v2635_v2 = vadd.f32 %v2628_v22, %v8050_v16  ;;  %v2408_v22 = vld [vmem:[%s9251_s9 + $0x30] sm:$0xff]  ;;  %5779 = vmatprep.subr.bf16.mxu1 %v8101_v48 }
 0x956   :  { %6625 = vtanh.f32 %v2635_v2  ;;  %v8115_v2 = vpack.c.bf16 %v2408_v22, %v2404_v29  ;;  %v2432_v29 = vld [vmem:[%s9251_s9 + $0xf0] sm:$0xff]  ;;  %v2435_v22 = vld [vmem:[%s9251_s9 + $0x108] sm:$0xff] }
 0x957   :  { %6627 = vtanh.f32 %v2636_v11  ;;  %v2415_v11 = vld [vmem:[%s9251_s9 + $0x68] sm:$0xff] }
 0x958   :  { %9414 = vst [vmem:[#allocation14_spill] sm:$0xff] %v8115_v2  ;;  %5781 = vmatpush1.bf16.msra.mxu1 %v8115_v2 }
 0x960   :  { %v6626_v34 = vpop.eup %6625 }
 0x961   :  { %v2645_v45 = vmul.f32 %v6626_v34, %v8057_v5  ;;  %v6628_v1 = vpop.eup %6627  ;;  %v2413_v34 = vld [vmem:[%s9251_s9 + $0x58] sm:$0xff] }
 0x962   :  { %v2646_v38 = vmul.f32 %v6628_v1, %v8057_v5  ;;  %v8128_v1 = vpack.c.bf16 %v2415_v11, %v2411_v47  ;;  %v2439_v47 = vld [vmem:[%s9251_s9 + $0x128] sm:$0xff]  ;;  %v2437_v11 = vld [vmem:[%s9251_s9 + $0x118] sm:$0xff]  ;;  %v2470_v5 = vld [vmem:[%s9251_s9 + $0x220] sm:$0xff] }
 0x963   :  { %2647 = vadd.xlane.f32.xlu0 %v2645_v45  ;;  %v2417_v45 = vld [vmem:[%s9251_s9 + $0x78] sm:$0xff] }
 0x964   :  { %9415 = vst [vmem:[#allocation15_spill] sm:$0xff] %v8128_v1  ;;  %5719 = vmatprep.subr.bf16.mxu0 %v8128_v1 }
 0x967   :  { %2649 = vadd.xlane.f32.xlu0 %v2646_v38  ;;  %v8130_v38 = vpack.c.bf16 %v2417_v45, %v2413_v34  ;;  %v2441_v34 = vld [vmem:[%s9251_s9 + $0x138] sm:$0xff]  ;;  %v8228_v45 = vpack.c.bf16 %v2430_v26, %v2426_v18  ;;  %v2444_v18 = vld [vmem:[%s9251_s9 + $0x150] sm:$0xff] }
 0x969   :  { %9416 = vst [vmem:[#allocation16_spill] sm:$0xff] %v8130_v38  ;;  %5783 = vmatprep.subr.bf16.mxu1 %v8130_v38  ;;  %9425 = vst [vmem:[#allocation25_spill] sm:$0xff] %v8228_v45 }
 0x9f0   :  { %v2648_v49 = vpop.xlane.xlu0 %2647 }
 0x9f1   :  { %v2658_v46 = vrot.slane %v2648_v49, %v8063_v50 }
 0x9f4   :  { %v2650_v51 = vpop.xlane.xlu0 %2649 }
 0x9f5   :  { %v2662_v56 = vrot.slane %v2650_v51, %v8063_v50 }
 0x9f7   :  { %v2664_v61 = vsel %vm2663_vm1, %v2662_v56, %v2658_v46  ;;  %v2416_v56 = vld [vmem:[%s9251_s9 + $0x70] sm:$0xff] }
 0x9f8   :  { %v2667_v62 = vsel %vm2666_vm2, %v2664_v61, -inf  ;;  %v2419_v61 = vld [vmem:[%s9251_s9 + $0x88] sm:$0xff] }
 0x9f9   :  { %2668 = vmax.xlane.f32.xlu1 %v2667_v62  ;;  %v2423_v62 = vld [vmem:[%s9251_s9 + $0xa8] sm:$0xff] }
 0xa86   :  { %v2669_v20 = vpop.xlane.xlu1 %2668 }
 0xa87   :  { %v2674_v4 = vrot.slane %v2669_v20, %v7369_v28  ;;  %v2678_v60 = vrot.slane %v2669_v20, %v7375_v32  ;;  %v8157_v20 = vpack.c.bf16 %v2423_v62, %v2419_v61  ;;  %v2436_v61 = vld [vmem:[%s9251_s9 + $0x110] sm:$0xff]  ;;  %v8246_v62 = vpack.c.bf16 %v2441_v34, %v2437_v11  ;;  %v2457_v11 = vld [vmem:[%s9251_s9 + $0x1b8] sm:$0xff] }
 0xa89   :  { %v2681_v10 = vsub.f32 %v2648_v49, %v2674_v4  ;;  %v2682_v57 = vsub.f32 %v2650_v51, %v2678_v60  ;;  %v2414_v49 = vld [vmem:[%s9251_s9 + $0x60] sm:$0xff]  ;;  %v2412_v51 = vld [vmem:[%s9251_s9 + $0x50] sm:$0xff]  ;;  %9419 = vst [vmem:[#allocation19_spill] sm:$0xff] %v8157_v20  ;;  %v2421_v4 = vld [vmem:[%s9251_s9 + $0x98] sm:$0xff] }
 0xa8a   :  { %v8142_v46 = vpack.c.bf16 %v2414_v49, %v2410_v30  ;;  %v8155_v63 = vpack.c.bf16 %v2416_v56, %v2412_v51  ;;  %v2425_v60 = vld [vmem:[%s9251_s9 + $0xb8] sm:$0xff]  ;;  %v8232_v30 = vpack.c.bf16 %v2432_v29, %v2428_v40  ;;  %v8234_v49 = vpack.c.bf16 %v2439_v47, %v2435_v22  ;;  %v2434_v51 = vld [vmem:[%s9251_s9 + $0x100] sm:$0xff]  ;;  %9428 = vst [vmem:[#allocation28_spill] sm:$0xff] %v8246_v62  ;;  %v2448_v40 = vld [vmem:[%s9251_s9 + $0x170] sm:$0xff] }
 0xa8b   :  { %v2683_v23 = vmul.f32 1.442695, %v2681_v10  ;;  %v2685_v24 = vmul.f32 1.442695, %v2682_v57  ;;  %v2418_v10 = vld [vmem:[%s9251_s9 + $0x80] sm:$0xff]  ;;  %v8168_v57 = vpack.c.bf16 %v2425_v60, %v2421_v4  ;;  %v2440_v4 = vld [vmem:[%s9251_s9 + $0x130] sm:$0xff] }
 0xa8c   :  { %9417 = vst [vmem:[#allocation17_spill] sm:$0xff] %v8142_v46  ;;  %9418 = vst [vmem:[#allocation18_spill] sm:$0xff] %v8155_v63  ;;  %5721 = vmatpush1.bf16.msra.mxu0 %v8142_v46  ;;  %5785 = vmatpush1.bf16.msra.mxu1 %v8155_v63  ;;  %v2438_v56 = vld [vmem:[%s9251_s9 + $0x120] sm:$0xff]  ;;  %v2443_v60 = vld [vmem:[%s9251_s9 + $0x148] sm:$0xff] }
 0xa8d   :  { %6629 = vpow2.f32 %v2683_v23  ;;  %9420 = vst [vmem:[#allocation20_spill] sm:$0xff] %v8168_v57  ;;  %v2422_v23 = vld [vmem:[%s9251_s9 + $0xa0] sm:$0xff]  ;;  %5723 = vmatprep.subr.bf16.mxu0 %v8157_v20  ;;  %5787 = vmatprep.subr.bf16.mxu1 %v8168_v57  ;;  %9426 = vst [vmem:[#allocation26_spill] sm:$0xff] %v8232_v30  ;;  %v2451_v29 = vld [vmem:[%s9251_s9 + $0x188] sm:$0xff] }
 0xa8e   :  { %6631 = vpow2.f32 %v2685_v24  ;;  %v2420_v24 = vld [vmem:[%s9251_s9 + $0x90] sm:$0xff]  ;;  %9427 = vst [vmem:[#allocation27_spill] sm:$0xff] %v8234_v49  ;;  %v2455_v22 = vld [vmem:[%s9251_s9 + $0x1a8] sm:$0xff]  ;;  %v2453_v47 = vld [vmem:[%s9251_s9 + $0x198] sm:$0xff] }
 0xa97   :  { %v8071_v25 = vpop.eup %6629 }
 0xa98   :  { %v8073_v35 = vpop.eup %6631  ;;  %2690 = vperm.xlu1 %6495, %v8071_v25  }
 0xa99   :  { %2693 = vperm.xlu0 %6496, %v8073_v35  }
 0xb17   :  { %v2691_v42 = vpop.permute.xlu1 %2690 }
 0xb18   :  { %v2694_v37 = vpop.permute.xlu0 %2693  ;;  %v2698_v43 = vrot.slane %v2691_v42, %v8063_v50  ;;  %v2424_v42 = vld [vmem:[%s9251_s9 + $0xb0] sm:$0xff] }
 0xb19   :  { %v2702_v52 = vrot.slane %v2694_v37, %v8063_v50  ;;  %v8180_v37 = vpack.c.bf16 %v2422_v23, %v2418_v10  ;;  %v2447_v10 = vld [vmem:[%s9251_s9 + $0x168] sm:$0xff]  ;;  %v2445_v23 = vld [vmem:[%s9251_s9 + $0x158] sm:$0xff]  ;;  %v2466_v50 = vld [vmem:[%s9251_s9 + $0x200] sm:$0xff] }
 0xb1b   :  { %v2703_v53 = vsel %vm2663_vm1, %v2702_v52, %v2698_v43  ;;  %9421 = vst [vmem:[#allocation21_spill] sm:$0xff] %v8180_v37  ;;  %v2427_v43 = vld [vmem:[%s9251_s9 + $0xc8] sm:$0xff]  ;;  %5725 = vmatpush1.bf16.msra.mxu0 %v8180_v37 }
 0xb1c   :  { %v2705_v54 = vsel %vm2666_vm2, %v2703_v53, 0.0  ;;  %v2431_v52 = vld [vmem:[%s9251_s9 + $0xe8] sm:$0xff]  ;;  %v2429_v53 = vld [vmem:[%s9251_s9 + $0xd8] sm:$0xff] }
 0xb1d   :  { %2706 = vadd.xlane.f32.xlu1 %v2705_v54  ;;  %v8193_v54 = vpack.c.bf16 %v2424_v42, %v2420_v24  ;;  %v8195_v59 = vpack.c.bf16 %v2431_v52, %v2427_v43  ;;  %v8207_v15 = vpack.c.bf16 %v2433_v14, %v2429_v53  ;;  %v2449_v24 = vld [vmem:[%s9251_s9 + $0x178] sm:$0xff]  ;;  %v8264_v42 = vpack.c.bf16 %v2438_v56, %v2434_v51  ;;  %v2442_v53 = vld [vmem:[%s9251_s9 + $0x140] sm:$0xff] }
 0xb1e   :  { %v8268_v43 = vpack.c.bf16 %v2440_v4, %v2436_v61  ;;  %v8270_v52 = vpack.c.bf16 %v2447_v10, %v2443_v60  ;;  %v2446_v14 = vld [vmem:[%s9251_s9 + $0x160] sm:$0xff]  ;;  %v8282_v26 = vpack.c.bf16 %v2449_v24, %v2445_v23  ;;  %v8304_v51 = vpack.c.bf16 %v2448_v40, %v2444_v18  ;;  %v2452_v60 = vld [vmem:[%s9251_s9 + $0x190] sm:$0xff]  ;;  %v2459_v24 = vld [vmem:[%s9251_s9 + $0x1c8] sm:$0xff] }
 0xb1f   :  { %9422 = vst [vmem:[#allocation22_spill] sm:$0xff] %v8193_v54  ;;  %9423 = vst [vmem:[#allocation23_spill] sm:$0xff] %v8195_v59  ;;  %5789 = vmatpush1.bf16.msra.mxu1 %v8193_v54  ;;  %5727 = vmatprep.subr.bf16.mxu0 %v8195_v59  ;;  %v8300_v34 = vpack.c.bf16 %v2446_v14, %v2442_v53  ;;  %v8306_v56 = vpack.c.bf16 %v2455_v22, %v2451_v29  ;;  %v2450_v61 = vld [vmem:[%s9251_s9 + $0x180] sm:$0xff]  ;;  %v2456_v23 = vld [vmem:[%s9251_s9 + $0x1b0] sm:$0xff] }
 0xb20   :  { %9424 = vst [vmem:[#allocation24_spill] sm:$0xff] %v8207_v15  ;;  %5791 = vmatprep.subr.bf16.mxu1 %v8207_v15  ;;  %5729 = vmatpush1.bf16.msra.mxu0 %v8228_v45  ;;  %9429 = vst [vmem:[#allocation29_spill] sm:$0xff] %v8264_v42  ;;  %v2454_v4 = vld [vmem:[%s9251_s9 + $0x1a0] sm:$0xff]  ;;  %v8318_v10 = vpack.c.bf16 %v2457_v11, %v2453_v47  ;;  %v2463_v53 = vld [vmem:[%s9251_s9 + $0x1e8] sm:$0xff]  ;;  %v8340_v29 = vpack.c.bf16 %v2456_v23, %v2452_v60 }
 0xb21   :  { %5731 = vmatprep.subr.bf16.mxu0 %v8234_v49  ;;  %9430 = vst [vmem:[#allocation30_spill] sm:$0xff] %v8268_v43  ;;  %9431 = vst [vmem:[#allocation31_spill] sm:$0xff] %v8270_v52  ;;  %v2461_v14 = vld [vmem:[%s9251_s9 + $0x1d8] sm:$0xff]  ;;  %v8336_v40 = vpack.c.bf16 %v2454_v4, %v2450_v61  ;;  %v8342_v22 = vpack.c.bf16 %v2463_v53, %v2459_v24  ;;  %v2458_v47 = vld [vmem:[%s9251_s9 + $0x1c0] sm:$0xff] }
 0xb22   :  { %9432 = vst [vmem:[#allocation32_spill] sm:$0xff] %v8282_v26  ;;  %9433 = vst [vmem:[#allocation33_spill] sm:$0xff] %v8300_v34  ;;  %v2465_v18 = vld [vmem:[%s9251_s9 + $0x1f8] sm:$0xff]  ;;  %v2462_v11 = vld [vmem:[%s9251_s9 + $0x1e0] sm:$0xff] }
 0xb23   :  { %5793 = vmatpush1.bf16.msra.mxu1 %v8232_v30  ;;  %9434 = vst [vmem:[#allocation34_spill] sm:$0xff] %v8304_v51  ;;  %9435 = vst [vmem:[#allocation35_spill] sm:$0xff] %v8306_v56  ;;  %v2460_v61 = vld [vmem:[%s9251_s9 + $0x1d0] sm:$0xff]  ;;  %v8354_v4 = vpack.c.bf16 %v2465_v18, %v2461_v14  ;;  %v2467_v23 = vld [vmem:[%s9251_s9 + $0x208] sm:$0xff]  ;;  %v8372_v18 = vpack.c.bf16 %v2462_v11, %v2458_v47 }
 0xb24   :  { %5795 = vmatprep.subr.bf16.mxu1 %v8246_v62  ;;  %5733 = vmatpush1.bf16.msra.mxu0 %v8264_v42  ;;  %9436 = vst [vmem:[#allocation36_spill] sm:$0xff] %v8318_v10  ;;  %9437 = vst [vmem:[#allocation37_spill] sm:$0xff] %v8336_v40  ;;  %v2464_v60 = vld [vmem:[%s9251_s9 + $0x1f0] sm:$0xff]  ;;  %v2471_v24 = vld [vmem:[%s9251_s9 + $0x228] sm:$0xff] }
 0xb25   :  { %5735 = vmatprep.subr.bf16.mxu0 %v8270_v52  ;;  %9438 = vst [vmem:[#allocation38_spill] sm:$0xff] %v8340_v29  ;;  %9439 = vst [vmem:[#allocation39_spill] sm:$0xff] %v8342_v22  ;;  %v2469_v53 = vld [vmem:[%s9251_s9 + $0x218] sm:$0xff]  ;;  %v8376_v3 = vpack.c.bf16 %v2464_v60, %v2460_v61  ;;  %v8378_v0 = vpack.c.bf16 %v2471_v24, %v2467_v23  ;;  %v2468_v47 = vld [vmem:[%s9251_s9 + $0x210] sm:$0xff] }
 0xb26   :  { %9440 = vst [vmem:[#allocation40_spill] sm:$0xff] %v8354_v4  ;;  %v2473_v14 = vld [vmem:[%s9251_s9 + $0x238] sm:$0xff]  ;;  %9441 = vst [vmem:[#allocation41_spill] sm:$0xff] %v8372_v18  ;;  %v2472_v61 = vld [vmem:[%s9251_s9 + $0x230] sm:$0xff] }
 0xb27   :  { %5797 = vmatpush1.bf16.msra.mxu1 %v8268_v43  ;;  %9442 = vst [vmem:[#allocation42_spill] sm:$0xff] %v8376_v3  ;;  %9443 = vst [vmem:[#allocation43_spill] sm:$0xff] %v8378_v0  ;;  %v8390_v11 = vpack.c.bf16 %v2473_v14, %v2469_v53  ;;  %v2475_v60 = vld [vmem:[%s9251_s9 + $0x248] sm:$0xff]  ;;  %v2477_v24 = vld [vmem:[%s9251_s9 + $0x258] sm:$0xff]  ;;  %v8408_v14 = vpack.c.bf16 %v2470_v5, %v2466_v50  ;;  %v8412_v33 = vpack.c.bf16 %v2472_v61, %v2468_v47 }
 0xb28   :  { %5799 = vmatprep.subr.bf16.mxu1 %v8282_v26  ;;  %5737 = vmatpush1.bf16.msra.mxu0 %v8300_v34  ;;  %v2479_v23 = vld [vmem:[%s9251_s9 + $0x268] sm:$0xff]  ;;  %v2481_v53 = vld [vmem:[%s9251_s9 + $0x278] sm:$0xff]  ;;  %v2476_v5 = vld [vmem:[%s9251_s9 + $0x250] sm:$0xff] }
 0xb29   :  { %5739 = vmatprep.subr.bf16.mxu0 %v8306_v56  ;;  %9444 = vst [vmem:[#allocation44_spill] sm:$0xff] %v8390_v11  ;;  %9445 = vst [vmem:[#allocation45_spill] sm:$0xff] %v8408_v14  ;;  %v8414_v16 = vpack.c.bf16 %v2479_v23, %v2475_v60  ;;  %v8426_v50 = vpack.c.bf16 %v2481_v53, %v2477_v24  ;;  %v2480_v47 = vld [vmem:[%s9251_s9 + $0x270] sm:$0xff]  ;;  %v2483_v61 = vld [vmem:[%s9251_s9 + $0x288] sm:$0xff] }
 0xb2a   :  { %9446 = vst [vmem:[#allocation46_spill] sm:$0xff] %v8412_v33  ;;  %v2487_v60 = vld [vmem:[%s9251_s9 + $0x2a8] sm:$0xff]  ;;  %v2485_v23 = vld [vmem:[%s9251_s9 + $0x298] sm:$0xff] }
 0xb2b   :  { %5801 = vmatpush1.bf16.msra.mxu1 %v8304_v51  ;;  %9447 = vst [vmem:[#allocation47_spill] sm:$0xff] %v8414_v16  ;;  %9448 = vst [vmem:[#allocation48_spill] sm:$0xff] %v8426_v50  ;;  %v2489_v24 = vld [vmem:[%s9251_s9 + $0x2b8] sm:$0xff] }
 0xb2c   :  { %5803 = vmatprep.subr.bf16.mxu1 %v8318_v10  ;;  %5741 = vmatpush1.bf16.msra.mxu0 %v8336_v40  ;;  %v2486_v10 = vld [vmem:[%s9251_s9 + $0x2a0] sm:$0xff] }
 0xb2d   :  { %5743 = vmatprep.subr.bf16.mxu0 %v8342_v22 }
 0xb2f   :  { %5805 = vmatpush1.bf16.msra.mxu1 %v8340_v29  ;;  %v2482_v29 = vld [vmem:[%s9251_s9 + $0x280] sm:$0xff] }
 0xb30   :  { %5807 = vmatprep.subr.bf16.mxu1 %v8354_v4  ;;  %5745 = vmatpush1.bf16.msra.mxu0 %v8372_v18  ;;  %v2478_v4 = vld [vmem:[%s9251_s9 + $0x260] sm:$0xff] }
 0xb31   :  { %5747 = vmatprep.subr.bf16.mxu0 %v8378_v0  ;;  %v8444_v53 = vpack.c.bf16 %v2478_v4, %v2474_v39  ;;  %v2484_v39 = vld [vmem:[%s9251_s9 + $0x290] sm:$0xff]  ;;  %v8462_v4 = vpack.c.bf16 %v2489_v24, %v2485_v23  ;;  %v2497_v23 = vld [vmem:[%s9251_s9 + $0x2f8] sm:$0xff]  ;;  %v8480_v24 = vpack.c.bf16 %v2486_v10, %v2482_v29 }
 0xb33   :  { %5809 = vmatpush1.bf16.msra.mxu1 %v8376_v3  ;;  %9449 = vst [vmem:[#allocation49_spill] sm:$0xff] %v8444_v53  ;;  %v8450_v3 = vpack.c.bf16 %v2487_v60, %v2483_v61  ;;  %9452 = vst [vmem:[#allocation52_spill] sm:$0xff] %v8462_v4  ;;  %v2495_v61 = vld [vmem:[%s9251_s9 + $0x2e8] sm:$0xff]  ;;  %v2493_v60 = vld [vmem:[%s9251_s9 + $0x2d8] sm:$0xff] }
 0xb34   :  { %5811 = vmatprep.subr.bf16.mxu1 %v8390_v11  ;;  %5749 = vmatpush1.bf16.msra.mxu0 %v8408_v14  ;;  %v8448_v11 = vpack.c.bf16 %v2480_v47, %v2476_v5  ;;  %v2488_v5 = vld [vmem:[%s9251_s9 + $0x2b0] sm:$0xff]  ;;  %v2491_v47 = vld [vmem:[%s9251_s9 + $0x2c8] sm:$0xff]  ;;  %9453 = vst [vmem:[#allocation53_spill] sm:$0xff] %v8480_v24  ;;  %v8489_v51 = vpack.c.bf16 %v2497_v23, %v2493_v60 }
 0xb35   :  { %5751 = vmatprep.subr.bf16.mxu0 %v8414_v16  ;;  %9451 = vst [vmem:[#allocation51_spill] sm:$0xff] %v8450_v3 }
 0xb36   :  { %9450 = vst [vmem:[#allocation50_spill] sm:$0xff] %v8448_v11  ;;  %9456 = vst [vmem:[#allocation56_spill] sm:$0xff] %v8489_v51 }
 0xb37   :  { %5813 = vmatpush1.bf16.msra.mxu1 %v8412_v33  ;;  %v8486_v33 = vpack.c.bf16 %v2495_v61, %v2491_v47  ;;  %v2494_v47 = vld [vmem:[%s9251_s9 + $0x2e0] sm:$0xff]  ;;  %v2492_v61 = vld [vmem:[%s9251_s9 + $0x2d0] sm:$0xff] }
 0xb38   :  { %5815 = vmatprep.subr.bf16.mxu1 %v8426_v50  ;;  %5753 = vmatpush1.bf16.msra.mxu0 %v8444_v53  ;;  %v8484_v50 = vpack.c.bf16 %v2488_v5, %v2484_v39  ;;  %v2490_v5 = vld [vmem:[%s9251_s9 + $0x2c0] sm:$0xff] }
 0xb39   :  { %5755 = vmatprep.subr.bf16.mxu0 %v8450_v3  ;;  %9455 = vst [vmem:[#allocation55_spill] sm:$0xff] %v8486_v33 }
 0xb3a   :  { %9454 = vst [vmem:[#allocation54_spill] sm:$0xff] %v8484_v50 }
 0xb3b   :  { %5817 = vmatpush1.bf16.msra.mxu1 %v8448_v11 }
 0xb3c   :  { %5819 = vmatprep.subr.bf16.mxu1 %v8462_v4  ;;  %5757 = vmatpush1.bf16.msra.mxu0 %v8480_v24  ;;  %v2499_v4 = vld [vmem:[%s9251_s9 + $0x308] sm:$0xff] }
 0xb3d   :  { %5759 = vmatprep.subr.bf16.mxu0 %v8486_v33 }
 0xb3f   :  { %5821 = vmatpush1.bf16.msra.mxu1 %v8484_v50 }
 0xb40   :  { %5823 = vmatprep.subr.bf16.mxu1 %v8489_v51  ;;  %v2496_v51 = vld [vmem:[%s9251_s9 + $0x2f0] sm:$0xff] }
 0xb41   :  { %v8512_v50 = vpack.c.bf16 %v2496_v51, %v2492_v61  ;;  %v2505_v51 = vld [vmem:[%s9251_s9 + $0x338] sm:$0xff] }
 0xb43   :  { %9458 = vst [vmem:[#allocation58_spill] sm:$0xff] %v8512_v50  ;;  %5825 = vmatpush1.bf16.msra.mxu1 %v8512_v50 }
 0xbaa   :  { %v2707_v10 = vpop.xlane.xlu1 %2706 }
 0xbab   :  { %6633 = vrcp.f32 %v2707_v10  ;;  %v8507_v10 = vpack.c.bf16 %v2494_v47, %v2490_v5  ;;  %v2498_v5 = vld [vmem:[%s9251_s9 + $0x300] sm:$0xff] }
 0xbac   :  { %v2502_v47 = vld [vmem:[%s9251_s9 + $0x320] sm:$0xff] }
 0xbad   :  { %9457 = vst [vmem:[#allocation57_spill] sm:$0xff] %v8507_v10  ;;  %5761 = vmatpush1.bf16.msra.mxu0 %v8507_v10  ;;  %v8539_v11 = vpack.c.bf16 %v2502_v47, %v2498_v5  ;;  %v2513_v5 = vld [vmem:[%s9251_s9 + $0x378] sm:$0xff]  ;;  %v2506_v47 = vld [vmem:[%s9251_s9 + $0x340] sm:$0xff] }
 0xbaf   :  { %9461 = vst [vmem:[#allocation61_spill] sm:$0xff] %v8539_v11 }
 0xbb5   :  { %v6634_v29 = vpop.eup %6633 }
 0xbb6   :  { %v2713_v39 = vrot.slane %v6634_v29, %v7369_v28  ;;  %v2717_v23 = vrot.slane %v6634_v29, %v7375_v32  ;;  %v2501_v29 = vld [vmem:[%s9251_s9 + $0x318] sm:$0xff] }
 0xbb8   :  { %v2720_v60 = vmul.f32 %v8071_v25, %v2713_v39  ;;  %v2503_v25 = vld [vmem:[%s9251_s9 + $0x328] sm:$0xff]  ;;  %v2721_v61 = vmul.f32 %v8073_v35, %v2717_v23 }
 0xbb9   :  { %v8525_v39 = vpack.c.bf16 %v2503_v25, %v2499_v4  ;;  %v2500_v4 = vld [vmem:[%s9251_s9 + $0x310] sm:$0xff]  ;;  %v2507_v35 = vld [vmem:[%s9251_s9 + $0x348] sm:$0xff] }
 0xbba   :  { %2724 = vperm.xlu0 %6496, %v2720_v60   ;;  %v8537_v60 = vpack.c.bf16 %v2505_v51, %v2501_v29  ;;  %v2504_v25 = vld [vmem:[%s9251_s9 + $0x330] sm:$0xff]  ;;  %v2511_v23 = vld [vmem:[%s9251_s9 + $0x368] sm:$0xff]  ;;  %v2509_v29 = vld [vmem:[%s9251_s9 + $0x358] sm:$0xff] }
 0xbbb   :  { %9459 = vst [vmem:[#allocation59_spill] sm:$0xff] %v8525_v39  ;;  %5763 = vmatprep.subr.bf16.mxu0 %v8525_v39  ;;  %v8548_v50 = vpack.c.bf16 %v2504_v25, %v2500_v4  ;;  %v8562_v51 = vpack.c.bf16 %v2511_v23, %v2507_v35  ;;  %v8573_v4 = vpack.c.bf16 %v2513_v5, %v2509_v29  ;;  %v2508_v35 = vld [vmem:[%s9251_s9 + $0x350] sm:$0xff]  ;;  %v2515_v29 = vld [vmem:[%s9251_s9 + $0x388] sm:$0xff] }
 0xbbc   :  { %9460 = vst [vmem:[#allocation60_spill] sm:$0xff] %v8537_v60  ;;  %5827 = vmatprep.subr.bf16.mxu1 %v8537_v60  ;;  %5765 = vmatpush1.bf16.msra.mxu0 %v8539_v11  ;;  %v2512_v23 = vld [vmem:[%s9251_s9 + $0x370] sm:$0xff]  ;;  %v2519_v5 = vld [vmem:[%s9251_s9 + $0x3a8] sm:$0xff] }
 0xbbd   :  { %9462 = vst [vmem:[#allocation62_spill] sm:$0xff] %v8548_v50  ;;  %5829 = vmatpush1.bf16.msra.mxu1 %v8548_v50  ;;  %9463 = vst [vmem:[#allocation63_spill] sm:$0xff] %v8562_v51  ;;  %5767 = vmatprep.subr.bf16.mxu0 %v8562_v51  ;;  %v8584_v50 = vpack.c.bf16 %v2512_v23, %v2508_v35  ;;  %v2521_v35 = vld [vmem:[%s9251_s9 + $0x3b8] sm:$0xff]  ;;  %v2514_v23 = vld [vmem:[%s9251_s9 + $0x380] sm:$0xff] }
 0xbbe   :  { %2729 = vperm.xlu0 %6496, %v2721_v61   ;;  %v2510_v61 = vld [vmem:[%s9251_s9 + $0x360] sm:$0xff]  ;;  %9464 = vst [vmem:[#allocation64_spill] sm:$0xff] %v8573_v4  ;;  %5831 = vmatprep.subr.bf16.mxu1 %v8573_v4 }
 0xbbf   :  { %v8575_v25 = vpack.c.bf16 %v2510_v61, %v2506_v47  ;;  %9466 = vst [vmem:[#allocation66_spill] sm:$0xff] %v8584_v50  ;;  %v2517_v47 = vld [vmem:[%s9251_s9 + $0x398] sm:$0xff]  ;;  %v8598_v61 = vpack.c.bf16 %v2519_v5, %v2515_v29  ;;  %v2518_v4 = vld [vmem:[%s9251_s9 + $0x3a0] sm:$0xff]  ;;  %v2516_v29 = vld [vmem:[%s9251_s9 + $0x390] sm:$0xff] }
 0xbc0   :  { %v8609_v60 = vpack.c.bf16 %v2521_v35, %v2517_v47  ;;  %v8611_v26 = vpack.c.bf16 %v2518_v4, %v2514_v23  ;;  %v2520_v5 = vld [vmem:[%s9251_s9 + $0x3b0] sm:$0xff]  ;;  %v2523_v47 = vld [vmem:[%s9251_s9 + $0x3c8] sm:$0xff]  ;;  %v2525_v35 = vld [vmem:[%s9251_s9 + $0x3d8] sm:$0xff] }
 0xbc1   :  { %9465 = vst [vmem:[#allocation65_spill] sm:$0xff] %v8575_v25  ;;  %5769 = vmatpush1.bf16.msra.mxu0 %v8575_v25  ;;  %5833 = vmatpush1.bf16.msra.mxu1 %v8584_v50  ;;  %9467 = vst [vmem:[#allocation67_spill] sm:$0xff] %v8598_v61  ;;  %v8620_v50 = vpack.c.bf16 %v2520_v5, %v2516_v29  ;;  %v2527_v4 = vld [vmem:[%s9251_s9 + $0x3e8] sm:$0xff]  ;;  %v2529_v29 = vld [vmem:[%s9251_s9 + $0x3f8] sm:$0xff] }
 0xbc2   :  { %9468 = vst [vmem:[#allocation68_spill] sm:$0xff] %v8609_v60  ;;  %9469 = vst [vmem:[#allocation69_spill] sm:$0xff] %v8611_v26  ;;  %5771 = vmatprep.subr.bf16.mxu0 %v8598_v61  ;;  %5835 = vmatprep.subr.bf16.mxu1 %v8609_v60  ;;  %v8634_v23 = vpack.c.bf16 %v2527_v4, %v2523_v47  ;;  %v2522_v5 = vld [vmem:[%s9251_s9 + $0x3c0] sm:$0xff]  ;;  %v8645_v43 = vpack.c.bf16 %v2529_v29, %v2525_v35  ;;  %v2524_v47 = vld [vmem:[%s9251_s9 + $0x3d0] sm:$0xff]  ;;  %v8663_v35 = vpop.f32.mrb[22].mxu0 }
 0xbc3   :  { %9470 = vst [vmem:[#allocation70_spill] sm:$0xff] %v8620_v50  ;;  %v2526_v60 = vld [vmem:[%s9251_s9 + $0x3e0] sm:$0xff]  ;;  %v2528_v4 = vld [vmem:[%s9251_s9 + $0x3f0] sm:$0xff]  ;;  %9476 = vst [vmem:[#allocation75_spill] sm:$0xff] %v8663_v35  ;;  %v8665_v29 = vpop.f32.mrb[23].mxu0 }
 0xbc4   :  { %9471 = vst [vmem:[#allocation71_spill] sm:$0xff] %v8634_v23  ;;  %9472 = vst [vmem:[#allocation72_spill] sm:$0xff] %v8645_v43  ;;  %v8647_v62 = vpack.c.bf16 %v2526_v60, %v2522_v5  ;;  %v9475_v60 = vmov 0.0|0.0  }
 0xbc5   :  { %5773 = vmatpush1.bf16.msra.mxu0 %v8611_v26  ;;  %5837 = vmatpush1.bf16.msra.mxu1 %v8620_v50  ;;  %v8656_v50 = vpack.c.bf16 %v2528_v4, %v2524_v47  ;;  %9477 = vst [vmem:[#allocation76_spill] sm:$0xff] %v8665_v29 }
 0xbc6   :  { %9473 = vst [vmem:[#allocation73_spill] sm:$0xff] %v8647_v62  ;;  %5775 = vmatprep.subr.bf16.mxu0 %v8634_v23  ;;  %5839 = vmatprep.subr.bf16.mxu1 %v8645_v43 }
 0xbc7   :  { %9474 = vst [vmem:[#allocation74_spill] sm:$0xff] %v8656_v50 }
 0xbc9   :  { %5777 = vmatpush1.bf16.msra.mxu0 %v8647_v62  ;;  %5841 = vmatpush1.bf16.msra.mxu1 %v8656_v50 }
 0xbca   :  { %5842 = vmatprep.subr.bf16.mxu0 %v9475_v60  ;;  %5867 = vmatprep.subr.bf16.mxu1 %v8090_v19 }
 0xc39   :  { %v2725_v5 = vpop.permute.xlu0 %2724 }
 0xc3a   :  { %v2732_v30 = vmul.f32 %v2725_v5, %v7947_v8  ;;  %v9478_v8 = vmov 0.0  }
 0xc3c   :  { %v2734_v15 = vrot.slane %v2732_v30, 4 }
 0xc3d   :  { %v2730_v47 = vpop.permute.xlu0 %2729 }
 0xc3e   :  { %v2735_v4 = vadd.f32 %v2734_v15, %v2732_v30  ;;  %v2733_v43 = vmul.f32 %v2730_v47, %v7956_v31  ;;  %v9483_v30 = vld [vmem:[#allocation3_spill] sm:$0xff] }
 0xc40   :  { %v2736_v54 = vrot.slane %v2735_v4, 2  ;;  %v2740_v57 = vrot.slane %v2733_v43, 4 }
 0xc42   :  { %v2737_v63 = vadd.f32 %v2736_v54, %v2735_v4  ;;  %v2741_v50 = vadd.f32 %v2740_v57, %v2733_v43  ;;  %v9484_v43 = vsub.s32 3, %v9483_v30 }
 0xc44   :  { %v2742_v38 = vrot.slane %v2741_v50, 2  ;;  %v2738_v2 = vrot.slane %v2737_v63, 1 }
 0xc46   :  { %v2743_v13 = vadd.f32 %v2742_v38, %v2741_v50  ;;  %v2739_v21 = vadd.f32 %v2738_v2, %v2737_v63 }
 0xc48   :  { %v2744_v19 = vrot.slane %v2743_v13, 1 }
 0xc4a   :  { %v2745_v35 = vadd.f32 %v2744_v19, %v2743_v13 }
 0xc4c   :  { %v2748_v29 = vsel %vm2663_vm1, %v2745_v35, %v2739_v21  ;;  %v2226_v21 = vld [vmem:[%s9252_s10] sm:$0xf] }
 0xc4d   :  { %2815 = vmatmul.mubr.f32.vlgmr.msra.gmra.mrb[26].mxu0 %v2748_v29  ;;  %2886 = vmatmul.mubr.f32.vlgmr.msra.gmra.mrb[26].mxu1 %v2748_v29  ;;  %v8724_v13 = vrot.slane %v2226_v21, %v7369_v28  ;;  %v8727_v31 = vrot.slane %v2226_v21, %v7375_v32  ;;  %v8740_v50 = vrot.slane %v2226_v21, %v9484_v43 }
 0xc4e   :  { %5844 = vmatpush3.bf16.msra.mxu0 %v7777_v44  ;;  %4875 = vmatprep.mubr.msk.f32.mxu0 %vm6763_vm0, %v9478_v8 }
 0xc4f   :  { %5845 = vmatprep.subr.bf16.mxu0 %v9475_v60  ;;  %5869 = vmatpush1.bf16.msra.mxu1 %v8103_v12  ;;  %9479 = vst [vmem:[#allocation77_spill] sm:$0xff] %v8724_v13  ;;  %9480 = vst [vmem:[#allocation78_spill] sm:$0xff] %v8727_v31  ;;  %v8731_v19 = vadd.f32 %v8036_v6, %v8724_v13  ;;  %v8735_v2 = vadd.f32 %v8038_v7, %v8727_v31  ;;  %v9486_v6 = vld [vmem:[#allocation76_spill] sm:$0xff]  ;;  %v9488_v7 = vsub.s32 2, %v9483_v30  ;;  %v9490_v31 = vld [vmem:[#allocation75_spill] sm:$0xff] }
 0xc50   :  { %5871 = vmatprep.subr.bf16.mxu1 %v8128_v1  ;;  %9485 = vst [vmem:[#allocation3_spill] sm:$0xff] %v8740_v50  ;;  %v8745_v47 = vadd.f32 %v9486_v6, %v8740_v50 }
 0xc51   :  { %9481 = vst [vmem:[#allocation79_spill] sm:$0xff] %v8731_v19  ;;  %9482 = vst [vmem:[#allocation80_spill] sm:$0xff] %v8735_v2  ;;  %v8749_v4 = vrot.slane %v2226_v21, %v9488_v7  ;;  %v9492_v7 = vld [vmem:[#allocation7_spill] sm:$0xff] }
 0xc52   :  { %5847 = vmatpush3.bf16.msra.mxu0 %v7795_v9  ;;  %9487 = vst [vmem:[#allocation76_spill] sm:$0xff] %v8745_v47 }
 0xc53   :  { %5848 = vmatprep.subr.bf16.mxu0 %v9475_v60  ;;  %5873 = vmatpush1.bf16.msra.mxu1 %v8142_v46  ;;  %9489 = vst [vmem:[#allocation81_spill] sm:$0xff] %v8749_v4  ;;  %v8754_v43 = vadd.f32 %v9490_v31, %v8749_v4 }
 0xc54   :  { %5875 = vmatprep.subr.bf16.mxu1 %v8157_v20 }
 0xc55   :  { %9491 = vst [vmem:[#allocation75_spill] sm:$0xff] %v8754_v43 }
 0xc56   :  { %5850 = vmatpush3.bf16.msra.mxu0 %v7805_v41 }
 0xc57   :  { %5851 = vmatprep.subr.bf16.mxu0 %v9475_v60  ;;  %5877 = vmatpush1.bf16.msra.mxu1 %v8180_v37 }
 0xc58   :  { %5879 = vmatprep.subr.bf16.mxu1 %v8195_v59 }
 0xc5a   :  { %5853 = vmatpush3.bf16.msra.mxu0 %v7815_v58 }
 0xc5b   :  { %5854 = vmatprep.subr.bf16.mxu0 %v9475_v60  ;;  %5881 = vmatpush1.bf16.msra.mxu1 %v8228_v45 }
 0xc5c   :  { %5883 = vmatprep.subr.bf16.mxu1 %v8234_v49 }
 0xc5e   :  { %5856 = vmatpush3.bf16.msra.mxu0 %v7831_v27 }
 0xc5f   :  { %5857 = vmatprep.subr.bf16.mxu0 %v9475_v60  ;;  %5885 = vmatpush1.bf16.msra.mxu1 %v8264_v42 }
 0xc60   :  { %5887 = vmatprep.subr.bf16.mxu1 %v8270_v52 }
 0xc62   :  { %5859 = vmatpush3.bf16.msra.mxu0 %v7852_v55 }
 0xc63   :  { %5860 = vmatprep.subr.bf16.mxu0 %v9475_v60  ;;  %5889 = vmatpush1.bf16.msra.mxu1 %v8300_v34 }
 0xc64   :  { %5891 = vmatprep.subr.bf16.mxu1 %v8306_v56 }
 0xc66   :  { %5862 = vmatpush3.bf16.msra.mxu0 %v7876_v17 }
 0xc67   :  { %5863 = vmatprep.subr.bf16.mxu0 %v9475_v60  ;;  %5893 = vmatpush1.bf16.msra.mxu1 %v8336_v40 }
 0xc68   :  { %5895 = vmatprep.subr.bf16.mxu1 %v8342_v22 }
 0xc6a   :  { %5865 = vmatpush3.bf16.msra.mxu0 %v7892_v36 }
 0xc6b   :  { %5931 = vmatprep.subr.bf16.mxu0 %v8101_v48  ;;  %5897 = vmatpush1.bf16.msra.mxu1 %v8372_v18 }
 0xc6c   :  { %5899 = vmatprep.subr.bf16.mxu1 %v8378_v0 }
 0xc6f   :  { %5901 = vmatpush1.bf16.msra.mxu1 %v8408_v14 }
 0xc70   :  { %5903 = vmatprep.subr.bf16.mxu1 %v8414_v16 }
 0xc73   :  { %5905 = vmatpush1.bf16.msra.mxu1 %v8444_v53 }
 0xc74   :  { %5907 = vmatprep.subr.bf16.mxu1 %v8450_v3 }
 0xc77   :  { %5909 = vmatpush1.bf16.msra.mxu1 %v8480_v24 }
 0xc78   :  { %5911 = vmatprep.subr.bf16.mxu1 %v8486_v33 }
 0xc7b   :  { %5913 = vmatpush1.bf16.msra.mxu1 %v8507_v10 }
 0xc7c   :  { %5915 = vmatprep.subr.bf16.mxu1 %v8525_v39 }
 0xc7f   :  { %5917 = vmatpush1.bf16.msra.mxu1 %v8539_v11 }
 0xc80   :  { %5919 = vmatprep.subr.bf16.mxu1 %v8562_v51 }
 0xc83   :  { %5921 = vmatpush1.bf16.msra.mxu1 %v8575_v25 }
 0xc84   :  { %5923 = vmatprep.subr.bf16.mxu1 %v8598_v61 }
 0xc87   :  { %5925 = vmatpush1.bf16.msra.mxu1 %v8611_v26 }
 0xc88   :  { %5927 = vmatprep.subr.bf16.mxu1 %v8634_v23 }
 0xc8b   :  { %5929 = vmatpush1.bf16.msra.mxu1 %v8647_v62 }
 0xc8c   :  { %5994 = vmatprep.subr.bf16.mxu1 %v9475_v60 }
 0xd20   :  { %v2816_v38 = vpop.f32.mrb[26].mxu0  ;;  %v2887_v63 = vpop.f32.mrb[26].mxu1 }
 0xd21   :  { %v2892_v57 = vadd.f32 %v2816_v38, %v8731_v19  ;;  %v2818_v54 = vpop.f32.mrb[27].mxu0  ;;  %v2889_v15 = vpop.f32.mrb[27].mxu1 }
 0xd22   :  { %v2893_v35 = vadd.f32 %v2818_v54, %v8735_v2  ;;  %v2895_v38 = vadd.f32 %v2889_v15, %v8745_v47  ;;  %v2916_v15 = vrot.slane %v9492_v7, 6  ;;  %v9505_v7 = vld [vmem:[#allocation34_spill] sm:$0xff] }
 0xd23   :  { %v4636_v29 = vmul.f32 -1.442695, %v2892_v57  ;;  %v2894_v57 = vadd.f32 %v2887_v63, %v8754_v43 }
 0xd24   :  { %v4637_v5 = vmul.f32 -1.442695, %v2893_v35  ;;  %v4638_v13 = vmul.f32 -1.442695, %v2895_v38 }
 0xd25   :  { %6635 = vpow2.f32 %v4636_v29 }
 0xd26   :  { %6637 = vpow2.f32 %v4637_v5 }
 0xd27   :  { %6639 = vpow2.f32 %v4638_v13 }
 0xd28   :  { %6641 = vtanh.f32 %v2894_v57 }
 0xd2f   :  { %v6636_v54 = vpop.eup %6635 }
 0xd30   :  { %v6638_v35 = vpop.eup %6637  ;;  %v2899_v29 = vadd.f32 1.0, %v6636_v54  ;;  %v9495_v54 = vld [vmem:[#allocation14_spill] sm:$0xff] }
 0xd31   :  { %v2905_v6 = vadd.f32 1.0, %v6638_v35  ;;  %v6640_v30 = vpop.eup %6639  ;;  %v9496_v35 = vld [vmem:[#allocation16_spill] sm:$0xff] }
 0xd32   :  { %6643 = vrcp.f32 %v2899_v29  ;;  %v6642_v21 = vpop.eup %6641  ;;  %v2912_v31 = vadd.f32 1.0, %v6640_v30  ;;  %v9500_v29 = vld [vmem:[#allocation24_spill] sm:$0xff] }
 0xd33   :  { %6645 = vrcp.f32 %v2905_v6  ;;  %v9501_v6 = vld [vmem:[#allocation26_spill] sm:$0xff]  ;;  %v9502_v30 = vld [vmem:[#allocation28_spill] sm:$0xff] }
 0xd34   :  { %6647 = vrcp.f32 %v2912_v31  ;;  %v9507_v31 = vld [vmem:[#allocation38_spill] sm:$0xff] }
 0xd3c   :  { %v6644_v5 = vpop.eup %6643 }
 0xd3d   :  { %v6646_v50 = vpop.eup %6645  ;;  %v2919_v47 = vmul.f32 %v6644_v5, %v6642_v21  ;;  %v9503_v21 = vld [vmem:[#allocation30_spill] sm:$0xff]  ;;  %v9504_v5 = vld [vmem:[#allocation32_spill] sm:$0xff] }
 0xd3e   :  { %v2918_v4 = vmul.f32 %v6646_v50, %v2916_v15  ;;  %v6648_v63 = vpop.eup %6647  ;;  %v9497_v50 = vld [vmem:[#allocation18_spill] sm:$0xff]  ;;  %v9506_v15 = vld [vmem:[#allocation36_spill] sm:$0xff] }
 0xd40   :  { %v8758_v38 = vadd.f32 %v2919_v47, %v2918_v4  ;;  %v9498_v47 = vld [vmem:[#allocation20_spill] sm:$0xff]  ;;  %v9499_v4 = vld [vmem:[#allocation22_spill] sm:$0xff] }
 0xd42   :  { %9493 = vst [vmem:[#allocation7_spill] sm:$0xff] %v8758_v38  ;;  %6649 = vtanh.f32 %v8758_v38 }
 0xd4c   :  { %v6650_v13 = vpop.eup %6649 }
 0xd4d   :  { %v8761_v57 = vmul.f32 %v6650_v13, %v6648_v63  ;;  %v9508_v63 = vld [vmem:[#allocation40_spill] sm:$0xff]  ;;  %v9509_v13 = vld [vmem:[#allocation42_spill] sm:$0xff] }
 0xd4f   :  { %9494 = vst [vmem:[#allocation82_spill] sm:$0xff] %v8761_v57  ;;  %4876 = vmatmul.mubr.f32.vlgmr.msra.gmra.mrb[28].mxu0 %v8761_v57  ;;  %3195 = vmatprep.mubr.f32.mxu1 %v8761_v57 }
 0xd50   :  { %3266 = vmatprep.mubr.f32.mxu0 %v8761_v57  ;;  %5933 = vmatpush1.bf16.msra.mxu0 %v9495_v54  ;;  %v9510_v57 = vld [vmem:[#allocation44_spill] sm:$0xff] }
 0xd51   :  { %5935 = vmatprep.subr.bf16.mxu0 %v9496_v35 }
 0xd54   :  { %5937 = vmatpush1.bf16.msra.mxu0 %v9497_v50 }
 0xd55   :  { %5939 = vmatprep.subr.bf16.mxu0 %v9498_v47 }
 0xd58   :  { %5941 = vmatpush1.bf16.msra.mxu0 %v9499_v4 }
 0xd59   :  { %5943 = vmatprep.subr.bf16.mxu0 %v9500_v29  ;;  %v9511_v29 = vld [vmem:[#allocation46_spill] sm:$0xff] }
 0xd5c   :  { %5945 = vmatpush1.bf16.msra.mxu0 %v9501_v6  ;;  %v9512_v6 = vld [vmem:[#allocation48_spill] sm:$0xff] }
 0xd5d   :  { %5947 = vmatprep.subr.bf16.mxu0 %v9502_v30  ;;  %v9513_v30 = vld [vmem:[#allocation50_spill] sm:$0xff] }
 0xd60   :  { %5949 = vmatpush1.bf16.msra.mxu0 %v9503_v21  ;;  %v9514_v21 = vld [vmem:[#allocation52_spill] sm:$0xff] }
 0xd61   :  { %5951 = vmatprep.subr.bf16.mxu0 %v9504_v5  ;;  %v9515_v5 = vld [vmem:[#allocation54_spill] sm:$0xff] }
 0xd64   :  { %5953 = vmatpush1.bf16.msra.mxu0 %v9505_v7  ;;  %v9516_v7 = vld [vmem:[#allocation56_spill] sm:$0xff] }
 0xd65   :  { %5955 = vmatprep.subr.bf16.mxu0 %v9506_v15  ;;  %v9517_v15 = vld [vmem:[#allocation58_spill] sm:$0xff] }
 0xd68   :  { %5957 = vmatpush1.bf16.msra.mxu0 %v9507_v31  ;;  %v9518_v31 = vld [vmem:[#allocation60_spill] sm:$0xff] }
 0xd69   :  { %5959 = vmatprep.subr.bf16.mxu0 %v9508_v63  ;;  %v9519_v63 = vld [vmem:[#allocation62_spill] sm:$0xff] }
 0xd6c   :  { %5961 = vmatpush1.bf16.msra.mxu0 %v9509_v13  ;;  %v9520_v13 = vld [vmem:[#allocation64_spill] sm:$0xff] }
 0xd6d   :  { %5963 = vmatprep.subr.bf16.mxu0 %v9510_v57  ;;  %v9521_v57 = vld [vmem:[#allocation66_spill] sm:$0xff] }
 0xd70   :  { %5965 = vmatpush1.bf16.msra.mxu0 %v9511_v29  ;;  %v9522_v29 = vld [vmem:[#allocation68_spill] sm:$0xff] }
 0xd71   :  { %5967 = vmatprep.subr.bf16.mxu0 %v9512_v6  ;;  %v9523_v6 = vld [vmem:[#allocation70_spill] sm:$0xff] }
 0xd74   :  { %5969 = vmatpush1.bf16.msra.mxu0 %v9513_v30  ;;  %v9524_v30 = vld [vmem:[#allocation72_spill] sm:$0xff] }
 0xd75   :  { %5971 = vmatprep.subr.bf16.mxu0 %v9514_v21  ;;  %v9525_v21 = vld [vmem:[#allocation74_spill] sm:$0xff] }
 0xd78   :  { %5973 = vmatpush1.bf16.msra.mxu0 %v9515_v5  ;;  %v9526_v5 = vld [vmem:[#allocation12_spill] sm:$0xff] }
 0xd79   :  { %5975 = vmatprep.subr.bf16.mxu0 %v9516_v7 }
 0xd7c   :  { %5977 = vmatpush1.bf16.msra.mxu0 %v9517_v15  ;;  %v9527_v15 = vld [vmem:[#allocation6_spill] sm:$0xff] }
 0xd7d   :  { %5979 = vmatprep.subr.bf16.mxu0 %v9518_v31 }
 0xd80   :  { %5981 = vmatpush1.bf16.msra.mxu0 %v9519_v63 }
 0xd81   :  { %5983 = vmatprep.subr.bf16.mxu0 %v9520_v13 }
 0xd84   :  { %5985 = vmatpush1.bf16.msra.mxu0 %v9521_v57 }
 0xd85   :  { %5987 = vmatprep.subr.bf16.mxu0 %v9522_v29 }
 0xd88   :  { %5989 = vmatpush1.bf16.msra.mxu0 %v9523_v6  ;;  %v9528_v6 = vld [vmem:[#allocation9_spill] sm:$0xff] }
 0xd89   :  { %5991 = vmatprep.subr.bf16.mxu0 %v9524_v30  ;;  %v9529_v30 = vld [vmem:[#allocation8_spill] sm:$0xff] }
 0xd8c   :  { %5993 = vmatpush1.bf16.msra.mxu0 %v9525_v21  ;;  %v9530_v21 = vld [vmem:[#allocation10_spill] sm:$0xff] }
 0xd8d   :  { %6019 = vmatprep.subr.bf16.mxu0 %v9526_v5 }
 0xe22   :  { %v2989_v7 = vpop.f32.mrb[28].mxu0 }
 0xe23   :  { %v3000_v4 = vrot.slane %v2989_v7, %v9527_v15  ;;  %v4877_v31 = vpop.f32.mrb[29].mxu0 }
 0xe25   :  { %v3001_v47 = vcombine.high %v3000_v4, %v3000_v4  ;;  %v3008_v63 = vrot.slane %v3000_v4, %v9527_v15 }
 0xe27   :  { %v3015_v13 = vrot.slane %v3001_v47, %v9527_v15  ;;  %v3019_v57 = vrot.slane %v3008_v63, %v7369_v28  ;;  %v9531_v15 = vld [vmem:[#allocation11_spill] sm:$0xff] }
 0xe29   :  { %v3023_v29 = vrot.slane %v3015_v13, %v7369_v28  ;;  %v3026_v50 = vadd.f32 %v3019_v57, %v9528_v6 }
 0xe2b   :  { %v3027_v35 = vadd.f32 %v3023_v29, %v9529_v30  ;;  %6651 = vtanh.f32 %v3026_v50 }
 0xe2d   :  { %6653 = vtanh.f32 %v3027_v35 }
 0xe35   :  { %v6652_v5 = vpop.eup %6651 }
 0xe36   :  { %v3030_v54 = vmul.f32 %v6652_v5, %v9530_v21 }
 0xe37   :  { %v6654_v7 = vpop.eup %6653 }
 0xe38   :  { %3032 = vadd.xlane.f32.xlu1 %v3030_v54  ;;  %v3031_v31 = vmul.f32 %v6654_v7, %v9530_v21 }
 0xe3a   :  { %3034 = vadd.xlane.f32.xlu0 %v3031_v31 }
 0xec5   :  { %v3033_v4 = vpop.xlane.xlu1 %3032 }
 0xec6   :  { %v3041_v63 = vrot.slane %v3033_v4, %v9531_v15 }
 0xec7   :  { %v3035_v47 = vpop.xlane.xlu0 %3034 }
 0xec8   :  { %v3045_v13 = vrot.slane %v3035_v47, %v9531_v15 }
 0xeca   :  { %v3046_v57 = vsel %vm2663_vm1, %v3045_v13, %v3041_v63 }
 0xecb   :  { %v3048_v29 = vsel %vm2666_vm2, %v3046_v57, -inf }
 0xecc   :  { %3049 = vmax.xlane.f32.xlu1 %v3048_v29 }
 0xf59   :  { %v3050_v35 = vpop.xlane.xlu1 %3049 }
 0xf5a   :  { %v3055_v50 = vrot.slane %v3050_v35, %v7369_v28  ;;  %v3059_v5 = vrot.slane %v3050_v35, %v7375_v32 }
 0xf5c   :  { %v3062_v54 = vsub.f32 %v3033_v4, %v3055_v50  ;;  %v3063_v30 = vsub.f32 %v3035_v47, %v3059_v5 }
 0xf5e   :  { %v3064_v21 = vmul.f32 1.442695, %v3062_v54  ;;  %v3066_v7 = vmul.f32 1.442695, %v3063_v30 }
 0xf60   :  { %6655 = vpow2.f32 %v3064_v21 }
 0xf61   :  { %6657 = vpow2.f32 %v3066_v7 }
 0xf6a   :  { %v6656_v31 = vpop.eup %6655 }
 0xf6b   :  { %3071 = vperm.xlu1 %6495, %v6656_v31   ;;  %v6658_v6 = vpop.eup %6657 }
 0xf6f   :  { %3074 = vperm.xlu1 %6495, %v6658_v6  }
 0xfea   :  { %v3072_v38 = vpop.permute.xlu1 %3071 }
 0xfeb   :  { %v3079_v13 = vrot.slane %v3072_v38, %v9531_v15  ;;  %v8819_v38 = vld [vmem:[#allocation2] sm:$0xff] }
 0xfee   :  { %v3075_v63 = vpop.permute.xlu1 %3074 }
 0xfef   :  { %v3083_v57 = vrot.slane %v3075_v63, %v9531_v15 }
 0xff1   :  { %v3084_v29 = vsel %vm2663_vm1, %v3083_v57, %v3079_v13 }
 0xff2   :  { %v3086_v35 = vsel %vm2666_vm2, %v3084_v29, 0.0  ;;  %v8822_v29 = vld [vmem:[#allocation2 + $0x8] sm:$0xff] }
 0xff3   :  { %3087 = vadd.xlane.f32.xlu1 %v3086_v35 }
0x1080   :  { %v3088_v4 = vpop.xlane.xlu1 %3087 }
0x1081   :  { %6659 = vrcp.f32 %v3088_v4 }
0x108b   :  { %v6660_v47 = vpop.eup %6659 }
0x108c   :  { %v3094_v30 = vrot.slane %v6660_v47, %v7369_v28  ;;  %v3098_v5 = vrot.slane %v6660_v47, %v7375_v32 }
0x108e   :  { %v3101_v50 = vmul.f32 %v6656_v31, %v3094_v30  ;;  %v3102_v54 = vmul.f32 %v6658_v6, %v3098_v5 }
0x1090   :  { %3105 = vperm.xlu0 %6496, %v3101_v50  }
0x1094   :  { %3110 = vperm.xlu0 %6496, %v3102_v54  }
0x110f   :  { %v3106_v21 = vpop.permute.xlu0 %3105 }
0x1110   :  { %v3113_v7 = vmul.f32 %v8819_v38, %v3106_v21 }
0x1112   :  { %v3115_v63 = vrot.slane %v3113_v7, 4 }
0x1113   :  { %v3111_v13 = vpop.permute.xlu0 %3110 }
0x1114   :  { %v3116_v57 = vadd.f32 %v3115_v63, %v3113_v7  ;;  %v3114_v35 = vmul.f32 %v8822_v29, %v3111_v13 }
0x1116   :  { %v3117_v4 = vrot.slane %v3116_v57, 2  ;;  %v3121_v15 = vrot.slane %v3114_v35, 4 }
0x1118   :  { %v3118_v31 = vadd.f32 %v3117_v4, %v3116_v57  ;;  %v3122_v30 = vadd.f32 %v3121_v15, %v3114_v35 }
0x111a   :  { %v3123_v47 = vrot.slane %v3122_v30, 2  ;;  %v3119_v50 = vrot.slane %v3118_v31, 1 }
0x111c   :  { %v3124_v6 = vadd.f32 %v3123_v47, %v3122_v30  ;;  %v3120_v54 = vadd.f32 %v3119_v50, %v3118_v31  ;;  %v9532_v30 = vld [vmem:[#allocation76_spill] sm:$0xff] }
0x111e   :  { %v3125_v5 = vrot.slane %v3124_v6, 1 }
0x1120   :  { %v3126_v32 = vadd.f32 %v3125_v5, %v3124_v6 }
0x1122   :  { %v3129_v28 = vsel %vm2663_vm1, %v3126_v32, %v3120_v54 }
0x1123   :  { %3196 = vmatmul.mubr.f32.vlgmr.msra.gmra.mrb[28].mxu1 %v3129_v28  ;;  %3267 = vmatmul.mubr.f32.vlgmr.msra.gmra.mrb[30].mxu0 %v3129_v28 }
0x1124   :  { %5996 = vmatpush3.bf16.msra.mxu1 %v7777_v44  ;;  %4910 = vmatprep.mubr.msk.f32.mxu1 %vm6763_vm0, %v9478_v8 }
0x1125   :  { %5997 = vmatprep.subr.bf16.mxu1 %v9475_v60  ;;  %6021 = vmatpush1.bf16.msra.mxu0 %v8103_v12 }
0x1126   :  { %6023 = vmatprep.subr.bf16.mxu0 %v8128_v1 }
0x1128   :  { %5999 = vmatpush3.bf16.msra.mxu1 %v7795_v9 }
0x1129   :  { %6000 = vmatprep.subr.bf16.mxu1 %v9475_v60  ;;  %6025 = vmatpush1.bf16.msra.mxu0 %v8142_v46 }
0x112a   :  { %6027 = vmatprep.subr.bf16.mxu0 %v8157_v20 }
0x112c   :  { %6002 = vmatpush3.bf16.msra.mxu1 %v7805_v41 }
0x112d   :  { %6003 = vmatprep.subr.bf16.mxu1 %v9475_v60  ;;  %6029 = vmatpush1.bf16.msra.mxu0 %v8180_v37 }
0x112e   :  { %6031 = vmatprep.subr.bf16.mxu0 %v8195_v59 }
0x1130   :  { %6005 = vmatpush3.bf16.msra.mxu1 %v7815_v58 }
0x1131   :  { %6006 = vmatprep.subr.bf16.mxu1 %v9475_v60  ;;  %6033 = vmatpush1.bf16.msra.mxu0 %v8228_v45 }
0x1132   :  { %6035 = vmatprep.subr.bf16.mxu0 %v8234_v49 }
0x1134   :  { %6008 = vmatpush3.bf16.msra.mxu1 %v7831_v27 }
0x1135   :  { %6009 = vmatprep.subr.bf16.mxu1 %v9475_v60  ;;  %6037 = vmatpush1.bf16.msra.mxu0 %v8264_v42 }
0x1136   :  { %6039 = vmatprep.subr.bf16.mxu0 %v8270_v52 }
0x1138   :  { %6011 = vmatpush3.bf16.msra.mxu1 %v7852_v55 }
0x1139   :  { %6012 = vmatprep.subr.bf16.mxu1 %v9475_v60  ;;  %6041 = vmatpush1.bf16.msra.mxu0 %v8300_v34 }
0x113a   :  { %6043 = vmatprep.subr.bf16.mxu0 %v8306_v56 }
0x113c   :  { %6014 = vmatpush3.bf16.msra.mxu1 %v7876_v17 }
0x113d   :  { %6015 = vmatprep.subr.bf16.mxu1 %v9475_v60  ;;  %6045 = vmatpush1.bf16.msra.mxu0 %v8336_v40 }
0x113e   :  { %6047 = vmatprep.subr.bf16.mxu0 %v8342_v22 }
0x1140   :  { %6017 = vmatpush3.bf16.msra.mxu1 %v7892_v36 }
0x1141   :  { %6083 = vmatprep.subr.bf16.mxu1 %v8101_v48  ;;  %6049 = vmatpush1.bf16.msra.mxu0 %v8372_v18 }
0x1142   :  { %6051 = vmatprep.subr.bf16.mxu0 %v8378_v0 }
0x1145   :  { %6053 = vmatpush1.bf16.msra.mxu0 %v8408_v14 }
0x1146   :  { %6055 = vmatprep.subr.bf16.mxu0 %v8414_v16 }
0x1149   :  { %6057 = vmatpush1.bf16.msra.mxu0 %v8444_v53 }
0x114a   :  { %6059 = vmatprep.subr.bf16.mxu0 %v8450_v3 }
0x114d   :  { %6061 = vmatpush1.bf16.msra.mxu0 %v8480_v24 }
0x114e   :  { %6063 = vmatprep.subr.bf16.mxu0 %v8486_v33 }
0x1151   :  { %6065 = vmatpush1.bf16.msra.mxu0 %v8507_v10 }
0x1152   :  { %6067 = vmatprep.subr.bf16.mxu0 %v8525_v39 }
0x1155   :  { %6069 = vmatpush1.bf16.msra.mxu0 %v8539_v11 }
0x1156   :  { %6071 = vmatprep.subr.bf16.mxu0 %v8562_v51 }
0x1159   :  { %6073 = vmatpush1.bf16.msra.mxu0 %v8575_v25 }
0x115a   :  { %6075 = vmatprep.subr.bf16.mxu0 %v8598_v61 }
0x115d   :  { %6077 = vmatpush1.bf16.msra.mxu0 %v8611_v26 }
0x115e   :  { %6079 = vmatprep.subr.bf16.mxu0 %v8634_v23 }
0x1161   :  { %6081 = vmatpush1.bf16.msra.mxu0 %v8647_v62 }
0x1162   :  { %6146 = vmatprep.subr.bf16.mxu0 %v9475_v60 }
0x11f6   :  { %v3197_v28 = vpop.f32.mrb[28].mxu1  ;;  %v3268_v32 = vpop.f32.mrb[30].mxu0 }
0x11f7   :  { %v3277_v15 = vrot.slane %v3197_v28, 6  ;;  %v3199_v21 = vpop.f32.mrb[29].mxu1  ;;  %v3270_v7 = vpop.f32.mrb[31].mxu0  ;;  %v3279_v50 = vrot.slane %v3268_v32, 6 }
0x11f8   :  { %v3278_v63 = vrot.slane %v3199_v21, 6  ;;  %v3280_v31 = vrot.slane %v3270_v7, 6  ;;  %v9533_v7 = vld [vmem:[#allocation7_spill] sm:$0xff] }
0x11f9   :  { %v3285_v13 = vadd.f32 %v3277_v15, %v8731_v19  ;;  %v3287_v5 = vadd.f32 %v3279_v50, %v8754_v43 }
0x11fa   :  { %v3286_v57 = vadd.f32 %v3278_v63, %v8735_v2  ;;  %v3288_v47 = vadd.f32 %v3280_v31, %v9532_v30 }
0x11fb   :  { %v4639_v35 = vmul.f32 -1.442695, %v3285_v13 }
0x11fc   :  { %v4640_v4 = vmul.f32 -1.442695, %v3286_v57  ;;  %v4641_v6 = vmul.f32 -1.442695, %v3288_v47  ;;  %v3309_v57 = vrot.slane %v9533_v7, 6  ;;  %v9542_v7 = vld [vmem:[#allocation26_spill] sm:$0xff] }
0x11fd   :  { %6661 = vpow2.f32 %v4639_v35 }
0x11fe   :  { %6663 = vpow2.f32 %v4640_v4 }
0x11ff   :  { %6665 = vpow2.f32 %v4641_v6 }
0x1200   :  { %6667 = vtanh.f32 %v3287_v5 }
0x1207   :  { %v6662_v54 = vpop.eup %6661 }
0x1208   :  { %v6664_v28 = vpop.eup %6663  ;;  %v3292_v62 = vadd.f32 1.0, %v6662_v54  ;;  %v9536_v54 = vld [vmem:[#allocation14_spill] sm:$0xff] }
0x1209   :  { %v3298_v21 = vadd.f32 1.0, %v6664_v28  ;;  %v6666_v15 = vpop.eup %6665  ;;  %v9537_v28 = vld [vmem:[#allocation16_spill] sm:$0xff] }
0x120a   :  { %6669 = vrcp.f32 %v3292_v62  ;;  %v6668_v63 = vpop.eup %6667  ;;  %v3305_v31 = vadd.f32 1.0, %v6666_v15  ;;  %v9539_v15 = vld [vmem:[#allocation20_spill] sm:$0xff] }
0x120b   :  { %6671 = vrcp.f32 %v3298_v21  ;;  %v9538_v21 = vld [vmem:[#allocation18_spill] sm:$0xff] }
0x120c   :  { %6673 = vrcp.f32 %v3305_v31  ;;  %v9546_v31 = vld [vmem:[#allocation34_spill] sm:$0xff] }
0x1214   :  { %v6670_v13 = vpop.eup %6669 }
0x1215   :  { %v6672_v35 = vpop.eup %6671  ;;  %v3312_v4 = vmul.f32 %v6670_v13, %v6668_v63  ;;  %v9540_v63 = vld [vmem:[#allocation22_spill] sm:$0xff]  ;;  %v9541_v13 = vld [vmem:[#allocation24_spill] sm:$0xff] }
0x1216   :  { %v3311_v32 = vmul.f32 %v6672_v35, %v3309_v57  ;;  %v6674_v50 = vpop.eup %6673  ;;  %v9543_v57 = vld [vmem:[#allocation28_spill] sm:$0xff]  ;;  %v9544_v35 = vld [vmem:[#allocation30_spill] sm:$0xff] }
0x1218   :  { %v8881_v47 = vadd.f32 %v3312_v4, %v3311_v32  ;;  %v9545_v4 = vld [vmem:[#allocation32_spill] sm:$0xff] }
0x1219   :  { %v9547_v32 = vld [vmem:[#allocation36_spill] sm:$0xff] }
0x121a   :  { %9534 = vst [vmem:[#allocation10_spill] sm:$0xff] %v8881_v47  ;;  %6675 = vtanh.f32 %v8881_v47 }
0x1224   :  { %v6676_v6 = vpop.eup %6675 }
0x1225   :  { %v8884_v5 = vmul.f32 %v6676_v6, %v6674_v50  ;;  %v9548_v50 = vld [vmem:[#allocation38_spill] sm:$0xff]  ;;  %v9549_v6 = vld [vmem:[#allocation40_spill] sm:$0xff] }
0x1227   :  { %9535 = vst [vmem:[#allocation7_spill] sm:$0xff] %v8884_v5  ;;  %v3317_v62 = vrot.slane %v8884_v5, 2 }
0x1229   :  { %4911 = vmatmul.mubr.f32.vlgmr.msra.gmra.mrb[30].mxu1 %v3317_v62  ;;  %3591 = vmatprep.mubr.f32.mxu0 %v3317_v62 }
0x122a   :  { %3662 = vmatprep.mubr.f32.mxu1 %v3317_v62  ;;  %6085 = vmatpush1.bf16.msra.mxu1 %v9536_v54  ;;  %v9550_v62 = vld [vmem:[#allocation42_spill] sm:$0xff] }
0x122b   :  { %6087 = vmatprep.subr.bf16.mxu1 %v9537_v28 }
0x122e   :  { %6089 = vmatpush1.bf16.msra.mxu1 %v9538_v21 }
0x122f   :  { %6091 = vmatprep.subr.bf16.mxu1 %v9539_v15 }
0x1232   :  { %6093 = vmatpush1.bf16.msra.mxu1 %v9540_v63  ;;  %v9551_v63 = vld [vmem:[#allocation44_spill] sm:$0xff] }
0x1233   :  { %6095 = vmatprep.subr.bf16.mxu1 %v9541_v13  ;;  %v9552_v13 = vld [vmem:[#allocation46_spill] sm:$0xff] }
0x1236   :  { %6097 = vmatpush1.bf16.msra.mxu1 %v9542_v7  ;;  %v9553_v7 = vld [vmem:[#allocation48_spill] sm:$0xff] }
0x1237   :  { %6099 = vmatprep.subr.bf16.mxu1 %v9543_v57  ;;  %v9554_v57 = vld [vmem:[#allocation50_spill] sm:$0xff] }
0x123a   :  { %6101 = vmatpush1.bf16.msra.mxu1 %v9544_v35  ;;  %v9555_v35 = vld [vmem:[#allocation52_spill] sm:$0xff] }
0x123b   :  { %6103 = vmatprep.subr.bf16.mxu1 %v9545_v4  ;;  %v9556_v4 = vld [vmem:[#allocation54_spill] sm:$0xff] }
0x123e   :  { %6105 = vmatpush1.bf16.msra.mxu1 %v9546_v31  ;;  %v9557_v31 = vld [vmem:[#allocation56_spill] sm:$0xff] }
0x123f   :  { %6107 = vmatprep.subr.bf16.mxu1 %v9547_v32  ;;  %v9558_v32 = vld [vmem:[#allocation58_spill] sm:$0xff] }
0x1242   :  { %6109 = vmatpush1.bf16.msra.mxu1 %v9548_v50  ;;  %v9559_v50 = vld [vmem:[#allocation60_spill] sm:$0xff] }
0x1243   :  { %6111 = vmatprep.subr.bf16.mxu1 %v9549_v6  ;;  %v9560_v6 = vld [vmem:[#allocation62_spill] sm:$0xff] }
0x1246   :  { %6113 = vmatpush1.bf16.msra.mxu1 %v9550_v62  ;;  %v9561_v62 = vld [vmem:[#allocation64_spill] sm:$0xff] }
0x1247   :  { %6115 = vmatprep.subr.bf16.mxu1 %v9551_v63  ;;  %v9562_v63 = vld [vmem:[#allocation66_spill] sm:$0xff] }
0x124a   :  { %6117 = vmatpush1.bf16.msra.mxu1 %v9552_v13  ;;  %v9563_v13 = vld [vmem:[#allocation68_spill] sm:$0xff] }
0x124b   :  { %6119 = vmatprep.subr.bf16.mxu1 %v9553_v7  ;;  %v9564_v7 = vld [vmem:[#allocation70_spill] sm:$0xff] }
0x124e   :  { %6121 = vmatpush1.bf16.msra.mxu1 %v9554_v57  ;;  %v9565_v57 = vld [vmem:[#allocation72_spill] sm:$0xff] }
0x124f   :  { %6123 = vmatprep.subr.bf16.mxu1 %v9555_v35  ;;  %v9566_v35 = vld [vmem:[#allocation74_spill] sm:$0xff] }
0x1252   :  { %6125 = vmatpush1.bf16.msra.mxu1 %v9556_v4  ;;  %v9567_v4 = vld [vmem:[#allocation12_spill] sm:$0xff] }
0x1253   :  { %6127 = vmatprep.subr.bf16.mxu1 %v9557_v31 }
0x1256   :  { %6129 = vmatpush1.bf16.msra.mxu1 %v9558_v32  ;;  %v9568_v32 = vld [vmem:[#allocation6_spill] sm:$0xff] }
0x1257   :  { %6131 = vmatprep.subr.bf16.mxu1 %v9559_v50 }
0x125a   :  { %6133 = vmatpush1.bf16.msra.mxu1 %v9560_v6 }
0x125b   :  { %6135 = vmatprep.subr.bf16.mxu1 %v9561_v62 }
0x125e   :  { %6137 = vmatpush1.bf16.msra.mxu1 %v9562_v63  ;;  %v9569_v63 = vld [vmem:[#allocation4_spill] sm:$0xff] }
0x125f   :  { %6139 = vmatprep.subr.bf16.mxu1 %v9563_v13 }
0x1262   :  { %6141 = vmatpush1.bf16.msra.mxu1 %v9564_v7  ;;  %v9570_v7 = vld [vmem:[#allocation9_spill] sm:$0xff] }
0x1263   :  { %6143 = vmatprep.subr.bf16.mxu1 %v9565_v57  ;;  %v9571_v57 = vld [vmem:[#allocation8_spill] sm:$0xff] }
0x1266   :  { %6145 = vmatpush1.bf16.msra.mxu1 %v9566_v35 }
0x1267   :  { %6171 = vmatprep.subr.bf16.mxu1 %v9567_v4 }
0x12fc   :  { %v3385_v31 = vpop.f32.mrb[30].mxu1 }
0x12fd   :  { %v3396_v15 = vrot.slane %v3385_v31, %v9568_v32  ;;  %v4912_v50 = vpop.f32.mrb[31].mxu1  ;;  %v8929_v31 = vld [vmem:[%s9250_s7] ss:$0 sm:$0xff] }
0x12fe   :  { %9572 = vst [vmem:[#allocation83_spill] sm:$0xff] %v8929_v31 }
0x12ff   :  { %v3397_v21 = vcombine.high %v3396_v15, %v3396_v15  ;;  %v3404_v6 = vrot.slane %v3396_v15, %v9568_v32 }
0x1301   :  { %v3411_v62 = vrot.slane %v3397_v21, %v9568_v32  ;;  %v3415_v28 = vrot.slane %v3404_v6, %v9569_v63 }
0x1303   :  { %v3419_v13 = vrot.slane %v3411_v62, %v9569_v63  ;;  %v3422_v54 = vadd.f32 %v3415_v28, %v9570_v7  ;;  %v9573_v28 = vld [vmem:[#allocation11_spill] sm:$0xff] }
0x1305   :  { %v3423_v5 = vadd.f32 %v3419_v13, %v9571_v57  ;;  %6677 = vtanh.f32 %v3422_v54 }
0x1307   :  { %6679 = vtanh.f32 %v3423_v5 }
0x130f   :  { %v6678_v4 = vpop.eup %6677 }
0x1310   :  { %v3426_v15 = vmul.f32 %v8929_v31, %v6678_v4  ;;  %v9574_v4 = vld [vmem:[#allocation5_spill] sm:$0xff] }
0x1311   :  { %v6680_v50 = vpop.eup %6679 }
0x1312   :  { %3428 = vadd.xlane.f32.xlu0 %v3426_v15  ;;  %v3427_v21 = vmul.f32 %v8929_v31, %v6680_v50 }
0x1314   :  { %3430 = vadd.xlane.f32.xlu1 %v3427_v21 }
0x139f   :  { %v3429_v6 = vpop.xlane.xlu0 %3428 }
0x13a0   :  { %v3437_v7 = vrot.slane %v3429_v6, %v9573_v28 }
0x13a1   :  { %v3431_v62 = vpop.xlane.xlu1 %3430 }
0x13a2   :  { %v3441_v54 = vrot.slane %v3431_v62, %v9573_v28 }
0x13a4   :  { %v3442_v5 = vsel %vm2663_vm1, %v3441_v54, %v3437_v7 }
0x13a5   :  { %v3444_v13 = vsel %vm2666_vm2, %v3442_v5, -inf }
0x13a6   :  { %3445 = vmax.xlane.f32.xlu1 %v3444_v13 }
0x1433   :  { %v3446_v57 = vpop.xlane.xlu1 %3445 }
0x1434   :  { %v3451_v32 = vrot.slane %v3446_v57, %v9569_v63  ;;  %v3455_v35 = vrot.slane %v3446_v57, %v9574_v4 }
0x1436   :  { %v3458_v15 = vsub.f32 %v3429_v6, %v3451_v32  ;;  %v3459_v47 = vsub.f32 %v3431_v62, %v3455_v35 }
0x1438   :  { %v3460_v50 = vmul.f32 1.442695, %v3458_v15  ;;  %v3462_v21 = vmul.f32 1.442695, %v3459_v47 }
0x143a   :  { %6681 = vpow2.f32 %v3460_v50 }
0x143b   :  { %6683 = vpow2.f32 %v3462_v21 }
0x1444   :  { %v6682_v31 = vpop.eup %6681 }
0x1445   :  { %3467 = vperm.xlu1 %6495, %v6682_v31   ;;  %v6684_v43 = vpop.eup %6683 }
0x1449   :  { %3470 = vperm.xlu1 %6495, %v6684_v43  }
0x14c4   :  { %v3468_v30 = vpop.permute.xlu1 %3467 }
0x14c5   :  { %v3475_v54 = vrot.slane %v3468_v30, %v9573_v28 }
0x14c8   :  { %v3471_v7 = vpop.permute.xlu1 %3470 }
0x14c9   :  { %v3479_v5 = vrot.slane %v3471_v7, %v9573_v28 }
0x14cb   :  { %v3480_v13 = vsel %vm2663_vm1, %v3479_v5, %v3475_v54 }
0x14cc   :  { %v3482_v57 = vsel %vm2666_vm2, %v3480_v13, 0.0 }
0x14cd   :  { %3483 = vadd.xlane.f32.xlu0 %v3482_v57 }
0x155a   :  { %v3484_v35 = vpop.xlane.xlu0 %3483 }
0x155b   :  { %6685 = vrcp.f32 %v3484_v35 }
0x1565   :  { %v6686_v32 = vpop.eup %6685 }
0x1566   :  { %v3494_v47 = vrot.slane %v6686_v32, %v9574_v4  ;;  %v3490_v6 = vrot.slane %v6686_v32, %v9569_v63 }
0x1568   :  { %v3498_v62 = vmul.f32 %v6684_v43, %v3494_v47  ;;  %v3497_v15 = vmul.f32 %v6682_v31, %v3490_v6 }
0x156a   :  { %3506 = vperm.xlu0 %6496, %v3498_v62   ;;  %3501 = vperm.xlu1 %6495, %v3497_v15  }
0x15e9   :  { %v3507_v50 = vpop.permute.xlu0 %3506  ;;  %v3502_v30 = vpop.permute.xlu1 %3501 }
0x15ea   :  { %v3510_v21 = vmul.f32 %v8822_v29, %v3507_v50  ;;  %v3509_v7 = vmul.f32 %v8819_v38, %v3502_v30  ;;  %v9576_v50 = vld [vmem:[#allocation79_spill] sm:$0xff] }
0x15ec   :  { %v3517_v54 = vrot.slane %v3510_v21, 4  ;;  %v3511_v5 = vrot.slane %v3509_v7, 4 }
0x15ee   :  { %v3518_v13 = vadd.f32 %v3517_v54, %v3510_v21  ;;  %v3512_v57 = vadd.f32 %v3511_v5, %v3509_v7  ;;  %v9577_v21 = vld [vmem:[#allocation80_spill] sm:$0xff] }
0x15f0   :  { %v3519_v35 = vrot.slane %v3518_v13, 2  ;;  %v3513_v28 = vrot.slane %v3512_v57, 2 }
0x15f2   :  { %v3520_v2 = vadd.f32 %v3519_v35, %v3518_v13  ;;  %v3514_v4 = vadd.f32 %v3513_v28, %v3512_v57  ;;  %v9578_v57 = vld [vmem:[#allocation76_spill] sm:$0xff] }
0x15f4   :  { %v3521_v19 = vrot.slane %v3520_v2, 1  ;;  %v3515_v32 = vrot.slane %v3514_v4, 1 }
0x15f6   :  { %v3522_v43 = vadd.f32 %v3521_v19, %v3520_v2  ;;  %v3516_v31 = vadd.f32 %v3515_v32, %v3514_v4  ;;  %v9575_v19 = vld [vmem:[#allocation73_spill] sm:$0xff] }
0x15f8   :  { %v3525_v47 = vsel %vm2663_vm1, %v3522_v43, %v3516_v31  ;;  %v9579_v31 = vld [vmem:[#allocation75_spill] sm:$0xff] }
0x15f9   :  { %3592 = vmatmul.mubr.f32.vlgmr.msra.gmra.mrb[32].mxu0 %v3525_v47  ;;  %3663 = vmatmul.mubr.f32.vlgmr.msra.gmra.mrb[32].mxu1 %v3525_v47 }
0x15fa   :  { %6148 = vmatpush3.bf16.msra.mxu0 %v7777_v44  ;;  %4945 = vmatprep.mubr.msk.f32.mxu0 %vm6763_vm0, %v9478_v8 }
0x15fb   :  { %6149 = vmatprep.subr.bf16.mxu0 %v9475_v60  ;;  %6173 = vmatpush1.bf16.msra.mxu1 %v8103_v12 }
0x15fc   :  { %6175 = vmatprep.subr.bf16.mxu1 %v8128_v1  ;;  %v9618_v1 = vld [vmem:[#allocation8_spill] sm:$0xff] }
0x15fe   :  { %6151 = vmatpush3.bf16.msra.mxu0 %v7795_v9 }
0x15ff   :  { %6152 = vmatprep.subr.bf16.mxu0 %v9475_v60  ;;  %6177 = vmatpush1.bf16.msra.mxu1 %v8142_v46 }
0x1600   :  { %6179 = vmatprep.subr.bf16.mxu1 %v8157_v20  ;;  %v9617_v20 = vld [vmem:[#allocation9_spill] sm:$0xff] }
0x1602   :  { %6154 = vmatpush3.bf16.msra.mxu0 %v7805_v41 }
0x1603   :  { %6155 = vmatprep.subr.bf16.mxu0 %v9475_v60  ;;  %6181 = vmatpush1.bf16.msra.mxu1 %v8180_v37 }
0x1604   :  { %6183 = vmatprep.subr.bf16.mxu1 %v8195_v59 }
0x1606   :  { %6157 = vmatpush3.bf16.msra.mxu0 %v7815_v58 }
0x1607   :  { %6158 = vmatprep.subr.bf16.mxu0 %v9475_v60  ;;  %6185 = vmatpush1.bf16.msra.mxu1 %v8228_v45 }
0x1608   :  { %6187 = vmatprep.subr.bf16.mxu1 %v8234_v49 }
0x160a   :  { %6160 = vmatpush3.bf16.msra.mxu0 %v7831_v27 }
0x160b   :  { %6161 = vmatprep.subr.bf16.mxu0 %v9475_v60  ;;  %6189 = vmatpush1.bf16.msra.mxu1 %v8264_v42 }
0x160c   :  { %6191 = vmatprep.subr.bf16.mxu1 %v8270_v52 }
0x160e   :  { %6163 = vmatpush3.bf16.msra.mxu0 %v7852_v55 }
0x160f   :  { %6164 = vmatprep.subr.bf16.mxu0 %v9475_v60  ;;  %6193 = vmatpush1.bf16.msra.mxu1 %v8300_v34 }
0x1610   :  { %6195 = vmatprep.subr.bf16.mxu1 %v8306_v56  ;;  %v9616_v56 = vld [vmem:[#allocation6_spill] sm:$0xff] }
0x1612   :  { %6166 = vmatpush3.bf16.msra.mxu0 %v7876_v17 }
0x1613   :  { %6167 = vmatprep.subr.bf16.mxu0 %v9475_v60  ;;  %6197 = vmatpush1.bf16.msra.mxu1 %v8336_v40 }
0x1614   :  { %6199 = vmatprep.subr.bf16.mxu1 %v8342_v22  ;;  %v9615_v22 = vld [vmem:[#allocation74_spill] sm:$0xff] }
0x1616   :  { %6169 = vmatpush3.bf16.msra.mxu0 %v7892_v36 }
0x1617   :  { %6235 = vmatprep.subr.bf16.mxu0 %v8101_v48  ;;  %6201 = vmatpush1.bf16.msra.mxu1 %v8372_v18  ;;  %v9614_v18 = vld [vmem:[#allocation72_spill] sm:$0xff] }
0x1618   :  { %6203 = vmatprep.subr.bf16.mxu1 %v8378_v0  ;;  %v9613_v0 = vld [vmem:[#allocation70_spill] sm:$0xff] }
0x161b   :  { %6205 = vmatpush1.bf16.msra.mxu1 %v8408_v14  ;;  %v9612_v14 = vld [vmem:[#allocation68_spill] sm:$0xff] }
0x161c   :  { %6207 = vmatprep.subr.bf16.mxu1 %v8414_v16  ;;  %v9611_v16 = vld [vmem:[#allocation66_spill] sm:$0xff] }
0x161f   :  { %6209 = vmatpush1.bf16.msra.mxu1 %v8444_v53  ;;  %v9610_v53 = vld [vmem:[#allocation64_spill] sm:$0xff] }
0x1620   :  { %6211 = vmatprep.subr.bf16.mxu1 %v8450_v3  ;;  %v9609_v3 = vld [vmem:[#allocation62_spill] sm:$0xff] }
0x1623   :  { %6213 = vmatpush1.bf16.msra.mxu1 %v8480_v24  ;;  %v9608_v24 = vld [vmem:[#allocation60_spill] sm:$0xff] }
0x1624   :  { %6215 = vmatprep.subr.bf16.mxu1 %v8486_v33  ;;  %v9607_v33 = vld [vmem:[#allocation58_spill] sm:$0xff] }
0x1627   :  { %6217 = vmatpush1.bf16.msra.mxu1 %v8507_v10  ;;  %v9606_v10 = vld [vmem:[#allocation56_spill] sm:$0xff] }
0x1628   :  { %6219 = vmatprep.subr.bf16.mxu1 %v8525_v39  ;;  %v9605_v39 = vld [vmem:[#allocation54_spill] sm:$0xff] }
0x162b   :  { %6221 = vmatpush1.bf16.msra.mxu1 %v8539_v11  ;;  %v9604_v11 = vld [vmem:[#allocation52_spill] sm:$0xff] }
0x162c   :  { %6223 = vmatprep.subr.bf16.mxu1 %v8562_v51  ;;  %v9603_v51 = vld [vmem:[#allocation50_spill] sm:$0xff] }
0x162f   :  { %6225 = vmatpush1.bf16.msra.mxu1 %v8575_v25  ;;  %v9602_v25 = vld [vmem:[#allocation48_spill] sm:$0xff] }
0x1630   :  { %6227 = vmatprep.subr.bf16.mxu1 %v8598_v61  ;;  %v9601_v61 = vld [vmem:[#allocation46_spill] sm:$0xff] }
0x1633   :  { %6229 = vmatpush1.bf16.msra.mxu1 %v8611_v26 }
0x1634   :  { %6231 = vmatprep.subr.bf16.mxu1 %v8634_v23 }
0x1637   :  { %6233 = vmatpush1.bf16.msra.mxu1 %v9575_v19 }
0x1638   :  { %6298 = vmatprep.subr.bf16.mxu1 %v9475_v60 }
0x16cc   :  { %v3593_v2 = vpop.f32.mrb[32].mxu0  ;;  %v3664_v28 = vpop.f32.mrb[32].mxu1 }
0x16cd   :  { %v3673_v4 = vrot.slane %v3593_v2, 4  ;;  %v3595_v6 = vpop.f32.mrb[33].mxu0  ;;  %v3666_v62 = vpop.f32.mrb[33].mxu1  ;;  %v3675_v32 = vrot.slane %v3664_v28, 4 }
0x16ce   :  { %v3674_v15 = vrot.slane %v3595_v6, 4  ;;  %v3676_v13 = vrot.slane %v3666_v62, 4  ;;  %v9580_v62 = vld [vmem:[#allocation10_spill] sm:$0xff] }
0x16cf   :  { %v3681_v30 = vadd.f32 %v3673_v4, %v9576_v50  ;;  %v3683_v47 = vadd.f32 %v3675_v32, %v9579_v31 }
0x16d0   :  { %v3682_v7 = vadd.f32 %v3674_v15, %v9577_v21  ;;  %v3684_v35 = vadd.f32 %v3676_v13, %v9578_v57 }
0x16d1   :  { %v4642_v54 = vmul.f32 -1.442695, %v3681_v30 }
0x16d2   :  { %v4643_v5 = vmul.f32 -1.442695, %v3682_v7  ;;  %v4644_v43 = vmul.f32 -1.442695, %v3684_v35  ;;  %v3705_v7 = vrot.slane %v9580_v62, 6  ;;  %v9588_v62 = vld [vmem:[#allocation20_spill] sm:$0xff] }
0x16d3   :  { %6687 = vpow2.f32 %v4642_v54 }
0x16d4   :  { %6689 = vpow2.f32 %v4643_v5 }
0x16d5   :  { %6691 = vpow2.f32 %v4644_v43  ;;  %v9582_v43 = vld [vmem:[#allocation7_spill] sm:$0xff] }
0x16d6   :  { %6693 = vtanh.f32 %v3683_v47  ;;  %v9583_v47 = vld [vmem:[#allocation82_spill] sm:$0xff] }
0x16dd   :  { %v6688_v19 = vpop.eup %6687 }
0x16de   :  { %v6690_v2 = vpop.eup %6689  ;;  %v3688_v23 = vadd.f32 1.0, %v6688_v19 }
0x16df   :  { %v3694_v6 = vadd.f32 1.0, %v6690_v2  ;;  %v6692_v4 = vpop.eup %6691  ;;  %v4493_v2 = vsel %vm4492_vm3, %v9583_v47, %v9582_v43  ;;  %v9597_v43 = vld [vmem:[#allocation38_spill] sm:$0xff]  ;;  %v9598_v47 = vld [vmem:[#allocation40_spill] sm:$0xff] }
0x16e0   :  { %6695 = vrcp.f32 %v3688_v23  ;;  %v6694_v15 = vpop.eup %6693  ;;  %v3701_v13 = vadd.f32 1.0, %v6692_v4  ;;  %v9585_v4 = vld [vmem:[#allocation14_spill] sm:$0xff] }
0x16e1   :  { %6697 = vrcp.f32 %v3694_v6 }
0x16e2   :  { %6699 = vrcp.f32 %v3701_v13  ;;  %v9592_v13 = vld [vmem:[#allocation28_spill] sm:$0xff] }
0x16ea   :  { %v6696_v30 = vpop.eup %6695 }
0x16eb   :  { %v6698_v54 = vpop.eup %6697  ;;  %v3708_v5 = vmul.f32 %v6696_v30, %v6694_v15  ;;  %v9586_v15 = vld [vmem:[#allocation16_spill] sm:$0xff]  ;;  %v9587_v30 = vld [vmem:[#allocation18_spill] sm:$0xff] }
0x16ec   :  { %v3707_v28 = vmul.f32 %v6698_v54, %v3705_v7  ;;  %v6700_v19 = vpop.eup %6699  ;;  %v9589_v7 = vld [vmem:[#allocation22_spill] sm:$0xff]  ;;  %v9590_v54 = vld [vmem:[#allocation24_spill] sm:$0xff] }
0x16ee   :  { %v9003_v35 = vadd.f32 %v3708_v5, %v3707_v28  ;;  %v9591_v5 = vld [vmem:[#allocation26_spill] sm:$0xff] }
0x16ef   :  { %v9593_v28 = vld [vmem:[#allocation30_spill] sm:$0xff] }
0x16f0   :  { %9581 = vst [vmem:[#allocation79_spill] sm:$0xff] %v9003_v35  ;;  %6701 = vtanh.f32 %v9003_v35 }
0x16fa   :  { %v6702_v32 = vpop.eup %6701 }
0x16fb   :  { %v3711_v23 = vmul.f32 %v6702_v32, %v6700_v19  ;;  %v9594_v19 = vld [vmem:[#allocation32_spill] sm:$0xff]  ;;  %v9595_v32 = vld [vmem:[#allocation34_spill] sm:$0xff] }
0x16fd   :  { %v3713_v6 = vrot.slane %v3711_v23, 4  ;;  %v9008_v26 = vsel %vm4494_vm4, %v4493_v2, %v3711_v23  ;;  %v9596_v23 = vld [vmem:[#allocation36_spill] sm:$0xff]  ;;  %v9599_v2 = vld [vmem:[#allocation42_spill] sm:$0xff] }
0x16fe   :  { %9584 = vst [vmem:[#allocation10_spill] sm:$0xff] %v9008_v26  ;;  %v9619_v26 = vld [vmem:[#allocation83_spill] sm:$0xff] }
0x16ff   :  { %4946 = vmatmul.mubr.f32.vlgmr.msra.gmra.mrb[34].mxu0 %v3713_v6  ;;  %3987 = vmatprep.mubr.f32.mxu1 %v3713_v6 }
0x1700   :  { %4058 = vmatprep.mubr.f32.mxu0 %v3713_v6  ;;  %6237 = vmatpush1.bf16.msra.mxu0 %v9585_v4  ;;  %v9600_v6 = vld [vmem:[#allocation44_spill] sm:$0xff] }
0x1701   :  { %6239 = vmatprep.subr.bf16.mxu0 %v9586_v15 }
0x1704   :  { %6241 = vmatpush1.bf16.msra.mxu0 %v9587_v30 }
0x1705   :  { %6243 = vmatprep.subr.bf16.mxu0 %v9588_v62 }
0x1708   :  { %6245 = vmatpush1.bf16.msra.mxu0 %v9589_v7 }
0x1709   :  { %6247 = vmatprep.subr.bf16.mxu0 %v9590_v54 }
0x170c   :  { %6249 = vmatpush1.bf16.msra.mxu0 %v9591_v5 }
0x170d   :  { %6251 = vmatprep.subr.bf16.mxu0 %v9592_v13 }
0x1710   :  { %6253 = vmatpush1.bf16.msra.mxu0 %v9593_v28 }
0x1711   :  { %6255 = vmatprep.subr.bf16.mxu0 %v9594_v19 }
0x1714   :  { %6257 = vmatpush1.bf16.msra.mxu0 %v9595_v32 }
0x1715   :  { %6259 = vmatprep.subr.bf16.mxu0 %v9596_v23 }
0x1718   :  { %6261 = vmatpush1.bf16.msra.mxu0 %v9597_v43 }
0x1719   :  { %6263 = vmatprep.subr.bf16.mxu0 %v9598_v47 }
0x171c   :  { %6265 = vmatpush1.bf16.msra.mxu0 %v9599_v2 }
0x171d   :  { %6267 = vmatprep.subr.bf16.mxu0 %v9600_v6 }
0x1720   :  { %6269 = vmatpush1.bf16.msra.mxu0 %v9601_v61 }
0x1721   :  { %6271 = vmatprep.subr.bf16.mxu0 %v9602_v25 }
0x1724   :  { %6273 = vmatpush1.bf16.msra.mxu0 %v9603_v51 }
0x1725   :  { %6275 = vmatprep.subr.bf16.mxu0 %v9604_v11 }
0x1728   :  { %6277 = vmatpush1.bf16.msra.mxu0 %v9605_v39 }
0x1729   :  { %6279 = vmatprep.subr.bf16.mxu0 %v9606_v10 }
0x172c   :  { %6281 = vmatpush1.bf16.msra.mxu0 %v9607_v33 }
0x172d   :  { %6283 = vmatprep.subr.bf16.mxu0 %v9608_v24 }
0x1730   :  { %6285 = vmatpush1.bf16.msra.mxu0 %v9609_v3 }
0x1731   :  { %6287 = vmatprep.subr.bf16.mxu0 %v9610_v53 }
0x1734   :  { %6289 = vmatpush1.bf16.msra.mxu0 %v9611_v16 }
0x1735   :  { %6291 = vmatprep.subr.bf16.mxu0 %v9612_v14 }
0x1738   :  { %6293 = vmatpush1.bf16.msra.mxu0 %v9613_v0 }
0x1739   :  { %6295 = vmatprep.subr.bf16.mxu0 %v9614_v18 }
0x173c   :  { %6297 = vmatpush1.bf16.msra.mxu0 %v9615_v22 }
0x173d   :  { %6387 = vmatprep.subr.bf16.mxu0 %v8101_v48 }
0x17d2   :  { %v3781_v40 = vpop.f32.mrb[34].mxu0 }
0x17d3   :  { %v3792_v34 = vrot.slane %v3781_v40, %v9616_v56  ;;  %v4947_v52 = vpop.f32.mrb[35].mxu0 }
0x17d5   :  { %v3793_v42 = vcombine.high %v3792_v34, %v3792_v34  ;;  %v3800_v49 = vrot.slane %v3792_v34, %v9616_v56 }
0x17d7   :  { %v3807_v45 = vrot.slane %v3793_v42, %v9616_v56  ;;  %v3811_v59 = vrot.slane %v3800_v49, %v9569_v63  ;;  %v9620_v56 = vld [vmem:[#allocation11_spill] sm:$0xff] }
0x17d9   :  { %v3815_v37 = vrot.slane %v3807_v45, %v9569_v63  ;;  %v3818_v46 = vadd.f32 %v3811_v59, %v9617_v20 }
0x17db   :  { %v3819_v12 = vadd.f32 %v3815_v37, %v9618_v1  ;;  %6703 = vtanh.f32 %v3818_v46 }
0x17dd   :  { %6705 = vtanh.f32 %v3819_v12 }
0x17e5   :  { %v6704_v48 = vpop.eup %6703 }
0x17e6   :  { %v3822_v35 = vmul.f32 %v9619_v26, %v6704_v48  ;;  %v9621_v48 = vld [vmem:[#allocation5_spill] sm:$0xff] }
0x17e7   :  { %v6706_v40 = vpop.eup %6705 }
0x17e8   :  { %3824 = vadd.xlane.f32.xlu1 %v3822_v35  ;;  %v3823_v52 = vmul.f32 %v9619_v26, %v6706_v40 }
0x17ea   :  { %3826 = vadd.xlane.f32.xlu0 %v3823_v52 }
0x1875   :  { %v3825_v34 = vpop.xlane.xlu1 %3824 }
0x1876   :  { %v3833_v49 = vrot.slane %v3825_v34, %v9620_v56 }
0x1877   :  { %v3827_v42 = vpop.xlane.xlu0 %3826 }
0x1878   :  { %v3837_v45 = vrot.slane %v3827_v42, %v9620_v56 }
0x187a   :  { %v3838_v59 = vsel %vm2663_vm1, %v3837_v45, %v3833_v49 }
0x187b   :  { %v3840_v37 = vsel %vm2666_vm2, %v3838_v59, -inf }
0x187c   :  { %3841 = vmax.xlane.f32.xlu1 %v3840_v37 }
0x1909   :  { %v3842_v12 = vpop.xlane.xlu1 %3841 }
0x190a   :  { %v3847_v46 = vrot.slane %v3842_v12, %v9569_v63  ;;  %v3851_v1 = vrot.slane %v3842_v12, %v9621_v48 }
0x190c   :  { %v3854_v35 = vsub.f32 %v3825_v34, %v3847_v46  ;;  %v3855_v20 = vsub.f32 %v3827_v42, %v3851_v1 }
0x190e   :  { %v3856_v40 = vmul.f32 1.442695, %v3854_v35  ;;  %v3858_v52 = vmul.f32 1.442695, %v3855_v20 }
0x1910   :  { %6707 = vpow2.f32 %v3856_v40 }
0x1911   :  { %6709 = vpow2.f32 %v3858_v52 }
0x191a   :  { %v6708_v26 = vpop.eup %6707 }
0x191b   :  { %v6710_v31 = vpop.eup %6709  ;;  %3863 = vperm.xlu1 %6495, %v6708_v26  }
0x191c   :  { %3866 = vperm.xlu0 %6496, %v6710_v31  }
0x199a   :  { %v3864_v57 = vpop.permute.xlu1 %3863 }
0x199b   :  { %v3867_v49 = vpop.permute.xlu0 %3866  ;;  %v3871_v45 = vrot.slane %v3864_v57, %v9620_v56 }
0x199c   :  { %v3875_v59 = vrot.slane %v3867_v49, %v9620_v56 }
0x199e   :  { %v3876_v37 = vsel %vm2663_vm1, %v3875_v59, %v3871_v45 }
0x199f   :  { %v3878_v12 = vsel %vm2666_vm2, %v3876_v37, 0.0 }
0x19a0   :  { %3879 = vadd.xlane.f32.xlu1 %v3878_v12 }
0x1a2d   :  { %v3880_v1 = vpop.xlane.xlu1 %3879 }
0x1a2e   :  { %6711 = vrcp.f32 %v3880_v1 }
0x1a38   :  { %v6712_v20 = vpop.eup %6711 }
0x1a39   :  { %v3886_v34 = vrot.slane %v6712_v20, %v9569_v63  ;;  %v3890_v46 = vrot.slane %v6712_v20, %v9621_v48 }
0x1a3b   :  { %v3893_v42 = vmul.f32 %v6708_v26, %v3886_v34  ;;  %v3894_v35 = vmul.f32 %v6710_v31, %v3890_v46  ;;  %v9636_v46 = vld [vmem:[#allocation29_spill] sm:$0xff] }
0x1a3d   :  { %3897 = vperm.xlu0 %6496, %v3893_v42  }
0x1a41   :  { %3902 = vperm.xlu0 %6496, %v3894_v35   ;;  %v9637_v35 = vld [vmem:[#allocation31_spill] sm:$0xff] }
0x1abc   :  { %v3898_v40 = vpop.permute.xlu0 %3897 }
0x1abd   :  { %v3905_v57 = vmul.f32 %v8819_v38, %v3898_v40  ;;  %v9626_v38 = vld [vmem:[#allocation79_spill] sm:$0xff]  ;;  %v9638_v40 = vld [vmem:[#allocation33_spill] sm:$0xff] }
0x1abf   :  { %v3907_v52 = vrot.slane %v3905_v57, 4 }
0x1ac0   :  { %v3903_v49 = vpop.permute.xlu0 %3902 }
0x1ac1   :  { %v3908_v45 = vadd.f32 %v3907_v52, %v3905_v57  ;;  %v3906_v59 = vmul.f32 %v8822_v29, %v3903_v49  ;;  %v4101_v29 = vrot.slane %v9626_v38, 6  ;;  %v9639_v57 = vld [vmem:[#allocation35_spill] sm:$0xff]  ;;  %v9640_v52 = vld [vmem:[#allocation37_spill] sm:$0xff] }
0x1ac2   :  { %v9641_v49 = vld [vmem:[#allocation39_spill] sm:$0xff] }
0x1ac3   :  { %v3909_v37 = vrot.slane %v3908_v45, 2  ;;  %v3913_v12 = vrot.slane %v3906_v59, 4 }
0x1ac5   :  { %v3910_v1 = vadd.f32 %v3909_v37, %v3908_v45  ;;  %v3914_v56 = vadd.f32 %v3913_v12, %v3906_v59  ;;  %v9642_v45 = vld [vmem:[#allocation41_spill] sm:$0xff]  ;;  %v9643_v59 = vld [vmem:[#allocation43_spill] sm:$0xff] }
0x1ac6   :  { %v9644_v37 = vld [vmem:[#allocation45_spill] sm:$0xff]  ;;  %v9645_v12 = vld [vmem:[#allocation47_spill] sm:$0xff] }
0x1ac7   :  { %v3915_v21 = vrot.slane %v3914_v56, 2  ;;  %v3911_v63 = vrot.slane %v3910_v1, 1 }
0x1ac9   :  { %v3916_v26 = vadd.f32 %v3915_v21, %v3914_v56  ;;  %v3912_v20 = vadd.f32 %v3911_v63, %v3910_v1  ;;  %v9646_v1 = vld [vmem:[#allocation49_spill] sm:$0xff] }
0x1acb   :  { %v3917_v34 = vrot.slane %v3916_v26, 1 }
0x1acd   :  { %v3918_v42 = vadd.f32 %v3917_v34, %v3916_v26  ;;  %v9647_v26 = vld [vmem:[#allocation51_spill] sm:$0xff]  ;;  %v9648_v34 = vld [vmem:[#allocation53_spill] sm:$0xff] }
0x1acf   :  { %v3921_v31 = vsel %vm2663_vm1, %v3918_v42, %v3912_v20  ;;  %v9649_v20 = vld [vmem:[#allocation55_spill] sm:$0xff]  ;;  %v9650_v42 = vld [vmem:[#allocation57_spill] sm:$0xff] }
0x1ad0   :  { %3988 = vmatmul.mubr.f32.vlgmr.msra.gmra.mrb[34].mxu1 %v3921_v31  ;;  %4059 = vmatmul.mubr.f32.vlgmr.msra.gmra.mrb[36].mxu0 %v3921_v31  ;;  %v9651_v31 = vld [vmem:[#allocation59_spill] sm:$0xff] }
0x1ad1   :  { %6300 = vmatpush3.bf16.msra.mxu1 %v7777_v44  ;;  %4980 = vmatprep.mubr.msk.f32.mxu1 %vm6763_vm0, %v9478_v8  ;;  %v9622_v44 = vld [vmem:[#allocation12_spill] sm:$0xff] }
0x1ad2   :  { %6301 = vmatprep.subr.bf16.mxu1 %v9475_v60  ;;  %6389 = vmatpush1.bf16.msra.mxu0 %v9585_v4 }
0x1ad3   :  { %6391 = vmatprep.subr.bf16.mxu0 %v9586_v15 }
0x1ad5   :  { %6303 = vmatpush3.bf16.msra.mxu1 %v7795_v9 }
0x1ad6   :  { %6304 = vmatprep.subr.bf16.mxu1 %v9475_v60  ;;  %6393 = vmatpush1.bf16.msra.mxu0 %v9587_v30 }
0x1ad7   :  { %6395 = vmatprep.subr.bf16.mxu0 %v9588_v62 }
0x1ad9   :  { %6306 = vmatpush3.bf16.msra.mxu1 %v7805_v41 }
0x1ada   :  { %6307 = vmatprep.subr.bf16.mxu1 %v9475_v60  ;;  %6397 = vmatpush1.bf16.msra.mxu0 %v9589_v7 }
0x1adb   :  { %6399 = vmatprep.subr.bf16.mxu0 %v9590_v54 }
0x1add   :  { %6309 = vmatpush3.bf16.msra.mxu1 %v7815_v58 }
0x1ade   :  { %6310 = vmatprep.subr.bf16.mxu1 %v9475_v60  ;;  %6401 = vmatpush1.bf16.msra.mxu0 %v9591_v5  ;;  %v9627_v5 = vld [vmem:[#allocation10_spill] sm:$0xff] }
0x1adf   :  { %6403 = vmatprep.subr.bf16.mxu0 %v9592_v13 }
0x1ae1   :  { %6312 = vmatpush3.bf16.msra.mxu1 %v7831_v27 }
0x1ae2   :  { %6313 = vmatprep.subr.bf16.mxu1 %v9475_v60  ;;  %6405 = vmatpush1.bf16.msra.mxu0 %v9593_v28  ;;  %v9628_v28 = vld [vmem:[#allocation13_spill] sm:$0xff] }
0x1ae3   :  { %6407 = vmatprep.subr.bf16.mxu0 %v9594_v19  ;;  %v9629_v19 = vld [vmem:[#allocation15_spill] sm:$0xff] }
0x1ae5   :  { %6315 = vmatpush3.bf16.msra.mxu1 %v7852_v55 }
0x1ae6   :  { %6316 = vmatprep.subr.bf16.mxu1 %v9475_v60  ;;  %6409 = vmatpush1.bf16.msra.mxu0 %v9595_v32  ;;  %v9630_v32 = vld [vmem:[#allocation17_spill] sm:$0xff] }
0x1ae7   :  { %6411 = vmatprep.subr.bf16.mxu0 %v9596_v23  ;;  %v9631_v23 = vld [vmem:[#allocation19_spill] sm:$0xff] }
0x1ae9   :  { %6318 = vmatpush3.bf16.msra.mxu1 %v7876_v17 }
0x1aea   :  { %6319 = vmatprep.subr.bf16.mxu1 %v9475_v60  ;;  %6413 = vmatpush1.bf16.msra.mxu0 %v9597_v43  ;;  %v9632_v43 = vld [vmem:[#allocation21_spill] sm:$0xff] }
0x1aeb   :  { %6415 = vmatprep.subr.bf16.mxu0 %v9598_v47  ;;  %v9633_v47 = vld [vmem:[#allocation23_spill] sm:$0xff] }
0x1aed   :  { %6321 = vmatpush3.bf16.msra.mxu1 %v7892_v36  ;;  %v9623_v36 = vld [vmem:[#allocation80_spill] sm:$0xff] }
0x1aee   :  { %6323 = vmatprep.subr.bf16.mxu1 %v9622_v44  ;;  %6417 = vmatpush1.bf16.msra.mxu0 %v9599_v2  ;;  %v9634_v2 = vld [vmem:[#allocation25_spill] sm:$0xff] }
0x1aef   :  { %6419 = vmatprep.subr.bf16.mxu0 %v9600_v6  ;;  %v9635_v6 = vld [vmem:[#allocation27_spill] sm:$0xff]  ;;  %v9652_v44 = vld [vmem:[#allocation61_spill] sm:$0xff] }
0x1af2   :  { %6421 = vmatpush1.bf16.msra.mxu0 %v9601_v61 }
0x1af3   :  { %6423 = vmatprep.subr.bf16.mxu0 %v9602_v25 }
0x1af6   :  { %6425 = vmatpush1.bf16.msra.mxu0 %v9603_v51 }
0x1af7   :  { %6427 = vmatprep.subr.bf16.mxu0 %v9604_v11 }
0x1afa   :  { %6429 = vmatpush1.bf16.msra.mxu0 %v9605_v39 }
0x1afb   :  { %6431 = vmatprep.subr.bf16.mxu0 %v9606_v10 }
0x1afe   :  { %6433 = vmatpush1.bf16.msra.mxu0 %v9607_v33 }
0x1aff   :  { %6435 = vmatprep.subr.bf16.mxu0 %v9608_v24 }
0x1b02   :  { %6437 = vmatpush1.bf16.msra.mxu0 %v9609_v3 }
0x1b03   :  { %6439 = vmatprep.subr.bf16.mxu0 %v9610_v53 }
0x1b06   :  { %6441 = vmatpush1.bf16.msra.mxu0 %v9611_v16 }
0x1b07   :  { %6443 = vmatprep.subr.bf16.mxu0 %v9612_v14 }
0x1b0a   :  { %6445 = vmatpush1.bf16.msra.mxu0 %v9613_v0  ;;  %v9624_v0 = vld [vmem:[#allocation76_spill] sm:$0xff] }
0x1b0b   :  { %6447 = vmatprep.subr.bf16.mxu0 %v9614_v18 }
0x1b0e   :  { %6449 = vmatpush1.bf16.msra.mxu0 %v9615_v22  ;;  %v9625_v22 = vld [vmem:[#allocation75_spill] sm:$0xff] }
0x1ba3   :  { %v3989_v9 = vpop.f32.mrb[34].mxu1  ;;  %v4060_v41 = vpop.f32.mrb[36].mxu0 }
0x1ba4   :  { %v4069_v58 = vrot.slane %v3989_v9, 2  ;;  %v3991_v27 = vpop.f32.mrb[35].mxu1  ;;  %v4062_v55 = vpop.f32.mrb[37].mxu0  ;;  %v4071_v18 = vrot.slane %v4060_v41, 2  ;;  %v9653_v9 = vld [vmem:[#allocation63_spill] sm:$0xff]  ;;  %v9654_v41 = vld [vmem:[#allocation65_spill] sm:$0xff] }
0x1ba5   :  { %v4070_v17 = vrot.slane %v3991_v27, 2  ;;  %v4072_v11 = vrot.slane %v4062_v55, 2  ;;  %v9656_v27 = vld [vmem:[#allocation69_spill] sm:$0xff]  ;;  %v9657_v55 = vld [vmem:[#allocation71_spill] sm:$0xff] }
0x1ba6   :  { %v4077_v3 = vadd.f32 %v4069_v58, %v9576_v50  ;;  %v4079_v24 = vadd.f32 %v4071_v18, %v9625_v22  ;;  %v9655_v58 = vld [vmem:[#allocation67_spill] sm:$0xff]  ;;  %v9661_v22 = vld [vmem:[#allocation9_spill] sm:$0xff] }
0x1ba7   :  { %v4078_v33 = vadd.f32 %v4070_v17, %v9623_v36  ;;  %v4080_v14 = vadd.f32 %v4072_v11, %v9624_v0  ;;  %v9658_v17 = vld [vmem:[#allocation73_spill] sm:$0xff]  ;;  %v9659_v36 = vld [vmem:[#allocation6_spill] sm:$0xff] }
0x1ba8   :  { %v4645_v56 = vmul.f32 -1.442695, %v4077_v3 }
0x1ba9   :  { %v4646_v16 = vmul.f32 -1.442695, %v4078_v33  ;;  %v4647_v53 = vmul.f32 -1.442695, %v4080_v14  ;;  %v9660_v14 = vld [vmem:[#allocation4_spill] sm:$0xff] }
0x1baa   :  { %6713 = vpow2.f32 %v4645_v56 }
0x1bab   :  { %6715 = vpow2.f32 %v4646_v16 }
0x1bac   :  { %6717 = vpow2.f32 %v4647_v53 }
0x1bad   :  { %6719 = vtanh.f32 %v4079_v24 }
0x1bb4   :  { %v6714_v10 = vpop.eup %6713 }
0x1bb5   :  { %v6716_v39 = vpop.eup %6715  ;;  %v4084_v51 = vadd.f32 1.0, %v6714_v10  ;;  %v9662_v10 = vld [vmem:[#allocation8_spill] sm:$0xff] }
0x1bb6   :  { %v4090_v25 = vadd.f32 1.0, %v6716_v39  ;;  %v6718_v61 = vpop.eup %6717 }
0x1bb7   :  { %6721 = vrcp.f32 %v4084_v51  ;;  %v6720_v60 = vpop.eup %6719  ;;  %v4097_v21 = vadd.f32 1.0, %v6718_v61 }
0x1bb8   :  { %6723 = vrcp.f32 %v4090_v25  ;;  %v9663_v25 = vld [vmem:[#allocation83_spill] sm:$0xff] }
0x1bb9   :  { %6725 = vrcp.f32 %v4097_v21 }
0x1bc1   :  { %v6722_v8 = vpop.eup %6721 }
0x1bc2   :  { %v6724_v63 = vpop.eup %6723  ;;  %v4104_v50 = vmul.f32 %v6722_v8, %v6720_v60 }
0x1bc3   :  { %v4103_v4 = vmul.f32 %v6724_v63, %v4101_v29  ;;  %v6726_v30 = vpop.eup %6725  ;;  %v9664_v63 = vld [vmem:[#allocation11_spill] sm:$0xff] }
0x1bc5   :  { %v9120_v15 = vadd.f32 %v4104_v50, %v4103_v4 }
0x1bc7   :  { %6727 = vtanh.f32 %v9120_v15 }
0x1bd1   :  { %v6728_v62 = vpop.eup %6727 }
0x1bd2   :  { %v4107_v7 = vmul.f32 %v6728_v62, %v6726_v30 }
0x1bd4   :  { %v4109_v54 = vrot.slane %v4107_v7, 6  ;;  %v9124_v13 = vsel %vm4496_vm5, %v9627_v5, %v4107_v7 }
0x1bd6   :  { %4981 = vmatmul.mubr.f32.vlgmr.msra.gmra.mrb[36].mxu1 %v4109_v54  ;;  %4454 = vmatprep.mubr.f32.mxu0 %v4109_v54 }
0x1bd7   :  { %4383 = vmatprep.mubr.f32.mxu1 %v4109_v54  ;;  %6325 = vmatpush1.bf16.msra.mxu1 %v9628_v28 }
0x1bd8   :  { %6327 = vmatprep.subr.bf16.mxu1 %v9629_v19 }
0x1bdb   :  { %6329 = vmatpush1.bf16.msra.mxu1 %v9630_v32 }
0x1bdc   :  { %6331 = vmatprep.subr.bf16.mxu1 %v9631_v23 }
0x1bdf   :  { %6333 = vmatpush1.bf16.msra.mxu1 %v9632_v43 }
0x1be0   :  { %6335 = vmatprep.subr.bf16.mxu1 %v9633_v47 }
0x1be3   :  { %6337 = vmatpush1.bf16.msra.mxu1 %v9634_v2 }
0x1be4   :  { %6339 = vmatprep.subr.bf16.mxu1 %v9635_v6 }
0x1be7   :  { %6341 = vmatpush1.bf16.msra.mxu1 %v9636_v46 }
0x1be8   :  { %6343 = vmatprep.subr.bf16.mxu1 %v9637_v35 }
0x1beb   :  { %6345 = vmatpush1.bf16.msra.mxu1 %v9638_v40 }
0x1bec   :  { %6347 = vmatprep.subr.bf16.mxu1 %v9639_v57 }
0x1bef   :  { %6349 = vmatpush1.bf16.msra.mxu1 %v9640_v52 }
0x1bf0   :  { %6351 = vmatprep.subr.bf16.mxu1 %v9641_v49 }
0x1bf3   :  { %6353 = vmatpush1.bf16.msra.mxu1 %v9642_v45 }
0x1bf4   :  { %6355 = vmatprep.subr.bf16.mxu1 %v9643_v59 }
0x1bf7   :  { %6357 = vmatpush1.bf16.msra.mxu1 %v9644_v37 }
0x1bf8   :  { %6359 = vmatprep.subr.bf16.mxu1 %v9645_v12 }
0x1bfb   :  { %6361 = vmatpush1.bf16.msra.mxu1 %v9646_v1  ;;  %v6758_v1 = vld [vmem:[#allocation2] sm:$0xff] }
0x1bfc   :  { %6363 = vmatprep.subr.bf16.mxu1 %v9647_v26 }
0x1bff   :  { %6365 = vmatpush1.bf16.msra.mxu1 %v9648_v34 }
0x1c00   :  { %6367 = vmatprep.subr.bf16.mxu1 %v9649_v20 }
0x1c03   :  { %6369 = vmatpush1.bf16.msra.mxu1 %v9650_v42 }
0x1c04   :  { %6371 = vmatprep.subr.bf16.mxu1 %v9651_v31  ;;  %v6759_v31 = vld [vmem:[#allocation2 + $0x8] sm:$0xff] }
0x1c07   :  { %6373 = vmatpush1.bf16.msra.mxu1 %v9652_v44 }
0x1c08   :  { %6375 = vmatprep.subr.bf16.mxu1 %v9653_v9 }
0x1c0b   :  { %6377 = vmatpush1.bf16.msra.mxu1 %v9654_v41 }
0x1c0c   :  { %6379 = vmatprep.subr.bf16.mxu1 %v9655_v58 }
0x1c0f   :  { %6381 = vmatpush1.bf16.msra.mxu1 %v9656_v27 }
0x1c10   :  { %6383 = vmatprep.subr.bf16.mxu1 %v9657_v55 }
0x1c13   :  { %6385 = vmatpush1.bf16.msra.mxu1 %v9658_v17 }
0x1ca9   :  { %v4177_v3 = vpop.f32.mrb[36].mxu1 }
0x1caa   :  { %v4188_v33 = vrot.slane %v4177_v3, %v9659_v36  ;;  %v4982_v56 = vpop.f32.mrb[37].mxu1 }
0x1cac   :  { %v4189_v16 = vcombine.high %v4188_v33, %v4188_v33  ;;  %v4196_v11 = vrot.slane %v4188_v33, %v9659_v36 }
0x1cae   :  { %v4203_v0 = vrot.slane %v4189_v16, %v9659_v36  ;;  %v4207_v18 = vrot.slane %v4196_v11, %v9660_v14  ;;  %v4498_v16 = vld [vmem:[%s9253_s11] sm:$0xff]  ;;  %v4499_v11 = vld [vmem:[%s9253_s11 + $0x8] sm:$0xff] }
0x1cb0   :  { %v4211_v53 = vrot.slane %v4203_v0, %v9660_v14  ;;  %v4214_v24 = vadd.f32 %v4207_v18, %v9661_v22  ;;  %v6450_v0 = vpack.c.bf16 %v4499_v11, %v4498_v16  ;;  %v4501_v18 = vld [vmem:[%s9253_s11 + $0x18] sm:$0xff]  ;;  %v4503_v22 = vld [vmem:[%s9253_s11 + $0x28] sm:$0xff] }
0x1cb2   :  { %v4215_v39 = vadd.f32 %v4211_v53, %v9662_v10  ;;  %6729 = vtanh.f32 %v4214_v24  ;;  %6451 = vmatprep.subr.bf16.mxu0 %v6450_v0  ;;  %v4502_v53 = vld [vmem:[%s9253_s11 + $0x20] sm:$0xff]  ;;  %v4504_v10 = vld [vmem:[%s9253_s11 + $0x30] sm:$0xff] }
0x1cb3   :  { %v6458_v24 = vpack.c.bf16 %v4503_v22, %v4502_v53 }
0x1cb4   :  { %6731 = vtanh.f32 %v4215_v39  ;;  %v4505_v39 = vld [vmem:[%s9253_s11 + $0x38] sm:$0xff] }
0x1cbc   :  { %v6730_v51 = vpop.eup %6729 }
0x1cbd   :  { %v4218_v61 = vmul.f32 %v9663_v25, %v6730_v51  ;;  %v6462_v51 = vpack.c.bf16 %v4505_v39, %v4504_v10 }
0x1cbe   :  { %v6732_v60 = vpop.eup %6731 }
0x1cbf   :  { %4220 = vadd.xlane.f32.xlu0 %v4218_v61  ;;  %v4219_v8 = vmul.f32 %v9663_v25, %v6732_v60  ;;  %v4506_v25 = vld [vmem:[%s9253_s11 + $0x40] sm:$0xff]  ;;  %v4507_v61 = vld [vmem:[%s9253_s11 + $0x48] sm:$0xff] }
0x1cc0   :  { %v6466_v60 = vpack.c.bf16 %v4507_v61, %v4506_v25 }
0x1cc1   :  { %4222 = vadd.xlane.f32.xlu1 %v4219_v8  ;;  %v4508_v8 = vld [vmem:[%s9253_s11 + $0x50] sm:$0xff] }
0x1d4c   :  { %v4221_v38 = vpop.xlane.xlu0 %4220 }
0x1d4d   :  { %v4229_v50 = vrot.slane %v4221_v38, %v9664_v63 }
0x1d4e   :  { %v4223_v29 = vpop.xlane.xlu1 %4222 }
0x1d4f   :  { %v4233_v21 = vrot.slane %v4223_v29, %v9664_v63 }
0x1d51   :  { %v4234_v4 = vsel %vm2663_vm1, %v4233_v21, %v4229_v50  ;;  %v4511_v50 = vld [vmem:[%s9253_s11 + $0x68] sm:$0xff] }
0x1d52   :  { %v4236_v30 = vsel %vm2666_vm2, %v4234_v4, -inf  ;;  %v4512_v4 = vld [vmem:[%s9253_s11 + $0x70] sm:$0xff] }
0x1d53   :  { %4237 = vmax.xlane.f32.xlu1 %v4236_v30  ;;  %v4513_v30 = vld [vmem:[%s9253_s11 + $0x78] sm:$0xff] }
0x1de0   :  { %v4238_v62 = vpop.xlane.xlu1 %4237 }
0x1de1   :  { %v4243_v7 = vrot.slane %v4238_v62, %v9660_v14  ;;  %v4247_v54 = vrot.slane %v4238_v62, %v9621_v48  ;;  %v6478_v62 = vpack.c.bf16 %v4513_v30, %v4512_v4 }
0x1de3   :  { %v4250_v5 = vsub.f32 %v4221_v38, %v4243_v7  ;;  %v4251_v28 = vsub.f32 %v4223_v29, %v4247_v54  ;;  %v4509_v38 = vld [vmem:[%s9253_s11 + $0x58] sm:$0xff] }
0x1de4   :  { %v6470_v29 = vpack.c.bf16 %v4509_v38, %v4508_v8 }
0x1de5   :  { %v4252_v19 = vmul.f32 1.442695, %v4250_v5  ;;  %v4254_v32 = vmul.f32 1.442695, %v4251_v28  ;;  %v9665_v5 = vld [vmem:[#allocation77_spill] sm:$0xff] }
0x1de7   :  { %6733 = vpow2.f32 %v4252_v19 }
0x1de8   :  { %6735 = vpow2.f32 %v4254_v32 }
0x1df1   :  { %v6734_v23 = vpop.eup %6733 }
0x1df2   :  { %v6736_v43 = vpop.eup %6735  ;;  %4259 = vperm.xlu1 %6495, %v6734_v23  }
0x1df3   :  { %4262 = vperm.xlu0 %6496, %v6736_v43  }
0x1e71   :  { %v4260_v47 = vpop.permute.xlu1 %4259 }
0x1e72   :  { %v4263_v2 = vpop.permute.xlu0 %4262  ;;  %v4267_v6 = vrot.slane %v4260_v47, %v9664_v63 }
0x1e73   :  { %v4271_v46 = vrot.slane %v4263_v2, %v9664_v63  ;;  %v4510_v63 = vld [vmem:[%s9253_s11 + $0x60] sm:$0xff] }
0x1e74   :  { %v6474_v21 = vpack.c.bf16 %v4511_v50, %v4510_v63 }
0x1e75   :  { %v4272_v35 = vsel %vm2663_vm1, %v4271_v46, %v4267_v6  ;;  %v9667_v6 = vld [vmem:[#allocation3_spill] sm:$0xff] }
0x1e76   :  { %v4274_v40 = vsel %vm2666_vm2, %v4272_v35, 0.0 }
0x1e77   :  { %4275 = vadd.xlane.f32.xlu1 %v4274_v40  ;;  %v9668_v40 = vld [vmem:[#allocation81_spill] sm:$0xff] }
0x1f04   :  { %v4276_v57 = vpop.xlane.xlu1 %4275 }
0x1f05   :  { %6737 = vrcp.f32 %v4276_v57 }
0x1f0f   :  { %v6738_v52 = vpop.eup %6737 }
0x1f10   :  { %v4282_v49 = vrot.slane %v6738_v52, %v9660_v14  ;;  %v4286_v59 = vrot.slane %v6738_v52, %v9621_v48  ;;  %v4500_v14 = vld [vmem:[%s9253_s11 + $0x10] sm:$0xff] }
0x1f12   :  { %v4289_v45 = vmul.f32 %v6734_v23, %v4282_v49  ;;  %v4290_v37 = vmul.f32 %v6736_v43, %v4286_v59  ;;  %v9666_v23 = vld [vmem:[#allocation78_spill] sm:$0xff] }
0x1f14   :  { %4293 = vperm.xlu0 %6496, %v4289_v45  }
0x1f18   :  { %4298 = vperm.xlu0 %6496, %v4290_v37  }
0x1f93   :  { %v4294_v12 = vpop.permute.xlu0 %4293 }
0x1f94   :  { %v4301_v26 = vmul.f32 %v6758_v1, %v4294_v12 }
0x1f96   :  { %v4303_v34 = vrot.slane %v4301_v26, 4 }
0x1f97   :  { %v4299_v20 = vpop.permute.xlu0 %4298 }
0x1f98   :  { %v4304_v42 = vadd.f32 %v4303_v34, %v4301_v26  ;;  %v4302_v44 = vmul.f32 %v6759_v31, %v4299_v20  ;;  %v4485_v26 = vrot.slane %v9120_v15, 6 }
0x1f9a   :  { %v4305_v9 = vrot.slane %v4304_v42, 2  ;;  %v4309_v41 = vrot.slane %v4302_v44, 4 }
0x1f9c   :  { %v4306_v58 = vadd.f32 %v4305_v9, %v4304_v42  ;;  %v4310_v27 = vadd.f32 %v4309_v41, %v4302_v44 }
0x1f9e   :  { %v4311_v55 = vrot.slane %v4310_v27, 2  ;;  %v4307_v17 = vrot.slane %v4306_v58, 1 }
0x1fa0   :  { %v4312_v3 = vadd.f32 %v4311_v55, %v4310_v27  ;;  %v4308_v48 = vadd.f32 %v4307_v17, %v4306_v58  ;;  %v4651_v27 = vld [vmem:[%s9254_s12] ss:$0 sm:$0xff] }
0x1fa2   :  { %v4313_v36 = vrot.slane %v4312_v3, 1 }
0x1fa4   :  { %v4314_v33 = vadd.f32 %v4313_v36, %v4312_v3 }
0x1fa6   :  { %v4317_v56 = vsel %vm2663_vm1, %v4314_v33, %v4308_v48 }
0x1fa7   :  { %4384 = vmatmul.mubr.f32.vlgmr.msra.gmra.mrb[22].mxu1 %v4317_v56  ;;  %4455 = vmatmul.mubr.f32.vlgmr.msra.gmra.mrb[24].mxu0 %v4317_v56 }
0x1fa8   :  { %5015 = vmatprep.mubr.f32.mxu0 %v9124_v13  ;;  %6453 = vmatpush3.bf16.msra.mxu0 %v6450_v0  ;;  %v6454_v13 = vpack.c.bf16 %v4501_v18, %v4500_v14 }
0x1faa   :  { %6455 = vmatprep.subr.bf16.mxu0 %v6454_v13 }
0x1fac   :  { %6457 = vmatpush3.bf16.msra.mxu0 %v6454_v13 }
0x1fad   :  { %6459 = vmatprep.subr.bf16.mxu0 %v6458_v24 }
0x1fb0   :  { %6461 = vmatpush3.bf16.msra.mxu0 %v6458_v24 }
0x1fb1   :  { %6463 = vmatprep.subr.bf16.mxu0 %v6462_v51 }
0x1fb4   :  { %6465 = vmatpush3.bf16.msra.mxu0 %v6462_v51 }
0x1fb5   :  { %6467 = vmatprep.subr.bf16.mxu0 %v6466_v60 }
0x1fb8   :  { %6469 = vmatpush3.bf16.msra.mxu0 %v6466_v60 }
0x1fb9   :  { %6471 = vmatprep.subr.bf16.mxu0 %v6470_v29 }
0x1fbc   :  { %6473 = vmatpush3.bf16.msra.mxu0 %v6470_v29 }
0x1fbd   :  { %6475 = vmatprep.subr.bf16.mxu0 %v6474_v21 }
0x1fc0   :  { %6477 = vmatpush3.bf16.msra.mxu0 %v6474_v21 }
0x1fc1   :  { %6479 = vmatprep.subr.bf16.mxu0 %v6478_v62 }
0x1fc4   :  { %6481 = vmatpush3.bf16.msra.mxu0 %v6478_v62 }
0x207a   :  { %v4385_v7 = vpop.f32.mrb[22].mxu1  ;;  %v4456_v54 = vpop.f32.mrb[24].mxu0 }
0x207b   :  { %v6482_v28 = vadd.f32 %v4385_v7, %v9665_v5  ;;  %v4387_v19 = vpop.f32.mrb[23].mxu1  ;;  %v4458_v32 = vpop.f32.mrb[25].mxu0  ;;  %v6484_v57 = vadd.f32 %v4456_v54, %v9668_v40 }
0x207c   :  { %v6483_v43 = vadd.f32 %v4387_v19, %v9666_v23  ;;  %v6485_v46 = vadd.f32 %v4458_v32, %v9667_v6 }
0x207d   :  { %v4648_v47 = vmul.f32 -1.442695, %v6482_v28 }
0x207e   :  { %v4649_v2 = vmul.f32 -1.442695, %v6483_v43  ;;  %v4650_v35 = vmul.f32 -1.442695, %v6485_v46 }
0x207f   :  { %6739 = vpow2.f32 %v4648_v47 }
0x2080   :  { %6741 = vpow2.f32 %v4649_v2 }
0x2081   :  { %6743 = vpow2.f32 %v4650_v35 }
0x2082   :  { %6745 = vtanh.f32 %v6484_v57 }
0x2089   :  { %v6740_v52 = vpop.eup %6739 }
0x208a   :  { %v6742_v49 = vpop.eup %6741  ;;  %v4468_v45 = vadd.f32 1.0, %v6740_v52 }
0x208b   :  { %v4474_v59 = vadd.f32 1.0, %v6742_v49  ;;  %v6744_v37 = vpop.eup %6743 }
0x208c   :  { %6747 = vrcp.f32 %v4468_v45  ;;  %v6746_v12 = vpop.eup %6745  ;;  %v4481_v42 = vadd.f32 1.0, %v6744_v37 }
0x208d   :  { %6749 = vrcp.f32 %v4474_v59 }
0x208e   :  { %6751 = vrcp.f32 %v4481_v42 }
0x2096   :  { %v6748_v1 = vpop.eup %6747 }
0x2097   :  { %v6750_v34 = vpop.eup %6749  ;;  %v4488_v20 = vmul.f32 %v6748_v1, %v6746_v12 }
0x2098   :  { %v4487_v31 = vmul.f32 %v6750_v34, %v4485_v26  ;;  %v6752_v9 = vpop.eup %6751 }
0x209a   :  { %v4489_v44 = vadd.f32 %v4488_v20, %v4487_v31 }
0x209c   :  { %6753 = vtanh.f32 %v4489_v44 }
0x20a6   :  { %v6754_v41 = vpop.eup %6753 }
0x20a7   :  { %v4491_v58 = vmul.f32 %v6754_v41, %v6752_v9 }
0x20a9   :  { %5016 = vmatmul.mubr.f32.vlgmr.msra.gmra.mrb[38].mxu0 %v4491_v58 }
0x217c   :  { %v5017_v55 = vpop.f32.mrb[38].mxu0 }
0x217d   :  { %v4593_v17 = vadd.f32 %v5017_v55, %v4651_v27  ;;  %v4587_v3 = vpop.f32.mrb[39].mxu0 }
0x217e   :  { %v4588_v36 = vadd.f32 %v4651_v27, %v4587_v3 }
0x217f   :  { %4597 = vst [vmem:[%s9255_s13 + $0x8] sm:$0x3] %v4593_v17 }
0x2180   :  { %4596 = vst [vmem:[%s9255_s13] sm:$0xff] %v4588_v36 }

</bundles_post_ra>
